<compile_context>
chip_gen: v7x
topology: tpu7x:2x2x1
jax: 0.10.0
libtpu: 0.0.40
codegen_flags: <defaults>
</compile_context>

<pallas_src>
import functools

import jax
import jax.numpy as jnp
import numpy as np
from jax import lax
from jax.experimental import pallas as pl
from jax.experimental.pallas import tpu as pltpu


def _round_up(v, m):
    return ((v + m - 1) // m) * m


def _cdiv(a, b):
    return (a + b - 1) // b


def decoder_kernel(x_ref, w1_ref, b1_ref, w2_ref, b2_ref, w3_ref, b3_ref,
                   out_ref, *, num_caps, unit_size):
    """One batch tile of the DecoderNet forward.

    x_ref   : [TB, C*U] f32   flattened digit-capsule outputs (batch tile)
    w*_ref  : bf16 weights [in, out];  b*_ref : f32 biases [1, out]
    out_ref : [TB, recon_pad] f32  (lane-padded; wrapper slices to 784)
    """
    C, U = num_caps, unit_size
    x = x_ref[...]                                   # [TB, E] f32
    TB, E = x.shape
    CP = 128                                         # lane-padded capsule axis

    # ---- capsule masking (reference `mask()`): keep only the longest capsule ----
    # membership[e, c] = 1 iff element e belongs to capsule c (zero for c >= C).
    e_row = lax.broadcasted_iota(jnp.int32, (E, CP), 0)
    c_col = lax.broadcasted_iota(jnp.int32, (E, CP), 1)
    membership = jnp.where((e_row >= c_col * U) & (e_row < (c_col + 1) * U),
                           1.0, 0.0)                              # [E, CP] f32

    # Squared capsule lengths via one tiny MXU dot (exact f32 accumulation so
    # the argmax matches the f32 reference / torch first-index semantics).
    lens2 = jnp.dot(x * x, membership,
                    preferred_element_type=jnp.float32,
                    precision=lax.Precision.HIGHEST)              # [TB, CP]
    max_len = jnp.max(lens2, axis=1, keepdims=True)               # [TB, 1]
    cap_pos = lax.broadcasted_iota(jnp.int32, (TB, CP), 1).astype(jnp.float32)
    # First index achieving the max (ties -> lowest index, like torch.max).
    best_c = jnp.min(jnp.where(lens2 >= max_len, cap_pos, float(CP)),
                     axis=1, keepdims=True)                       # [TB, 1] f32

    lo = best_c * float(U)                                        # [TB, 1]
    e_pos = lax.broadcasted_iota(jnp.int32, (TB, E), 1).astype(jnp.float32)
    keep = (e_pos >= lo) & (e_pos < lo + float(U))                # [TB, E]
    masked = jnp.where(keep, x, 0.0)

    # ---- fully connected decoder: bf16 MXU inputs, f32 accumulation ----
    h1 = jnp.dot(masked.astype(jnp.bfloat16), w1_ref[...],
                 preferred_element_type=jnp.float32) + b1_ref[...]
    h1 = jnp.maximum(h1, 0.0)
    h2 = jnp.dot(h1.astype(jnp.bfloat16), w2_ref[...],
                 preferred_element_type=jnp.float32) + b2_ref[...]
    h2 = jnp.maximum(h2, 0.0)
    z3 = jnp.dot(h2.astype(jnp.bfloat16), w3_ref[...],
                 preferred_element_type=jnp.float32) + b3_ref[...]
    # sigmoid: exp on EUP + exact reciprocal; exp(-z) -> inf gives 1/inf = 0.
    # (approx=True risks the 1e-4 tolerance, so kept exact.)
    out_ref[...] = pl.reciprocal(1.0 + jnp.exp(-z3), approx=False)


# Batch-tile cap: 256 sits in the recommended range for all of v5e/v6e/v7x
# (v5e goes MXU-bound earlier; v6e/v7x could use up to 512 at very large batch).
_TB_CAP = 256


@functools.partial(jax.jit, static_argnames=("recon_size",))
def decoder_net_forward(digit_caps_output, labels, params, *, recon_size=784):
    """Pallas-backed equivalent of DecoderNet.forward.

    NOTE: like the reference PyTorch module, `labels` is only used for the
    output-shape assertion; masking always selects the longest capsule.
    `params` must come from `to_inference_params` (bf16 weights, lane-padded fc3).
    """
    B, C, U = digit_caps_output.shape
    w1, b1, w2, b2, w3p, b3p = params
    fc1, fc2, recon_pad = w1.shape[1], w2.shape[1], w3p.shape[1]
    E = C * U

    x = digit_caps_output.reshape(B, E).astype(jnp.float32)

    # Batch tiling: activations/outputs stream over the grid, weights stay
    # VMEM-resident (constant index_map -> DMA'd once, single-buffered).
    # Pick the tile so the grid has >= 2 entries whenever the batch allows it
    # (keeps both v7x TensorCores busy); tiles are 8-row aligned.
    B8 = _round_up(B, 8)
    n_tiles = _cdiv(B8, _TB_CAP)
    if B8 >= 16:
        n_tiles = max(n_tiles, 2)
    TB = _round_up(_cdiv(B8, n_tiles), 8)
    padded_B = n_tiles * TB
    if padded_B != B:
        x = jnp.pad(x, ((0, padded_B - B), (0, 0)))

    kernel = functools.partial(decoder_kernel, num_caps=C, unit_size=U)
    resident = dict(pipeline_mode=pl.Buffered(1))   # fetch once, single buffer

    out = pl.pallas_call(
        kernel,
        out_shape=jax.ShapeDtypeStruct((padded_B, recon_pad), jnp.float32),
        grid=(n_tiles,),
        in_specs=[
            pl.BlockSpec((TB, E), lambda i: (i, 0)),                          # x: streams
            pl.BlockSpec((E, fc1), lambda i: (0, 0), **resident),             # w1 (bf16)
            pl.BlockSpec((1, fc1), lambda i: (0, 0), **resident),             # b1
            pl.BlockSpec((fc1, fc2), lambda i: (0, 0), **resident),           # w2 (bf16)
            pl.BlockSpec((1, fc2), lambda i: (0, 0), **resident),             # b2
            pl.BlockSpec((fc2, recon_pad), lambda i: (0, 0), **resident),     # w3 (bf16, padded)
            pl.BlockSpec((1, recon_pad), lambda i: (0, 0), **resident),       # b3 (padded)
        ],
        # recon_pad is a multiple of 128 -> lane-dense, unmasked output stores.
        out_specs=pl.BlockSpec((TB, recon_pad), lambda i: (i, 0)),
        compiler_params=pltpu.CompilerParams(
            dimension_semantics=("parallel",),
            # Peak is ~8-12 MiB at TB=256 (single-buffered bf16 weights,
            # double-buffered activation/output tiles, f32 intermediates);
            # 32 MiB leaves headroom and respects v7x's 32 MiB scoped default.
            vmem_limit_bytes=32 << 20,
        ),
    )(x, w1, b1.reshape(1, -1), w2, b2.reshape(1, -1), w3p, b3p.reshape(1, -1))

    out = out[:B, :recon_size]
    assert out.shape == (labels.shape[0], recon_size)
    return out


def decoder_net_ref(digit_caps_output, params, recon_size):
    """Pure-JAX reference with identical numerics (bf16 weights, f32 accum)."""
    w1, b1, w2, b2, w3, b3 = params
    x32 = digit_caps_output.astype(jnp.float32)
    lens2 = jnp.sum(x32 ** 2, axis=2)
    idx = jnp.argmax(lens2, axis=1)
    onehot = jax.nn.one_hot(idx, digit_caps_output.shape[1], dtype=jnp.float32)
    masked = x32 * onehot[:, :, None]
    x = masked.reshape(digit_caps_output.shape[0], -1)

    def dense(a, w, b):
        return jnp.dot(a.astype(w.dtype), w,
                       preferred_element_type=jnp.float32) + b

    h1 = jax.nn.relu(dense(x, w1, b1))
    h2 = jax.nn.relu(dense(h1, w2, b2))
    return jax.nn.sigmoid(dense(h2, w3, b3))[:, :recon_size]


def init_params(key, in_dim, fc1, fc2, recon):
    ks = jax.random.split(key, 6)

    def lin(kw, kb, fan_in, fan_out):
        bound = 1.0 / np.sqrt(fan_in)
        w = jax.random.uniform(kw, (fan_in, fan_out), jnp.float32, -bound, bound)
        b = jax.random.uniform(kb, (fan_out,), jnp.float32, -bound, bound)
        return w, b

    w1, b1 = lin(ks[0], ks[1], in_dim, fc1)
    w2, b2 = lin(ks[2], ks[3], fc1, fc2)
    w3, b3 = lin(ks[4], ks[5], fc2, recon)
    return (w1, b1, w2, b2, w3, b3)


def to_inference_params(params, *, lane=128):
    """Weights -> bf16 (halves weight HBM traffic), biases stay f32, and the
    fc3 output dimension is zero-padded to a lane multiple (784 -> 896) so the
    kernel's output stores are lane-dense.  Padded columns are exactly zero,
    so sliced outputs are bit-identical to the unpadded math."""
    w1, b1, w2, b2, w3, b3 = params
    recon = w3.shape[1]
    pad = (-recon) % lane
    w3p = jnp.pad(w3, ((0, 0), (0, pad)))
    b3p = jnp.pad(b3, ((0, pad),))
    return (w1.astype(jnp.bfloat16), b1,
            w2.astype(jnp.bfloat16), b2,
            w3p.astype(jnp.bfloat16), b3p)


if __name__ == "__main__":
    # CapsNet-style shapes: num_classes=10 capsules of output_unit_size=16.
    B, C, U = 2, 10, 16
    FC1, FC2, RECON = 512, 1024, 784

    key = jax.random.PRNGKey(0)
    k_caps, k_params = jax.random.split(key)
    digit_caps_output = jax.random.normal(k_caps, (B, C, U), jnp.float32)
    labels = jnp.zeros((B,), jnp.int32)   # only used for the output-shape assert

    params = init_params(k_params, C * U, FC1, FC2, RECON)
    infer_params = to_inference_params(params)   # bf16 weights, padded fc3

    out = jax.block_until_ready(
        decoder_net_forward(digit_caps_output, labels, infer_params,
                            recon_size=RECON))
    ref = jax.block_until_ready(
        decoder_net_ref(digit_caps_output, infer_params, RECON))

    np.testing.assert_allclose(np.asarray(out), np.asarray(ref),
                               rtol=1e-4, atol=1e-4)
    assert out.shape == (B, RECON)

    print("KERNEL_OK")
</pallas_src>

<mosaic_0001>
module attributes {stable_mosaic.version = 11 : i64} {
  func.func @decoder_kernel(%arg0: i32, %arg1: memref<8x160xf32, #tpu.memory_space<vmem>>, %arg2: memref<160x512xbf16, #tpu.memory_space<vmem>>, %arg3: memref<1x512xf32, #tpu.memory_space<vmem>>, %arg4: memref<512x1024xbf16, #tpu.memory_space<vmem>>, %arg5: memref<1x1024xf32, #tpu.memory_space<vmem>>, %arg6: memref<1024x896xbf16, #tpu.memory_space<vmem>>, %arg7: memref<1x896xf32, #tpu.memory_space<vmem>>, %arg8: memref<8x896xf32, #tpu.memory_space<vmem>>) attributes {dimension_semantics = [#tpu.dimension_semantics<parallel>], iteration_bounds = array<i64: 1>, scalar_prefetch = 0 : i64, scratch_operands = 0 : i64, tpu.core_type = #tpu.core_type<tc>, window_params = [{transform_indices = @transform_0, window_bounds = array<i64: 8, 160>}, {pipeline_mode = #tpu.pipeline_mode<synchronous>, transform_indices = @transform_1, window_bounds = array<i64: 160, 512>}, {pipeline_mode = #tpu.pipeline_mode<synchronous>, transform_indices = @transform_2, window_bounds = array<i64: 1, 512>}, {pipeline_mode = #tpu.pipeline_mode<synchronous>, transform_indices = @transform_3, window_bounds = array<i64: 512, 1024>}, {pipeline_mode = #tpu.pipeline_mode<synchronous>, transform_indices = @transform_4, window_bounds = array<i64: 1, 1024>}, {pipeline_mode = #tpu.pipeline_mode<synchronous>, transform_indices = @transform_5, window_bounds = array<i64: 1024, 896>}, {pipeline_mode = #tpu.pipeline_mode<synchronous>, transform_indices = @transform_6, window_bounds = array<i64: 1, 896>}, {transform_indices = @transform_7, window_bounds = array<i64: 8, 896>}]} {
    %c0 = arith.constant 0 : index
    %c0_0 = arith.constant 0 : index
    %0 = vector.load %arg1[%c0, %c0_0] : memref<8x160xf32, #tpu.memory_space<vmem>>, vector<8x160xf32>
    %1 = tpu.iota {dimensions = array<i32: 0>} : vector<160x128xi32>
    %2 = tpu.iota {dimensions = array<i32: 1>} : vector<160x128xi32>
    %c16_i32 = arith.constant 16 : i32
    %3 = vector.broadcast %c16_i32 : i32 to vector<160x128xi32>
    %4 = arith.muli %2, %3 : vector<160x128xi32>
    %5 = arith.cmpi sge, %1, %4 : vector<160x128xi32>
    %c1_i32 = arith.constant 1 : i32
    %6 = vector.broadcast %c1_i32 : i32 to vector<160x128xi32>
    %7 = arith.addi %2, %6 : vector<160x128xi32>
    %c16_i32_1 = arith.constant 16 : i32
    %8 = vector.broadcast %c16_i32_1 : i32 to vector<160x128xi32>
    %9 = arith.muli %7, %8 : vector<160x128xi32>
    %10 = arith.cmpi slt, %1, %9 : vector<160x128xi32>
    %11 = arith.andi %5, %10 : vector<160x128xi1>
    %cst = arith.constant 1.000000e+00 : f32
    %cst_2 = arith.constant 0.000000e+00 : f32
    %12 = vector.broadcast %cst : f32 to vector<160x128xf32>
    %13 = vector.broadcast %cst_2 : f32 to vector<160x128xf32>
    %14 = arith.select %11, %12, %13 : vector<160x128xi1>, vector<160x128xf32>
    %15 = arith.mulf %0, %0 : vector<8x160xf32>
    %cst_3 = arith.constant dense<0.000000e+00> : vector<8x128xf32>
    %16 = tpu.matmul %15, %14, %cst_3 {dimension_numbers = #tpu.dot_dimension_numbers<[1], [0], [0], [1], [0, 0, 1, 1], [], []>, precision = #tpu.contract_precision<fp32>} : vector<8x160xf32>, vector<160x128xf32>, vector<8x128xf32> -> vector<8x128xf32>
    %cst_4 = arith.constant dense<0xFF800000> : vector<8xf32>
    %17 = vector.multi_reduction <maximumf>, %16, %cst_4 [1] : vector<8x128xf32> to vector<8xf32>
    %18 = vector.shape_cast %17 : vector<8xf32> to vector<8x1xf32>
    %19 = tpu.iota {dimensions = array<i32: 1>} : vector<8x128xi32>
    %20 = arith.sitofp %19 : vector<8x128xi32> to vector<8x128xf32>
    %21 = vector.broadcast %18 : vector<8x1xf32> to vector<8x128xf32>
    %22 = arith.cmpf oge, %16, %21 : vector<8x128xf32>
    %cst_5 = arith.constant 1.280000e+02 : f32
    %23 = vector.broadcast %cst_5 : f32 to vector<8x128xf32>
    %24 = arith.select %22, %20, %23 : vector<8x128xi1>, vector<8x128xf32>
    %cst_6 = arith.constant dense<0x7F800000> : vector<8xf32>
    %25 = vector.multi_reduction <minimumf>, %24, %cst_6 [1] : vector<8x128xf32> to vector<8xf32>
    %26 = vector.shape_cast %25 : vector<8xf32> to vector<8x1xf32>
    %cst_7 = arith.constant 1.600000e+01 : f32
    %27 = vector.broadcast %cst_7 : f32 to vector<8x1xf32>
    %28 = arith.mulf %26, %27 : vector<8x1xf32>
    %29 = tpu.iota {dimensions = array<i32: 1>} : vector<8x160xi32>
    %30 = arith.sitofp %29 : vector<8x160xi32> to vector<8x160xf32>
    %31 = vector.broadcast %28 : vector<8x1xf32> to vector<8x160xf32>
    %32 = arith.cmpf oge, %30, %31 : vector<8x160xf32>
    %cst_8 = arith.constant 1.600000e+01 : f32
    %33 = vector.broadcast %cst_8 : f32 to vector<8x1xf32>
    %34 = arith.addf %28, %33 : vector<8x1xf32>
    %35 = vector.broadcast %34 : vector<8x1xf32> to vector<8x160xf32>
    %36 = arith.cmpf olt, %30, %35 : vector<8x160xf32>
    %37 = arith.andi %32, %36 : vector<8x160xi1>
    %cst_9 = arith.constant 0.000000e+00 : f32
    %38 = vector.broadcast %cst_9 : f32 to vector<8x160xf32>
    %39 = arith.select %37, %0, %38 : vector<8x160xi1>, vector<8x160xf32>
    %40 = arith.truncf %39 : vector<8x160xf32> to vector<8x160xbf16>
    %c0_10 = arith.constant 0 : index
    %c0_11 = arith.constant 0 : index
    %41 = vector.load %arg2[%c0_10, %c0_11] : memref<160x512xbf16, #tpu.memory_space<vmem>>, vector<160x512xbf16>
    %cst_12 = arith.constant dense<0.000000e+00> : vector<8x512xf32>
    %42 = tpu.matmul %40, %41, %cst_12 {dimension_numbers = #tpu.dot_dimension_numbers<[1], [0], [0], [1], [0, 0, 1, 1], [], []>} : vector<8x160xbf16>, vector<160x512xbf16>, vector<8x512xf32> -> vector<8x512xf32>
    %c0_13 = arith.constant 0 : index
    %c0_14 = arith.constant 0 : index
    %43 = vector.load %arg3[%c0_13, %c0_14] : memref<1x512xf32, #tpu.memory_space<vmem>>, vector<1x512xf32>
    %44 = vector.broadcast %43 : vector<1x512xf32> to vector<8x512xf32>
    %45 = arith.addf %42, %44 : vector<8x512xf32>
    %cst_15 = arith.constant 0.000000e+00 : f32
    %46 = vector.broadcast %cst_15 : f32 to vector<8x512xf32>
    %47 = arith.maximumf %45, %46 : vector<8x512xf32>
    %48 = arith.truncf %47 : vector<8x512xf32> to vector<8x512xbf16>
    %c0_16 = arith.constant 0 : index
    %c0_17 = arith.constant 0 : index
    %49 = vector.load %arg4[%c0_16, %c0_17] : memref<512x1024xbf16, #tpu.memory_space<vmem>>, vector<512x1024xbf16>
    %cst_18 = arith.constant dense<0.000000e+00> : vector<8x1024xf32>
    %50 = tpu.matmul %48, %49, %cst_18 {dimension_numbers = #tpu.dot_dimension_numbers<[1], [0], [0], [1], [0, 0, 1, 1], [], []>} : vector<8x512xbf16>, vector<512x1024xbf16>, vector<8x1024xf32> -> vector<8x1024xf32>
    %c0_19 = arith.constant 0 : index
    %c0_20 = arith.constant 0 : index
    %51 = vector.load %arg5[%c0_19, %c0_20] : memref<1x1024xf32, #tpu.memory_space<vmem>>, vector<1x1024xf32>
    %52 = vector.broadcast %51 : vector<1x1024xf32> to vector<8x1024xf32>
    %53 = arith.addf %50, %52 : vector<8x1024xf32>
    %cst_21 = arith.constant 0.000000e+00 : f32
    %54 = vector.broadcast %cst_21 : f32 to vector<8x1024xf32>
    %55 = arith.maximumf %53, %54 : vector<8x1024xf32>
    %56 = arith.truncf %55 : vector<8x1024xf32> to vector<8x1024xbf16>
    %c0_22 = arith.constant 0 : index
    %c0_23 = arith.constant 0 : index
    %57 = vector.load %arg6[%c0_22, %c0_23] : memref<1024x896xbf16, #tpu.memory_space<vmem>>, vector<1024x896xbf16>
    %cst_24 = arith.constant dense<0.000000e+00> : vector<8x896xf32>
    %58 = tpu.matmul %56, %57, %cst_24 {dimension_numbers = #tpu.dot_dimension_numbers<[1], [0], [0], [1], [0, 0, 1, 1], [], []>} : vector<8x1024xbf16>, vector<1024x896xbf16>, vector<8x896xf32> -> vector<8x896xf32>
    %c0_25 = arith.constant 0 : index
    %c0_26 = arith.constant 0 : index
    %59 = vector.load %arg7[%c0_25, %c0_26] : memref<1x896xf32, #tpu.memory_space<vmem>>, vector<1x896xf32>
    %60 = vector.broadcast %59 : vector<1x896xf32> to vector<8x896xf32>
    %61 = arith.addf %58, %60 : vector<8x896xf32>
    %cst_27 = arith.constant 0.000000e+00 : f32
    %62 = vector.broadcast %cst_27 : f32 to vector<8x896xf32>
    %63 = arith.subf %62, %61 : vector<8x896xf32>
    %64 = math.exp %63 : vector<8x896xf32>
    %cst_28 = arith.constant 1.000000e+00 : f32
    %65 = vector.broadcast %cst_28 : f32 to vector<8x896xf32>
    %66 = arith.addf %65, %64 : vector<8x896xf32>
    %67 = tpu.reciprocal %66 : vector<8x896xf32> -> vector<8x896xf32>
    %c0_29 = arith.constant 0 : index
    %c0_30 = arith.constant 0 : index
    %68 = vector.load %arg8[%c0_29, %c0_30] : memref<8x896xf32, #tpu.memory_space<vmem>>, vector<8x896xf32>
    tpu.vector_store %arg8[%c0_29, %c0_30], %67 {strides = array<i32>} : memref<8x896xf32, #tpu.memory_space<vmem>>, vector<8x896xf32>,
    return
  }
  func.func @transform_0(%arg0: i32) -> (i32, i32) {
    %c0_i32 = arith.constant 0 : i32
    %c0_i32_0 = arith.constant 0 : i32
    return %arg0, %c0_i32 : i32, i32
  }
  func.func @transform_1(%arg0: i32) -> (i32, i32) {
    %c0_i32 = arith.constant 0 : i32
    %c0_i32_0 = arith.constant 0 : i32
    %c0_i32_1 = arith.constant 0 : i32
    return %c0_i32, %c0_i32_0 : i32, i32
  }
  func.func @transform_2(%arg0: i32) -> (i32, i32) {
    %c0_i32 = arith.constant 0 : i32
    %c0_i32_0 = arith.constant 0 : i32
    %c0_i32_1 = arith.constant 0 : i32
    return %c0_i32, %c0_i32_0 : i32, i32
  }
  func.func @transform_3(%arg0: i32) -> (i32, i32) {
    %c0_i32 = arith.constant 0 : i32
    %c0_i32_0 = arith.constant 0 : i32
    %c0_i32_1 = arith.constant 0 : i32
    return %c0_i32, %c0_i32_0 : i32, i32
  }
  func.func @transform_4(%arg0: i32) -> (i32, i32) {
    %c0_i32 = arith.constant 0 : i32
    %c0_i32_0 = arith.constant 0 : i32
    %c0_i32_1 = arith.constant 0 : i32
    return %c0_i32, %c0_i32_0 : i32, i32
  }
  func.func @transform_5(%arg0: i32) -> (i32, i32) {
    %c0_i32 = arith.constant 0 : i32
    %c0_i32_0 = arith.constant 0 : i32
    %c0_i32_1 = arith.constant 0 : i32
    return %c0_i32, %c0_i32_0 : i32, i32
  }
  func.func @transform_6(%arg0: i32) -> (i32, i32) {
    %c0_i32 = arith.constant 0 : i32
    %c0_i32_0 = arith.constant 0 : i32
    %c0_i32_1 = arith.constant 0 : i32
    return %c0_i32, %c0_i32_0 : i32, i32
  }
  func.func @transform_7(%arg0: i32) -> (i32, i32) {
    %c0_i32 = arith.constant 0 : i32
    %c0_i32_0 = arith.constant 0 : i32
    return %arg0, %c0_i32 : i32, i32
  }
}

</mosaic_0001>

<bundles_post_ra>
// kernel: decoder_net_forward.1
= control target key start
LH: loop header
LB: loop body
LE: loop exit
PB: predicated region body
PF: predicated region fallthrough
CT: control target
= control target key end

     0   :  { %12 = vsyncpa [#allocation3], 0  ;;  %s9594_s0 = inlined_call_operand.vmem [shape: f32[8,160], index: 0, kind: input, shape index: {}]   ;;  %s9595_s1 = inlined_call_operand.hbm [shape: bf16[160,512], index: 1, kind: input, shape index: {}]   ;;  %s9596_s2 = inlined_call_operand.hbm [shape: f32[1,512], index: 2, kind: input, shape index: {}]   ;;  %s9597_s3 = inlined_call_operand.hbm [shape: bf16[512,1024], index: 3, kind: input, shape index: {}]   ;;  %s9598_s4 = inlined_call_operand.hbm [shape: f32[1,1024], index: 4, kind: input, shape index: {}]   ;;  %s9599_s5 = inlined_call_operand.hbm [shape: bf16[1024,896], index: 5, kind: input, shape index: {}]   ;;  %s9600_s6 = inlined_call_operand.vmem [shape: f32[1,896], index: 6, kind: input, shape index: {}]   ;;  %s9601_s7 = inlined_call_operand.vmem [shape: f32[8,896], index: 7, kind: output, shape index: {}]  }
   0x1   :  { %13 = vsyncpa [#allocation5], 0 }
   0x2   :  { %14 = vsyncpa [#allocation8], 0  ;;  %s8660_s24 = smov [#allocation4]   ;;  %s8661_s26 = smov [#allocation7]  }
   0x3   :  { %s35_s25 = sshll.u32 %s8660_s24, 4  ;;  %s57_s27 = sshll.u32 %s8661_s26, 4  ;;  %s36_s25 = int_to_ptr.vmem [resolvable:$true] %s35_s25  ;;  %s58_s27 = int_to_ptr.vmem [resolvable:$true] %s57_s27 }
   0x4   :  { %s8544_s30 = scalar_lea.hbm %s9596_s2, 64 }
   0x5   :  { %p8545_p0 = scmp.ne.s32.totalorder %s9596_s2, %s8544_s30  ;;  %p8548_p1 = scmp.lt.u32.totalorder %s8544_s30, %s9596_s2 }
   0x7   :  { %p8550_p2 = pnand %p8548_p1, %p8545_p0 }
   0x9   :  { %8553 = shalt.err (!%p8550_p2)
}
   0xa   :  { %s8554_s12 = scalar_lea.vmem %s36_s25, 64  ;;  %p8559_p4 = scmp.lt.s32.totalorder %s36_s25, %s36_s25 }
   0xb   :  { %p8555_p3 = scmp.ne.s32.totalorder %s36_s25, %s8554_s12  ;;  %p8560_p5 = scmp.lt.s32.totalorder %s8554_s12, %s8554_s12 }
   0xd   :  { %p8561_p6 = por %p8560_p5, %p8559_p4 }
   0xf   :  { %p8562_p7 = pnand %p8561_p6, %p8555_p3 }
  0x11   :  { %8565 = shalt.err (!%p8562_p7)
}
  0x12   :  { %38 = dma.hbm_to_vmem [thread:$0]  %s9596_s2, 64, %s36_s25, [#allocation5]  }
  0x13   :  { %s8566_s17 = scalar_lea.hbm %s9598_s4, 128 }
  0x14   :  { %p8567_p8 = scmp.ne.s32.totalorder %s9598_s4, %s8566_s17  ;;  %p8570_p9 = scmp.lt.u32.totalorder %s8566_s17, %s9598_s4 }
  0x16   :  { %p8572_p10 = pnand %p8570_p9, %p8567_p8 }
  0x18   :  { %8575 = shalt.err (!%p8572_p10)
}
  0x19   :  { %s8576_s22 = scalar_lea.vmem %s58_s27, 128  ;;  %p8581_p12 = scmp.lt.s32.totalorder %s58_s27, %s58_s27 }
  0x1a   :  { %p8577_p11 = scmp.ne.s32.totalorder %s58_s27, %s8576_s22  ;;  %p8582_p13 = scmp.lt.s32.totalorder %s8576_s22, %s8576_s22 }
  0x1c   :  { %p8583_p0 = por %p8582_p13, %p8581_p12 }
  0x1e   :  { %p8584_p1 = pnand %p8583_p0, %p8577_p11 }
  0x20   :  { %8587 = shalt.err (!%p8584_p1)
}
  0x21   :  { %60 = dma.hbm_to_vmem [thread:$0]  %s9598_s4, 128, %s58_s27, [#allocation8]  }
  0x22   :  { %s8662_s24 = smov [#allocation2]   ;;  %s8588_s29 = scalar_lea.hbm %s9595_s1, 5120 }
  0x23   :  { %s22_s25 = sshll.u32 %s8662_s24, 4  ;;  %p8589_p2 = scmp.ne.s32.totalorder %s9595_s1, %s8588_s29  ;;  %s23_s25 = int_to_ptr.vmem [resolvable:$true] %s22_s25 }
  0x24   :  { %p8592_p3 = scmp.lt.u32.totalorder %s8588_s29, %s9595_s1 }
  0x26   :  { %p8594_p4 = pnand %p8592_p3, %p8589_p2 }
  0x28   :  { %8597 = shalt.err (!%p8594_p4)
}
  0x29   :  { %s8598_s11 = scalar_lea.vmem %s23_s25, 5120  ;;  %p8603_p6 = scmp.lt.s32.totalorder %s23_s25, %s23_s25 }
  0x2a   :  { %p8599_p5 = scmp.ne.s32.totalorder %s23_s25, %s8598_s11  ;;  %p8604_p7 = scmp.lt.s32.totalorder %s8598_s11, %s8598_s11 }
  0x2c   :  { %p8605_p8 = por %p8604_p7, %p8603_p6 }
  0x2e   :  { %p8606_p9 = pnand %p8605_p8, %p8599_p5 }
  0x30   :  { %8609 = shalt.err (!%p8606_p9)
}
  0x31   :  { %s8663_s4 = smov 256   ;;  %s8664_s27 = smov 16  }
  0x32   :  { %28 = dma.hbm_to_vmem [thread:$0]  %s9595_s1, 5120, %s23_s25, [#allocation3], %s8663_s4, %s8663_s4, %s8664_s27  }
  0x33   :  { %s8665_s14 = smov [#allocation6]   ;;  %s8610_s18 = scalar_lea.hbm %s9597_s3, 32768 }
  0x34   :  { %s44_s15 = sshll.u32 %s8665_s14, 4  ;;  %p8611_p10 = scmp.ne.s32.totalorder %s9597_s3, %s8610_s18  ;;  %s45_s15 = int_to_ptr.vmem [resolvable:$true] %s44_s15 }
  0x35   :  { %p8614_p11 = scmp.lt.u32.totalorder %s8610_s18, %s9597_s3 }
  0x37   :  { %p8616_p12 = pnand %p8614_p11, %p8611_p10 }
  0x39   :  { %8619 = shalt.err (!%p8616_p12)
}
  0x3a   :  { %s8620_s2 = scalar_lea.vmem %s45_s15, 32768  ;;  %p8625_p0 = scmp.lt.s32.totalorder %s45_s15, %s45_s15 }
  0x3b   :  { %p8621_p13 = scmp.ne.s32.totalorder %s45_s15, %s8620_s2  ;;  %p8626_p1 = scmp.lt.s32.totalorder %s8620_s2, %s8620_s2 }
  0x3d   :  { %p8627_p2 = por %p8626_p1, %p8625_p0 }
  0x3f   :  { %p8628_p3 = pnand %p8627_p2, %p8621_p13 }
  0x41   :  { %8631 = shalt.err (!%p8628_p3)
}
  0x42   :  { %s8666_s1 = smov 512   ;;  %s8667_s23 = smov 32  }
  0x43   :  { %50 = dma.hbm_to_vmem [thread:$0]  %s9597_s3, 32768, %s45_s15, [#allocation5], %s8666_s1, %s8666_s1, %s8667_s23  }
  0x44   :  { %s8668_s26 = smov [#allocation9]   ;;  %s8632_s8 = scalar_lea.hbm %s9599_s5, 57344 }
  0x45   :  { %s66_s28 = sshll.u32 %s8668_s26, 4  ;;  %p8633_p4 = scmp.ne.s32.totalorder %s9599_s5, %s8632_s8  ;;  %s67_s28 = int_to_ptr.vmem [resolvable:$true] %s66_s28 }
  0x46   :  { %p8636_p5 = scmp.lt.u32.totalorder %s8632_s8, %s9599_s5 }
  0x48   :  { %p8638_p6 = pnand %p8636_p5, %p8633_p4 }
  0x4a   :  { %8641 = shalt.err (!%p8638_p6)
}
  0x4b   :  { %s8642_s27 = scalar_lea.vmem %s67_s28, 57344  ;;  %p8647_p8 = scmp.lt.s32.totalorder %s67_s28, %s67_s28 }
  0x4c   :  { %p8643_p7 = scmp.ne.s32.totalorder %s67_s28, %s8642_s27  ;;  %p8648_p9 = scmp.lt.s32.totalorder %s8642_s27, %s8642_s27 }
  0x4e   :  { %p8649_p10 = por %p8648_p9, %p8647_p8 }
  0x50   :  { %p8650_p11 = pnand %p8649_p10, %p8643_p7 }
  0x52   :  { %8653 = shalt.err (!%p8650_p11)
}
  0x53   :  { %s8669_s3 = smov 448   ;;  %s8670_s12 = smov 28  }
  0x54   :  { %72 = dma.hbm_to_vmem [thread:$0]  %s9599_s5, 57344, %s67_s28, [#allocation8], %s8669_s3, %s8669_s3, %s8670_s12  }
  0x55   :  { %8654 = dma.done.wait [#allocation3], 5120  }
  0x56   :  { %8655 = vsyncadd [#allocation3], 4294962176 }
  0x57   :  { %8656 = dma.done.wait [#allocation5], 32832  }
  0x58   :  { %8657 = vsyncadd [#allocation5], 4294934464  ;;  %v93_v0 = vlaneseq }
  0x59   :  { %8658 = dma.done.wait [#allocation8], 57472  }
  0x5a   :  { %8659 = vsyncadd [#allocation8], 4294909824  ;;  %v8671_v1 = vmov 0.0|0.0   ;;  %v8775_v2 = vshrl.u32 %v93_v0, 7  ;;  %v8777_v3 = vand.u32 127, %v93_v0  ;;  %v9631_v14 = vmov 0 }
  0x5b   :  { %7543 = vmatprep.subr.bf16.mxu0 %v8671_v1  ;;  %v9622_v16 = vmov 1.0|1.0   ;;  %v9637_v20 = vmov 0  ;;  %v9641_v24 = vmov 0  ;;  %v9643_v25 = vmov 0  ;;  %v92_v40 = vld [vmem:[%s9594_s0 + $0x8] sm:$0xff] }
  0x5c   :  { %9626 = vst [vmem:[#allocation13_spill] sm:$0xff] %v8775_v2  ;;  %v95_v4 = vadd.s32 8, %v8775_v2  ;;  %v8781_v5 = vmul.u32 16, %v8777_v3  ;;  %v137_v6 = vadd.s32 1, %v8777_v3  ;;  %v96_v7 = vadd.s32 16, %v8775_v2  ;;  %v91_v41 = vld [vmem:[%s9594_s0] sm:$0xff] }
  0x5d   :  { %v97_v9 = vadd.s32 24, %v8775_v2  ;;  %v98_v10 = vadd.s32 32, %v8775_v2  ;;  %v99_v12 = vadd.s32 40, %v8775_v2  ;;  %v100_v15 = vadd.s32 48, %v8775_v2  ;;  %v7818_v44 = vld [vmem:[#allocation2 + $0x20] ss:$16 sps:$4 sm:$0xff]  }
  0x5e   :  { %vm117_vm0 = vcmp.ge.s32.totalorder %v8775_v2, %v8781_v5  ;;  %v8787_v8 = vmul.u32 16, %v137_v6  ;;  %vm118_vm1 = vcmp.ge.s32.totalorder %v95_v4, %v8781_v5  ;;  %vm119_vm5 = vcmp.ge.s32.totalorder %v96_v7, %v8781_v5  ;;  %v7819_v51 = vld [vmem:[#allocation2 + $0x44] ss:$16 sps:$4 sm:$0xff]   ;;  %v7821_v61 = vld [vmem:[#allocation2 + $0x40] ss:$16 sps:$4 sm:$0xff]  }
  0x5f   :  { %vm120_vm8 = vcmp.ge.s32.totalorder %v97_v9, %v8781_v5  ;;  %vm121_vm12 = vcmp.ge.s32.totalorder %v98_v10, %v8781_v5  ;;  %v101_v18 = vadd.s32 56, %v8775_v2  ;;  %vm122_vm15 = vcmp.ge.s32.totalorder %v99_v12, %v8781_v5 }
  0x60   :  { %vm139_vm2 = vcmp.lt.s32.totalorder %v8775_v2, %v8787_v8  ;;  %vm140_vm3 = vcmp.lt.s32.totalorder %v95_v4, %v8787_v8  ;;  %vm141_vm6 = vcmp.lt.s32.totalorder %v96_v7, %v8787_v8  ;;  %vm142_vm9 = vcmp.lt.s32.totalorder %v97_v9, %v8787_v8 }
  0x61   :  { %vm8795_vm4 = vmand %vm117_vm0, %vm139_vm2  ;;  %vm143_vm13 = vcmp.lt.s32.totalorder %v98_v10, %v8787_v8  ;;  %vm144_vm0 = vcmp.lt.s32.totalorder %v99_v12, %v8787_v8  ;;  %v102_v21 = vadd.s32 64, %v8775_v2  ;;  %v103_v23 = vadd.s32 72, %v8775_v2  ;;  %v7825_v10 = vld [vmem:[#allocation2 + $0x84] ss:$16 sps:$4 sm:$0xff]  }
  0x62   :  { %vm8802_vm7 = vmand %vm118_vm1, %vm140_vm3  ;;  %vm123_vm3 = vcmp.ge.s32.totalorder %v100_v15, %v8781_v5  ;;  %v104_v26 = vadd.s32 80, %v8775_v2  ;;  %v9645_v27 = vmov 0  ;;  %v105_v28 = vadd.s32 88, %v8775_v2 }
  0x63   :  { %vm8812_vm10 = vmpackc.low %vm8802_vm7, %vm8795_vm4  ;;  %v9647_v29 = vmov 0  ;;  %v9649_v30 = vmov 0  ;;  %v106_v31 = vadd.s32 96, %v8775_v2  ;;  %v9651_v32 = vmov 0 }
  0x64   :  { %v9632_v14 = vsel %vm8812_vm10, 4294967295, %v9631_v14  ;;  %7545 = vmatpush1.bf16.msk.msra.mxu0 %vm8812_vm10, %v9622_v16  ;;  %vm8820_vm11 = vmand %vm119_vm5, %vm141_vm6  ;;  %vm145_vm5 = vcmp.lt.s32.totalorder %v100_v15, %v8787_v8  ;;  %vm126_vm10 = vcmp.ge.s32.totalorder %v103_v23, %v8781_v5  ;;  %v107_v33 = vadd.s32 104, %v8775_v2 }
  0x65   :  { %7546 = vmatprep.subr.bf16.mxu0 %v8671_v1  ;;  %vm8828_vm14 = vmand %vm120_vm8, %vm142_vm9  ;;  %vm124_vm8 = vcmp.ge.s32.totalorder %v101_v18, %v8781_v5  ;;  %vm146_vm9 = vcmp.lt.s32.totalorder %v101_v18, %v8787_v8  ;;  %v9653_v34 = vmov 0  ;;  %v9655_v35 = vmov 0 }
  0x66   :  { %vm8838_vm1 = vmpackc.low %vm8828_vm14, %vm8820_vm11  ;;  %v108_v36 = vadd.s32 112, %v8775_v2  ;;  %v109_v38 = vadd.s32 120, %v8775_v2  ;;  %v9659_v39 = vmov 0  ;;  %v8673_v42 = vmov 0.0  }
  0x67   :  { %v9638_v20 = vsel %vm8838_vm1, 4294967295, %v9637_v20  ;;  %vm8843_vm2 = vmand %vm121_vm12, %vm143_vm13  ;;  %v179_v43 = vsel %vm8795_vm4, 1.0, %v8673_v42  ;;  %v110_v45 = vadd.s32 128, %v8775_v2  ;;  %v9663_v46 = vmov 0 }
  0x68   :  { %7548 = vmatpush1.bf16.msk.msra.mxu0 %vm8838_vm1, %v9622_v16  ;;  %vm8853_vm6 = vmand %vm122_vm15, %vm144_vm0  ;;  %vm125_vm15 = vcmp.ge.s32.totalorder %v102_v21, %v8781_v5  ;;  %vm147_vm0 = vcmp.lt.s32.totalorder %v102_v21, %v8787_v8  ;;  %v111_v47 = vadd.s32 136, %v8775_v2  ;;  %v9665_v48 = vmov 0 }
  0x69   :  { %v9642_v24 = vsel %vm8853_vm6, 4294967295, %v9641_v24  ;;  %7549 = vmatprep.subr.bf16.mxu0 %v8671_v1  ;;  %vm8864_vm12 = vmpackc.low %vm8853_vm6, %vm8843_vm2  ;;  %vm148_vm6 = vcmp.lt.s32.totalorder %v103_v23, %v8787_v8  ;;  %v180_v49 = vsel %vm8802_vm7, 1.0, %v8673_v42  ;;  %v8971_v50 = vsub.f32 %v179_v43, %v179_v43  ;;  %v7831_v23 = vld [vmem:[#allocation2 + $0xc4] ss:$16 sps:$4 sm:$0xff]  }
  0x6a   :  { %v9644_v25 = vsel %vm8864_vm12, 4294967295, %v9643_v25  ;;  %vm8869_vm13 = vmand %vm123_vm3, %vm145_vm5  ;;  %v112_v52 = vadd.s32 144, %v8775_v2  ;;  %v113_v53 = vadd.s32 152, %v8775_v2  ;;  %vm133_vm7 = vcmp.ge.s32.totalorder %v110_v45, %v8781_v5 }
  0x6b   :  { %v9646_v27 = vsel %vm8869_vm13, 4294967295, %v9645_v27  ;;  %vm8876_vm1 = vmand %vm124_vm8, %vm146_vm9  ;;  %vm127_vm8 = vcmp.ge.s32.totalorder %v104_v26, %v8781_v5  ;;  %vm149_vm9 = vcmp.lt.s32.totalorder %v104_v26, %v8787_v8  ;;  %v200_v55 = vmul.f32 %v92_v40, %v92_v40 }
  0x6c   :  { %v9648_v29 = vsel %vm8876_vm1, 4294967295, %v9647_v29  ;;  %7551 = vmatpush1.bf16.msk.msra.mxu0 %vm8864_vm12, %v9622_v16  ;;  %vm8889_vm3 = vmpackc.low %vm8876_vm1, %vm8869_vm13  ;;  %vm128_vm1 = vcmp.ge.s32.totalorder %v105_v28, %v8781_v5  ;;  %vm150_vm13 = vcmp.lt.s32.totalorder %v105_v28, %v8787_v8  ;;  %v199_v56 = vmul.f32 %v91_v41, %v91_v41 }
  0x6d   :  { %v9650_v30 = vsel %vm8889_vm3, 4294967295, %v9649_v30  ;;  %7552 = vmatprep.subr.bf16.mxu0 %v8671_v1  ;;  %vm8895_vm5 = vmand %vm125_vm15, %vm147_vm0  ;;  %vm151_vm0 = vcmp.lt.s32.totalorder %v106_v31, %v8787_v8  ;;  %v8996_v58 = vsub.f32 %v180_v49, %v180_v49  ;;  %v181_v59 = vsel %vm8820_vm11, 1.0, %v8673_v42 }
  0x6e   :  { %v9652_v32 = vsel %vm8895_vm5, 4294967295, %v9651_v32  ;;  %vm8902_vm12 = vmand %vm126_vm10, %vm148_vm6  ;;  %vm129_vm6 = vcmp.ge.s32.totalorder %v106_v31, %v8781_v5  ;;  %v182_v60 = vsel %vm8828_vm14, 1.0, %v8673_v42  ;;  %vm135_vm14 = vcmp.ge.s32.totalorder %v112_v52, %v8781_v5 }
  0x6f   :  { %v9654_v34 = vsel %vm8902_vm12, 4294967295, %v9653_v34  ;;  %vm8912_vm15 = vmpackc.low %vm8902_vm12, %vm8895_vm5  ;;  %vm130_vm5 = vcmp.ge.s32.totalorder %v107_v33, %v8781_v5  ;;  %v9025_v4 = vand.u32 4294901760, %v199_v56  ;;  %v287_v6 = vand.u32 4294901760, %v8971_v50 }
  0x70   :  { %v9656_v35 = vsel %vm8912_vm15, 4294967295, %v9655_v35  ;;  %7554 = vmatpush1.bf16.msk.msra.mxu0 %vm8889_vm3, %v9622_v16  ;;  %vm8920_vm10 = vmand %vm127_vm8, %vm149_vm9  ;;  %vm152_vm3 = vcmp.lt.s32.totalorder %v107_v33, %v8787_v8  ;;  %vm131_vm8 = vcmp.ge.s32.totalorder %v108_v36, %v8781_v5  ;;  %vm153_vm9 = vcmp.lt.s32.totalorder %v108_v36, %v8787_v8 }
  0x71   :  { %7555 = vmatprep.subr.bf16.mxu0 %v8671_v1  ;;  %vm8928_vm12 = vmand %vm128_vm1, %vm150_vm13  ;;  %v183_v9 = vsel %vm8843_vm2, 1.0, %v8673_v42  ;;  %v293_v12 = vand.u32 4294901760, %v8996_v58  ;;  %v9051_v13 = vsub.f32 %v181_v59, %v181_v59  ;;  %v9065_v17 = vsub.f32 %v199_v56, %v9025_v4 }
  0x72   :  { %v9660_v39 = vsel %vm8928_vm12, 4294967295, %v9659_v39  ;;  %vm8947_vm1 = vmpackc.low %vm8928_vm12, %vm8920_vm10  ;;  %vm132_vm12 = vcmp.ge.s32.totalorder %v109_v38, %v8781_v5  ;;  %v9079_v22 = vsub.f32 %v183_v9, %v183_v9  ;;  %v189_v9 = vsel %vm8920_vm10, 1.0, %v8673_v42 }
  0x73   :  { %vm8952_vm13 = vmand %vm129_vm6, %vm151_vm0  ;;  %vm154_vm6 = vcmp.lt.s32.totalorder %v109_v38, %v8787_v8  ;;  %vm155_vm0 = vcmp.lt.s32.totalorder %v110_v45, %v8787_v8  ;;  %v9620_v31 = vand.u32 4294901760, %v9065_v17  ;;  %v294_v33 = vsub.f32 %v8996_v58, %v293_v12 }
  0x74   :  { %v9664_v46 = vsel %vm8952_vm13, 4294967295, %v9663_v46  ;;  %7557 = vmatpush1.bf16.msk.msra.mxu0 %vm8912_vm15, %v9622_v16  ;;  %vm8962_vm4 = vmand %vm130_vm5, %vm152_vm3  ;;  %v299_v36 = vand.u32 4294901760, %v9051_v13  ;;  %v311_v45 = vand.u32 4294901760, %v9079_v22 }
  0x75   :  { %v9666_v48 = vsel %vm8962_vm4, 4294967295, %v9665_v48  ;;  %7558 = vmatprep.subr.bf16.mxu0 %v8671_v1  ;;  %vm8978_vm3 = vmpackc.low %vm8962_vm4, %vm8952_vm13  ;;  %vm134_vm4 = vcmp.ge.s32.totalorder %v111_v47, %v8781_v5  ;;  %vm156_vm13 = vcmp.lt.s32.totalorder %v111_v47, %v8787_v8  ;;  %vm9694_vm10 = vnez %v9664_v46 }
  0x76   :  { %vm8984_vm5 = vmand %vm131_vm8, %vm153_vm9  ;;  %vm9675_vm8 = vcmask 261120   ;;  %vm157_vm9 = vcmp.lt.s32.totalorder %v112_v52, %v8787_v8  ;;  %v278_v52 = vsub.f32 %v9065_v17, %v9620_v31  ;;  %v300_v56 = vsub.f32 %v9051_v13, %v299_v36 }
  0x77   :  { %vm8990_vm15 = vmand %vm132_vm12, %vm154_vm6  ;;  %v203_v62 = vsel %vm9675_vm8, %v200_v55, 0  ;;  %v9169_v46 = vpack.c.bf16 %v293_v12, %v287_v6 }
  0x78   :  { %7560 = vmatpush1.bf16.msk.msra.mxu0 %vm8947_vm1, %v9622_v16  ;;  %vm9011_vm12 = vmpackc.low %vm8990_vm15, %vm8984_vm5  ;;  %v9023_v0 = vand.u32 4294901760, %v203_v62 }
  0x79   :  { %7561 = vmatprep.subr.bf16.mxu0 %v8671_v1  ;;  %vm9017_vm11 = vmand %vm133_vm7, %vm155_vm0  ;;  %vm136_vm0 = vcmp.ge.s32.totalorder %v113_v53, %v8781_v5  ;;  %vm158_vm7 = vcmp.lt.s32.totalorder %v113_v53, %v8787_v8  ;;  %v9053_v8 = vsub.f32 %v182_v60, %v182_v60  ;;  %v288_v5 = vsub.f32 %v8971_v50, %v287_v6 }
  0x7a   :  { %vm9030_vm6 = vmand %vm134_vm4, %vm156_vm13  ;;  %v9048_v11 = vsub.f32 %v203_v62, %v9023_v0  ;;  %vm9684_vm13 = vnez %v9642_v24  ;;  %v295_v53 = vand.u32 4294901760, %v294_v33  ;;  %v194_v6 = vsel %vm8990_vm15, 1.0, %v8673_v42 }
  0x7b   :  { %vm9043_vm8 = vmpackc.low %vm9030_vm6, %vm9017_vm11  ;;  %v184_v18 = vsel %vm9684_vm13, 1.0, %v8673_v42  ;;  %v305_v38 = vand.u32 4294901760, %v9053_v8  ;;  %v289_v40 = vand.u32 4294901760, %v288_v5  ;;  %vm9692_vm13 = vnez %v9654_v34 }
  0x7c   :  { %7563 = vmatpush1.bf16.msk.msra.mxu0 %vm8978_vm3, %v9622_v16  ;;  %vm9060_vm2 = vmand %vm135_vm14, %vm157_vm9  ;;  %v9621_v21 = vand.u32 4294901760, %v9048_v11  ;;  %vm9689_vm9 = vnez %v9646_v27  ;;  %v9104_v27 = vsub.f32 %v184_v18, %v184_v18  ;;  %v188_v49 = vsel %vm9692_vm13, 1.0, %v8673_v42 }
  0x7d   :  { %7564 = vmatprep.subr.bf16.mxu0 %v8671_v1  ;;  %vm9071_vm4 = vmand %vm136_vm0, %vm158_vm7  ;;  %v185_v24 = vsel %vm9689_vm9, 1.0, %v8673_v42  ;;  %vm9690_vm0 = vnez %v9648_v29  ;;  %vm9691_vm7 = vnez %v9652_v32  ;;  %v306_v32 = vsub.f32 %v9053_v8, %v305_v38 }
  0x7e   :  { %vm9085_vm14 = vmpackc.low %vm9071_vm4, %vm9060_vm2  ;;  %v186_v26 = vsel %vm9690_vm0, 1.0, %v8673_v42  ;;  %v272_v28 = vsub.f32 %v9048_v11, %v9621_v21  ;;  %v9110_v41 = vsub.f32 %v185_v24, %v185_v24  ;;  %v187_v47 = vsel %vm9691_vm7, 1.0, %v8673_v42 }
  0x7f   :  { %v9112_v43 = vsub.f32 %v186_v26, %v186_v26  ;;  %v317_v55 = vand.u32 4294901760, %v9104_v27  ;;  %v9133_v60 = vsub.f32 %v187_v47, %v187_v47  ;;  %v9135_v62 = vsub.f32 %v188_v49, %v188_v49 }
  0x80   :  { %7566 = vmatpush1.bf16.msk.msra.mxu0 %vm9011_vm12, %v9622_v16  ;;  %v273_v29 = vand.u32 4294901760, %v272_v28  ;;  %v323_v34 = vand.u32 4294901760, %v9110_v41  ;;  %vm9693_vm9 = vnez %v9660_v39  ;;  %v279_v5 = vand.u32 4294901760, %v278_v52 }
  0x81   :  { %7567 = vmatprep.subr.bf16.mxu0 %v8671_v1  ;;  %v329_v59 = vand.u32 4294901760, %v9112_v43  ;;  %v190_v18 = vsel %vm9693_vm9, 1.0, %v8673_v42  ;;  %v312_v24 = vsub.f32 %v9079_v22, %v311_v45  ;;  %v7574_v26 = vpack.c.bf16 %v295_v53, %v289_v40 }
  0x82   :  { %274 = vmatprep.mubr.f32.mxu0 %v273_v29  ;;  %v301_v28 = vand.u32 4294901760, %v300_v56  ;;  %v307_v33 = vand.u32 4294901760, %v306_v32  ;;  %v318_v29 = vsub.f32 %v9104_v27, %v317_v55  ;;  %v335_v37 = vand.u32 4294901760, %v9133_v60 }
  0x83   :  { %v341_v47 = vand.u32 4294901760, %v9135_v62  ;;  %v9151_v39 = vsub.f32 %v189_v9, %v189_v9  ;;  %v9153_v49 = vsub.f32 %v190_v18, %v190_v18  ;;  %v191_v52 = vsel %vm9694_vm10, 1.0, %v8673_v42 }
  0x84   :  { %7569 = vmatpush1.bf16.msk.msra.mxu0 %vm9043_vm8, %v9622_v16  ;;  %vm9695_vm0 = vnez %v9666_v48  ;;  %v313_v53 = vand.u32 4294901760, %v312_v24  ;;  %v7577_v56 = vpack.c.bf16 %v307_v33, %v301_v28  ;;  %v319_v32 = vand.u32 4294901760, %v318_v29 }
  0x85   :  { %7570 = vmatprep.subr.bf16.mxu0 %v8671_v1  ;;  %v192_v40 = vsel %vm9695_vm0, 1.0, %v8673_v42  ;;  %v324_v31 = vsub.f32 %v9110_v41, %v323_v34  ;;  %v330_v9 = vsub.f32 %v9112_v43, %v329_v59  ;;  %v9171_v48 = vpack.c.bf16 %v305_v38, %v299_v36 }
  0x86   :  { %v9173_v18 = vpack.c.bf16 %v317_v55, %v311_v45  ;;  %v347_v24 = vand.u32 4294901760, %v9151_v39  ;;  %v9180_v28 = vsub.f32 %v192_v40, %v192_v40  ;;  %v353_v33 = vand.u32 4294901760, %v9153_v49 }
  0x87   :  { %v193_v29 = vsel %vm8984_vm5, 1.0, %v8673_v42  ;;  %v336_v12 = vsub.f32 %v9133_v60, %v335_v37  ;;  %v7580_v36 = vpack.c.bf16 %v319_v32, %v313_v53  ;;  %v325_v38 = vand.u32 4294901760, %v324_v31 }
  0x88   :  { %7572 = vmatpush1.bf16.msk.msra.mxu0 %vm9085_vm14, %v9622_v16  ;;  %v331_v45 = vand.u32 4294901760, %v330_v9  ;;  %v342_v55 = vsub.f32 %v9135_v62, %v341_v47  ;;  %v365_v54 = vand.u32 4294901760, %v9180_v28  ;;  %v9198_v57 = vsub.f32 %v194_v6, %v194_v6 }
  0x89   :  { %7573 = vmatprep.subr.bf16.mxu0 %v8671_v1  ;;  %v195_v40 = vsel %vm9017_vm11, 1.0, %v8673_v42  ;;  %v196_v31 = vsel %vm9030_vm6, 1.0, %v8673_v42  ;;  %v337_v53 = vand.u32 4294901760, %v336_v12  ;;  %v354_v32 = vsub.f32 %v9153_v49, %v353_v33 }
  0x8a   :  { %v9209_v9 = vpack.c.bf16 %v353_v33, %v347_v24  ;;  %v377_v63 = vand.u32 4294901760, %v9198_v57  ;;  %v9213_v6 = vsub.f32 %v195_v40, %v195_v40  ;;  %v9215_v7 = vsub.f32 %v196_v31, %v196_v31 }
  0x8b   :  { %280 = vmatmul.mubr.f32.vlgmr.msra.gmra.mrb[0].mxu0 %v279_v5  ;;  %v9175_v5 = vpack.c.bf16 %v329_v59, %v323_v34  ;;  %v9192_v34 = vpack.c.bf16 %v341_v47, %v335_v37  ;;  %v7583_v37 = vpack.c.bf16 %v331_v45, %v325_v38  ;;  %v343_v47 = vand.u32 4294901760, %v342_v55 }
  0x8c   :  { %7575 = vmatpush1.bf16.msra.mxu0 %v7574_v26  ;;  %430 = vmatprep.mubr.f32.mxu0 %v9023_v0  ;;  %v9178_v26 = vsub.f32 %v191_v52, %v191_v52  ;;  %v9196_v52 = vsub.f32 %v193_v29, %v193_v29  ;;  %v197_v12 = vsel %vm9060_vm2, 1.0, %v8673_v42  ;;  %v355_v45 = vand.u32 4294901760, %v354_v32 }
  0x8d   :  { %7576 = vmatprep.subr.bf16.mxu0 %v8671_v1  ;;  %v366_v55 = vsub.f32 %v9180_v28, %v365_v54  ;;  %v383_v31 = vand.u32 4294901760, %v9213_v6  ;;  %v389_v15 = vand.u32 4294901760, %v9215_v7  ;;  %v9230_v21 = vsub.f32 %v197_v12, %v197_v12 }
  0x8e   :  { %v359_v59 = vand.u32 4294901760, %v9178_v26  ;;  %v371_v29 = vand.u32 4294901760, %v9196_v52  ;;  %vm9697_vm15 = vnez %v9632_v14  ;;  %vm9699_vm5 = vnez %v9638_v20 }
  0x8f   :  { %v384_v2 = vsub.f32 %v9213_v6, %v383_v31  ;;  %vm9700_vm11 = vnez %v9644_v25  ;;  %vm9701_vm6 = vnez %v9650_v30  ;;  %vm9702_vm2 = vnez %v9656_v35  ;;  %v7813_v25 = vld [vmem:[#allocation2 + $0x4] ss:$16 sps:$4 sm:$0xff]   ;;  %v7815_v30 = vld [vmem:[#allocation2] ss:$16 sps:$4 sm:$0xff]  }
  0x90   :  { %7578 = vmatpush1.bf16.msra.mxu0 %v7577_v56  ;;  %v348_v56 = vsub.f32 %v9151_v39, %v347_v24  ;;  %v360_v38 = vsub.f32 %v9178_v26, %v359_v59  ;;  %v7586_v24 = vpack.c.bf16 %v343_v47, %v337_v53  ;;  %v9226_v40 = vpack.c.bf16 %v365_v54, %v359_v59  ;;  %v7816_v35 = vld [vmem:[#allocation2 + $0x24] ss:$16 sps:$4 sm:$0xff]  }
  0x91   :  { %7579 = vmatprep.subr.bf16.mxu0 %v8671_v1  ;;  %v367_v47 = vand.u32 4294901760, %v366_v55  ;;  %v9237_v59 = vpack.c.bf16 %v377_v63, %v371_v29  ;;  %v395_v54 = vand.u32 4294901760, %v9230_v21  ;;  %1077 = vmatprep.subr.bf16.mxu1 %v7813_v25  ;;  %vm9706_vm13 = vcmask 261120  }
  0x92   :  { %v349_v33 = vand.u32 4294901760, %v348_v56  ;;  %v378_v56 = vsub.f32 %v9198_v57, %v377_v63  ;;  %v385_v63 = vand.u32 4294901760, %v384_v2  ;;  %v7604_v2 = vpack.c.bf16 %v8996_v58, %v8971_v50  ;;  %1078 = vmatpush1.bf16.msra.mxu1 %v7815_v30  ;;  %v1249_v30 = vld [vmem:[#allocation6 + $0x290] sm:$0xff]  ;;  %vm9707_vm10 = vmmov %vm9706_vm13 }
  0x93   :  { %v7613_v50 = vpack.c.bf16 %v9112_v43, %v9110_v41  ;;  %v7616_v58 = vpack.c.bf16 %v9135_v62, %v9133_v60  ;;  %v9696_v43 = vmov 1.0|1.0   ;;  %v9698_v60 = vand.u32 4294901760, %v9048_v11  ;;  %1079 = vmatprep.subr.bf16.mxu1 %v7816_v35  ;;  %v7833_v62 = vld [vmem:[#allocation2 + $0xc0] ss:$16 sps:$4 sm:$0xff]   ;;  %v1253_v35 = vld [vmem:[#allocation6 + $0x2b0] sm:$0xff] }
  0x94   :  { %7581 = vmatpush1.bf16.msra.mxu0 %v7580_v36  ;;  %v198_v36 = vsel %vm9071_vm4, 1.0, %v8673_v42  ;;  %v372_v42 = vsub.f32 %v9196_v52, %v371_v29  ;;  %v7589_v53 = vpack.c.bf16 %v355_v45, %v349_v33  ;;  %v379_v16 = vand.u32 4294901760, %v378_v56 }
  0x95   :  { %7582 = vmatprep.subr.bf16.mxu0 %v8671_v1  ;;  %v9232_v19 = vsub.f32 %v198_v36, %v198_v36  ;;  %v396_v33 = vsub.f32 %v9230_v21, %v395_v54 }
  0x96   :  { %v373_v12 = vand.u32 4294901760, %v372_v42  ;;  %1080 = vmatpush1.bf16.msra.mxu1 %v7818_v44  ;;  %v6836_v44 = vcombine.high %v1249_v30, %v1253_v35 }
  0x97   :  { %v401_v32 = vand.u32 4294901760, %v9232_v19  ;;  %v7631_v41 = vpack.c.bf16 %v9232_v19, %v9230_v21  ;;  %1081 = vmatprep.subr.bf16.mxu1 %v7819_v51  ;;  %v7830_v21 = vld [vmem:[#allocation2 + $0xa0] ss:$16 sps:$4 sm:$0xff]   ;;  %v6835_v51 = vcombine.low %v1249_v30, %v1253_v35  ;;  %v1207_v35 = vld [vmem:[#allocation6 + $0x140] sm:$0xff] }
  0x98   :  { %7584 = vmatpush1.bf16.msra.mxu0 %v7583_v37  ;;  %v361_v37 = vand.u32 4294901760, %v360_v38  ;;  %v9244_v38 = vpack.c.bf16 %v389_v15, %v383_v31  ;;  %v7595_v29 = vpack.c.bf16 %v379_v16, %v373_v12  ;;  %v7607_v16 = vpack.c.bf16 %v9053_v8, %v9051_v13 }
  0x99   :  { %7585 = vmatprep.subr.bf16.mxu0 %v8671_v1  ;;  %v402_v55 = vsub.f32 %v9232_v19, %v401_v32  ;;  %v9249_v42 = vpack.c.bf16 %v401_v32, %v395_v54  ;;  %v7619_v13 = vpack.c.bf16 %v9153_v49, %v9151_v39  ;;  %v7622_v8 = vpack.c.bf16 %v9180_v28, %v9178_v26  ;;  %v7834_v39 = vld [vmem:[#allocation2 + $0xe4] ss:$16 sps:$4 sm:$0xff]   ;;  %v7836_v49 = vld [vmem:[#allocation2 + $0xe0] ss:$16 sps:$4 sm:$0xff]  }
  0x9a   :  { %v7592_v36 = vpack.c.bf16 %v367_v47, %v361_v37  ;;  %v397_v37 = vand.u32 4294901760, %v396_v33  ;;  %1082 = vmatpush1.bf16.msra.mxu1 %v7821_v61  ;;  %v7839_v26 = vld [vmem:[#allocation2 + $0x100] ss:$16 sps:$4 sm:$0xff]   ;;  %v7840_v28 = vld [vmem:[#allocation2 + $0x124] ss:$16 sps:$4 sm:$0xff]  }
  0x9b   :  { %v403_v47 = vand.u32 4294901760, %v402_v55  ;;  %v1181_v19 = vld [vmem:[#allocation6 + $0x70] sm:$0xff] }
  0x9c   :  { %7587 = vmatpush1.bf16.msra.mxu0 %v7586_v24  ;;  %v390_v24 = vsub.f32 %v9215_v7, %v389_v15  ;;  %v7610_v15 = vpack.c.bf16 %v9104_v27, %v9079_v22  ;;  %v7625_v22 = vpack.c.bf16 %v9198_v57, %v9196_v52  ;;  %v7628_v27 = vpack.c.bf16 %v9215_v7, %v9213_v6  ;;  %v7845_v52 = vld [vmem:[#allocation2 + $0xc] ss:$16 sps:$4 sm:$0xff]   ;;  %v1169_v57 = vld [vmem:[#allocation6 + $0x10] sm:$0xff] }
  0x9d   :  { %7588 = vmatprep.subr.bf16.mxu0 %v8671_v1  ;;  %v7601_v31 = vpack.c.bf16 %v403_v47, %v397_v37  ;;  %v1185_v54 = vld [vmem:[#allocation6 + $0x90] sm:$0xff] }
  0x9e   :  { %v391_v45 = vand.u32 4294901760, %v390_v24  ;;  %v1189_v32 = vld [vmem:[#allocation6 + $0xb0] sm:$0xff] }
  0x9f   :  { %v6772_v12 = vcombine.high %v1185_v54, %v1189_v32  ;;  %v1193_v24 = vld [vmem:[#allocation6 + $0xd0] sm:$0xff] }
  0xa0   :  { %7590 = vmatpush1.bf16.msra.mxu0 %v7589_v53  ;;  %v7598_v53 = vpack.c.bf16 %v391_v45, %v385_v63  ;;  %v1201_v63 = vld [vmem:[#allocation6 + $0x110] sm:$0xff] }
  0xa1   :  { %7591 = vmatprep.subr.bf16.mxu0 %v8671_v1  ;;  %v1205_v45 = vld [vmem:[#allocation6 + $0x130] sm:$0xff] }
  0xa2   :  { %v6788_v55 = vcombine.high %v1201_v63, %v1205_v45  ;;  %v1213_v37 = vld [vmem:[#allocation6 + $0x170] sm:$0xff] }
  0xa3   :  { %v1257_v61 = vld [vmem:[#allocation6 + $0x2d0] sm:$0xff] }
  0xa4   :  { %7593 = vmatpush1.bf16.msra.mxu0 %v7592_v36  ;;  %v6771_v36 = vcombine.low %v1185_v54, %v1189_v32  ;;  %v7854_v54 = vld [vmem:[#allocation2 + $0x6c] ss:$16 sps:$4 sm:$0xff]   ;;  %v7852_v32 = vld [vmem:[#allocation2 + $0x68] ss:$16 sps:$4 sm:$0xff]  }
  0xa5   :  { %7594 = vmatprep.subr.bf16.mxu0 %v8671_v1 }
  0xa8   :  { %7596 = vmatpush1.bf16.msra.mxu0 %v7595_v29 }
  0xa9   :  { %7597 = vmatprep.subr.bf16.mxu0 %v8671_v1 }
  0xac   :  { %7599 = vmatpush1.bf16.msra.mxu0 %v7598_v53  ;;  %v1209_v53 = vld [vmem:[#allocation6 + $0x150] sm:$0xff] }
  0xad   :  { %7600 = vmatprep.subr.bf16.mxu0 %v8671_v1  ;;  %v6796_v47 = vcombine.high %v1209_v53, %v1213_v37 }
  0xb0   :  { %7602 = vmatpush1.bf16.msra.mxu0 %v7601_v31  ;;  %v6795_v31 = vcombine.low %v1209_v53, %v1213_v37  ;;  %v7872_v53 = vld [vmem:[#allocation2 + $0x12c] ss:$16 sps:$4 sm:$0xff]   ;;  %v1167_v37 = vld [vmem:[#allocation6] sm:$0xff] }
  0xb1   :  { %7603 = vmatprep.subr.bf16.mxu0 %v8671_v1 }
  0xb3   :  { %432 = vmatmul.mubr.f32.vlgmr.msra.gmra.mrb[0].mxu0 %v9025_v4 }
  0xb4   :  { %7605 = vmatpush1.bf16.msra.mxu0 %v7604_v2  ;;  %523 = vmatprep.mubr.f32.mxu0 %v9048_v11  ;;  %v9703_v11 = vand.u32 4294901760, %v9065_v17  ;;  %v1217_v2 = vld [vmem:[#allocation6 + $0x190] sm:$0xff] }
  0xb5   :  { %7606 = vmatprep.subr.bf16.mxu0 %v8671_v1 }
  0xb8   :  { %7608 = vmatpush1.bf16.msra.mxu0 %v7607_v16  ;;  %v1221_v16 = vld [vmem:[#allocation6 + $0x1b0] sm:$0xff] }
  0xb9   :  { %7609 = vmatprep.subr.bf16.mxu0 %v8671_v1 }
  0xbc   :  { %7611 = vmatpush1.bf16.msra.mxu0 %v7610_v15  ;;  %v6804_v15 = vcombine.high %v1217_v2, %v1221_v16 }
  0xbd   :  { %7612 = vmatprep.subr.bf16.mxu0 %v8671_v1 }
  0xc0   :  { %7614 = vmatpush1.bf16.msra.mxu0 %v7613_v50  ;;  %v6803_v50 = vcombine.low %v1217_v2, %v1221_v16  ;;  %v1175_v16 = vld [vmem:[#allocation6 + $0x40] sm:$0xff] }
  0xc1   :  { %7615 = vmatprep.subr.bf16.mxu0 %v8671_v1 }
  0xc4   :  { %7617 = vmatpush1.bf16.msra.mxu0 %v7616_v58  ;;  %v1225_v58 = vld [vmem:[#allocation6 + $0x1d0] sm:$0xff] }
  0xc5   :  { %7618 = vmatprep.subr.bf16.mxu0 %v8671_v1 }
  0xc8   :  { %7620 = vmatpush1.bf16.msra.mxu0 %v7619_v13  ;;  %v1229_v13 = vld [vmem:[#allocation6 + $0x1f0] sm:$0xff] }
  0xc9   :  { %7621 = vmatprep.subr.bf16.mxu0 %v8671_v1 }
  0xcc   :  { %7623 = vmatpush1.bf16.msra.mxu0 %v7622_v8  ;;  %v6812_v8 = vcombine.high %v1225_v58, %v1229_v13 }
  0xcd   :  { %7624 = vmatprep.subr.bf16.mxu0 %v8671_v1 }
  0xd0   :  { %7626 = vmatpush1.bf16.msra.mxu0 %v7625_v22  ;;  %v6811_v22 = vcombine.low %v1225_v58, %v1229_v13  ;;  %v1183_v13 = vld [vmem:[#allocation6 + $0x80] sm:$0xff] }
  0xd1   :  { %7627 = vmatprep.subr.bf16.mxu0 %v8671_v1 }
  0xd4   :  { %7629 = vmatpush1.bf16.msra.mxu0 %v7628_v27  ;;  %v1233_v27 = vld [vmem:[#allocation6 + $0x210] sm:$0xff] }
  0xd5   :  { %7630 = vmatprep.subr.bf16.mxu0 %v8671_v1 }
  0xd8   :  { %7632 = vmatpush1.bf16.msra.mxu0 %v7631_v41  ;;  %v1237_v41 = vld [vmem:[#allocation6 + $0x230] sm:$0xff] }
  0xd9   :  { %7633 = vmatprep.subr.bf16.mxu0 %v8671_v1 }
  0xdb   :  { %526 = vmatmul.mubr.f32.vlgmr.msra.gmra.mrb[0].mxu0 %v9065_v17  ;;  %v7828_v17 = vld [vmem:[#allocation2 + $0xa4] ss:$16 sps:$4 sm:$0xff]  }
  0xdc   :  { %7635 = vmatpush1.bf16.msk.msra.mxu0 %vm9697_vm15, %v9696_v43  ;;  %598 = vmatprep.mubr.f32.mxu0 %v9698_v60  ;;  %v6819_v60 = vcombine.low %v1233_v27, %v1237_v41 }
  0xdd   :  { %7636 = vmatprep.subr.bf16.mxu0 %v8671_v1 }
  0xe0   :  { %7638 = vmatpush1.bf16.msk.msra.mxu0 %vm9699_vm5, %v9696_v43 }
  0xe1   :  { %7639 = vmatprep.subr.bf16.mxu0 %v8671_v1 }
  0xe4   :  { %7641 = vmatpush1.bf16.msk.msra.mxu0 %vm9700_vm11, %v9696_v43 }
  0xe5   :  { %7642 = vmatprep.subr.bf16.mxu0 %v8671_v1 }
  0xe8   :  { %7644 = vmatpush1.bf16.msk.msra.mxu0 %vm9701_vm6, %v9696_v43 }
  0xe9   :  { %7645 = vmatprep.subr.bf16.mxu0 %v8671_v1 }
  0xec   :  { %7647 = vmatpush1.bf16.msk.msra.mxu0 %vm9702_vm2, %v9696_v43 }
  0xed   :  { %7648 = vmatprep.subr.bf16.mxu0 %v8671_v1 }
  0xf0   :  { %7650 = vmatpush1.bf16.msk.msra.mxu0 %vm8947_vm1, %v9696_v43 }
  0xf1   :  { %7651 = vmatprep.subr.bf16.mxu0 %v8671_v1 }
  0xf4   :  { %7653 = vmatpush1.bf16.msk.msra.mxu0 %vm8978_vm3, %v9696_v43 }
  0xf5   :  { %7654 = vmatprep.subr.bf16.mxu0 %v8671_v1 }
  0xf8   :  { %7656 = vmatpush1.bf16.msk.msra.mxu0 %vm9011_vm12, %v9696_v43 }
  0xf9   :  { %7657 = vmatprep.subr.bf16.mxu0 %v8671_v1 }
  0xfc   :  { %7659 = vmatpush1.bf16.msk.msra.mxu0 %vm9043_vm8, %v9696_v43 }
  0xfd   :  { %7660 = vmatprep.subr.bf16.mxu0 %v8671_v1 }
 0x100   :  { %7662 = vmatpush1.bf16.msk.msra.mxu0 %vm9085_vm14, %v9696_v43 }
 0x101   :  { %7663 = vmatprep.subr.bf16.mxu0 %v8671_v1 }
 0x103   :  { %602 = vmatmul.mubr.f32.vlgmr.msra.gmra.mrb[0].mxu0 %v9703_v11  ;;  %v1241_v11 = vld [vmem:[#allocation6 + $0x250] sm:$0xff] }
 0x104   :  { %7665 = vmatpush1.bf16.msra.mxu0 %v9169_v46  ;;  %712 = vmatprep.mubr.f32.mxu0 %v9023_v0  ;;  %v9395_v46 = vcvt.s32.f32 %v8777_v3 }
 0x105   :  { %7666 = vmatprep.subr.bf16.mxu0 %v8671_v1 }
 0x108   :  { %7668 = vmatpush1.bf16.msra.mxu0 %v9171_v48 }
 0x109   :  { %7669 = vmatprep.subr.bf16.mxu0 %v8671_v1 }
 0x10c   :  { %7671 = vmatpush1.bf16.msra.mxu0 %v9173_v18 }
 0x10d   :  { %7672 = vmatprep.subr.bf16.mxu0 %v8671_v1 }
 0x110   :  { %7674 = vmatpush1.bf16.msra.mxu0 %v9175_v5  ;;  %v7837_v5 = vld [vmem:[#allocation2 + $0x104] ss:$16 sps:$4 sm:$0xff]  }
 0x111   :  { %7675 = vmatprep.subr.bf16.mxu0 %v8671_v1 }
 0x114   :  { %7677 = vmatpush1.bf16.msra.mxu0 %v9192_v34  ;;  %v7842_v34 = vld [vmem:[#allocation2 + $0x120] ss:$16 sps:$4 sm:$0xff]  }
 0x115   :  { %7678 = vmatprep.subr.bf16.mxu0 %v8671_v1 }
 0x118   :  { %7680 = vmatpush1.bf16.msra.mxu0 %v9209_v9  ;;  %v1173_v9 = vld [vmem:[#allocation6 + $0x30] sm:$0xff] }
 0x119   :  { %7681 = vmatprep.subr.bf16.mxu0 %v8671_v1  ;;  %v6755_v6 = vcombine.low %v1169_v57, %v1173_v9  ;;  %v6756_v7 = vcombine.high %v1169_v57, %v1173_v9 }
 0x11c   :  { %7683 = vmatpush1.bf16.msra.mxu0 %v9226_v40  ;;  %v1177_v40 = vld [vmem:[#allocation6 + $0x50] sm:$0xff] }
 0x11d   :  { %7684 = vmatprep.subr.bf16.mxu0 %v8671_v1  ;;  %v6764_v56 = vcombine.high %v1177_v40, %v1181_v19 }
 0x120   :  { %7686 = vmatpush1.bf16.msra.mxu0 %v9237_v59  ;;  %v6763_v59 = vcombine.low %v1177_v40, %v1181_v19  ;;  %v7843_v40 = vld [vmem:[#allocation2 + $0x8] ss:$16 sps:$4 sm:$0xff]   ;;  %v7848_v19 = vld [vmem:[#allocation2 + $0x2c] ss:$16 sps:$4 sm:$0xff]  }
 0x121   :  { %7687 = vmatprep.subr.bf16.mxu0 %v8671_v1 }
 0x124   :  { %7689 = vmatpush1.bf16.msra.mxu0 %v9244_v38  ;;  %v1197_v38 = vld [vmem:[#allocation6 + $0xf0] sm:$0xff] }
 0x125   :  { %7690 = vmatprep.subr.bf16.mxu0 %v8671_v1  ;;  %v6780_v33 = vcombine.high %v1193_v24, %v1197_v38  ;;  %v6779_v29 = vcombine.low %v1193_v24, %v1197_v38  ;;  %v7860_v24 = vld [vmem:[#allocation2 + $0xac] ss:$16 sps:$4 sm:$0xff]   ;;  %v7858_v38 = vld [vmem:[#allocation2 + $0xa8] ss:$16 sps:$4 sm:$0xff]  }
 0x128   :  { %7692 = vmatpush1.bf16.msra.mxu0 %v9249_v42  ;;  %v6787_v42 = vcombine.low %v1201_v63, %v1205_v45  ;;  %v7866_v63 = vld [vmem:[#allocation2 + $0xec] ss:$16 sps:$4 sm:$0xff]   ;;  %v7864_v45 = vld [vmem:[#allocation2 + $0xe8] ss:$16 sps:$4 sm:$0xff]  }
 0x129   :  { %7693 = vmatprep.subr.bf16.mxu0 %v8671_v1 }
 0x12b   :  { %714 = vmatmul.mubr.f32.vlgmr.msra.gmra.mrb[0].mxu0 %v9025_v4 }
 0x12c   :  { %7695 = vmatpush1.bf16.msk.msra.mxu0 %vm9697_vm15, %v9696_v43  ;;  %784 = vmatprep.mubr.f32.mxu0 %v9023_v0  ;;  %v7824_v0 = vld [vmem:[#allocation2 + $0x60] ss:$16 sps:$4 sm:$0xff]  }
 0x12d   :  { %7696 = vmatprep.subr.bf16.mxu0 %v8671_v1 }
 0x130   :  { %7698 = vmatpush1.bf16.msk.msra.mxu0 %vm9699_vm5, %v9696_v43 }
 0x131   :  { %7699 = vmatprep.subr.bf16.mxu0 %v8671_v1 }
 0x134   :  { %7701 = vmatpush1.bf16.msk.msra.mxu0 %vm9700_vm11, %v9696_v43 }
 0x135   :  { %7702 = vmatprep.subr.bf16.mxu0 %v8671_v1 }
 0x138   :  { %7704 = vmatpush1.bf16.msk.msra.mxu0 %vm9701_vm6, %v9696_v43 }
 0x139   :  { %7705 = vmatprep.subr.bf16.mxu0 %v8671_v1 }
 0x13c   :  { %7707 = vmatpush1.bf16.msk.msra.mxu0 %vm9702_vm2, %v9696_v43 }
 0x13d   :  { %7708 = vmatprep.subr.bf16.mxu0 %v8671_v1 }
 0x140   :  { %7710 = vmatpush1.bf16.msk.msra.mxu0 %vm8947_vm1, %v9696_v43 }
 0x141   :  { %7711 = vmatprep.subr.bf16.mxu0 %v8671_v1 }
 0x144   :  { %7713 = vmatpush1.bf16.msk.msra.mxu0 %vm8978_vm3, %v9696_v43 }
 0x145   :  { %7714 = vmatprep.subr.bf16.mxu0 %v8671_v1 }
 0x148   :  { %7716 = vmatpush1.bf16.msk.msra.mxu0 %vm9011_vm12, %v9696_v43 }
 0x149   :  { %7717 = vmatprep.subr.bf16.mxu0 %v8671_v1 }
 0x14c   :  { %7719 = vmatpush1.bf16.msk.msra.mxu0 %vm9043_vm8, %v9696_v43 }
 0x14d   :  { %7720 = vmatprep.subr.bf16.mxu0 %v8671_v1  ;;  %v7822_v1 = vld [vmem:[#allocation2 + $0x64] ss:$16 sps:$4 sm:$0xff]  }
 0x14e   :  { %1083 = vmatprep.subr.bf16.mxu1 %v7822_v1  ;;  %v1261_v1 = vld [vmem:[#allocation6 + $0x2f0] sm:$0xff] }
 0x14f   :  { %1084 = vmatpush1.bf16.msra.mxu1 %v7824_v0  ;;  %v6844_v0 = vcombine.high %v1257_v61, %v1261_v1 }
 0x150   :  { %7722 = vmatpush1.bf16.msk.msra.mxu0 %vm9085_vm14, %v9696_v43  ;;  %1085 = vmatprep.subr.bf16.mxu1 %v7825_v10  ;;  %v6820_v43 = vcombine.high %v1233_v27, %v1237_v41  ;;  %v6843_v10 = vcombine.low %v1257_v61, %v1261_v1  ;;  %v1191_v41 = vld [vmem:[#allocation6 + $0xc0] sm:$0xff] }
 0x151   :  { %2909 = vmatprep.subr.bf16.mxu0 %v6756_v7  ;;  %v1215_v1 = vld [vmem:[#allocation6 + $0x180] sm:$0xff] }
 0x153   :  { %786 = vmatmul.mubr.f32.vlgmr.msra.gmra.mrb[0].mxu0 %v9025_v4  ;;  %v7827_v4 = vld [vmem:[#allocation2 + $0x80] ss:$16 sps:$4 sm:$0xff]  }
 0x154   :  { %1086 = vmatpush1.bf16.msra.mxu1 %v7827_v4  ;;  %2910 = vmatpush1.bf16.msra.mxu0 %v6755_v6  ;;  %v1265_v4 = vld [vmem:[#allocation6 + $0x310] sm:$0xff] }
 0x155   :  { %1087 = vmatprep.subr.bf16.mxu1 %v7828_v17  ;;  %2911 = vmatprep.subr.bf16.mxu0 %v6764_v56  ;;  %v1269_v17 = vld [vmem:[#allocation6 + $0x330] sm:$0xff]  ;;  %v7851_v56 = vld [vmem:[#allocation2 + $0x4c] ss:$16 sps:$4 sm:$0xff]  }
 0x158   :  { %1088 = vmatpush1.bf16.msra.mxu1 %v7830_v21  ;;  %2912 = vmatpush1.bf16.msra.mxu0 %v6763_v59  ;;  %v6852_v21 = vcombine.high %v1265_v4, %v1269_v17  ;;  %v7849_v59 = vld [vmem:[#allocation2 + $0x48] ss:$16 sps:$4 sm:$0xff]  }
 0x159   :  { %1089 = vmatprep.subr.bf16.mxu1 %v7831_v23  ;;  %2913 = vmatprep.subr.bf16.mxu0 %v6772_v12  ;;  %v6851_v23 = vcombine.low %v1265_v4, %v1269_v17  ;;  %v7857_v12 = vld [vmem:[#allocation2 + $0x8c] ss:$16 sps:$4 sm:$0xff]   ;;  %v1223_v17 = vld [vmem:[#allocation6 + $0x1c0] sm:$0xff] }
 0x15c   :  { %1090 = vmatpush1.bf16.msra.mxu1 %v7833_v62  ;;  %2914 = vmatpush1.bf16.msra.mxu0 %v6771_v36  ;;  %v1273_v62 = vld [vmem:[#allocation6 + $0x350] sm:$0xff] }
 0x15d   :  { %1091 = vmatprep.subr.bf16.mxu1 %v7834_v39  ;;  %2915 = vmatprep.subr.bf16.mxu0 %v6780_v33  ;;  %v1277_v39 = vld [vmem:[#allocation6 + $0x370] sm:$0xff]  ;;  %v7863_v33 = vld [vmem:[#allocation2 + $0xcc] ss:$16 sps:$4 sm:$0xff]  }
 0x15e   :  { %v7855_v36 = vld [vmem:[#allocation2 + $0x88] ss:$16 sps:$4 sm:$0xff]  }
 0x160   :  { %1092 = vmatpush1.bf16.msra.mxu1 %v7836_v49  ;;  %2916 = vmatpush1.bf16.msra.mxu0 %v6779_v29  ;;  %v6860_v49 = vcombine.high %v1273_v62, %v1277_v39  ;;  %v7861_v29 = vld [vmem:[#allocation2 + $0xc8] ss:$16 sps:$4 sm:$0xff]  }
 0x161   :  { %1093 = vmatprep.subr.bf16.mxu1 %v7837_v5  ;;  %2917 = vmatprep.subr.bf16.mxu0 %v6788_v55  ;;  %v7869_v55 = vld [vmem:[#allocation2 + $0x10c] ss:$16 sps:$4 sm:$0xff]  }
 0x164   :  { %1094 = vmatpush1.bf16.msra.mxu1 %v7839_v26  ;;  %2918 = vmatpush1.bf16.msra.mxu0 %v6787_v42  ;;  %v7867_v42 = vld [vmem:[#allocation2 + $0x108] ss:$16 sps:$4 sm:$0xff]  }
 0x165   :  { %1095 = vmatprep.subr.bf16.mxu1 %v7840_v28  ;;  %2919 = vmatprep.subr.bf16.mxu0 %v6796_v47  ;;  %v1171_v47 = vld [vmem:[#allocation6 + $0x20] sm:$0xff] }
 0x166   :  { %v6752_v2 = vcombine.high %v1167_v37, %v1171_v47 }
 0x168   :  { %1096 = vmatpush1.bf16.msra.mxu1 %v7842_v34  ;;  %2920 = vmatpush1.bf16.msra.mxu0 %v6795_v31  ;;  %v7870_v31 = vld [vmem:[#allocation2 + $0x128] ss:$16 sps:$4 sm:$0xff]  }
 0x169   :  { %1118 = vmatprep.subr.bf16.mxu1 %v7845_v52  ;;  %2921 = vmatprep.subr.bf16.mxu0 %v6804_v15  ;;  %v8541_v52 = vld [vmem:[%s9594_s0 + $0x8] sm:$0xff] }
 0x16a   :  { %v1179_v15 = vld [vmem:[#allocation6 + $0x60] sm:$0xff] }
 0x16b   :  { %v6760_v58 = vcombine.high %v1175_v16, %v1179_v15 }
 0x16c   :  { %2922 = vmatpush1.bf16.msra.mxu0 %v6803_v50  ;;  %v6751_v50 = vcombine.low %v1167_v37, %v1171_v47 }
 0x16d   :  { %2923 = vmatprep.subr.bf16.mxu0 %v6812_v8  ;;  %v1187_v8 = vld [vmem:[#allocation6 + $0xa0] sm:$0xff] }
 0x16e   :  { %v6768_v27 = vcombine.high %v1183_v13, %v1187_v8 }
 0x170   :  { %2924 = vmatpush1.bf16.msra.mxu0 %v6811_v22  ;;  %v6759_v22 = vcombine.low %v1175_v16, %v1179_v15  ;;  %v1299_v16 = vld [vmem:[#allocation6 + $0x420] sm:$0xff]  ;;  %v1297_v15 = vld [vmem:[#allocation6 + $0x410] sm:$0xff] }
 0x171   :  { %2925 = vmatprep.subr.bf16.mxu0 %v6820_v43  ;;  %v1195_v43 = vld [vmem:[#allocation6 + $0xe0] sm:$0xff] }
 0x174   :  { %2926 = vmatpush1.bf16.msra.mxu0 %v6819_v60  ;;  %v6767_v60 = vcombine.low %v1183_v13, %v1187_v8  ;;  %v1287_v13 = vld [vmem:[#allocation6 + $0x3c0] sm:$0xff] }
 0x175   :  { %v1291_v8 = vld [vmem:[#allocation6 + $0x3e0] sm:$0xff] }
 0x226   :  { %v787_v14 = vpop.f32.mrb[0].mxu0 }
 0x227   :  { %791 = vmax.xlane.f32.xlu0 %v787_v14  ;;  %v789_v20 = vpop.f32.mrb[1].mxu0 }
 0x2b4   :  { %v792_v48 = vpop.xlane.xlu0 %791 }
 0x2b5   :  { %vm794_vm1 = vcmp.ge.f32.partialorder %v787_v14, %v792_v48  ;;  %v1245_v14 = vld [vmem:[#allocation6 + $0x270] sm:$0xff]  ;;  %v6859_v48 = vcombine.low %v1273_v62, %v1277_v39  ;;  %v1231_v39 = vld [vmem:[#allocation6 + $0x200] sm:$0xff] }
 0x2b6   :  { %v795_v18 = vsel %vm794_vm1, %v9395_v46, 128.0  ;;  %v6828_v20 = vcombine.high %v1241_v11, %v1245_v14  ;;  %v6827_v25 = vcombine.low %v1241_v11, %v1245_v14  ;;  %v6776_v11 = vcombine.high %v1191_v41, %v1195_v43  ;;  %v1199_v14 = vld [vmem:[#allocation6 + $0x100] sm:$0xff] }
 0x2b7   :  { %796 = vmin.xlane.f32.xlu0 %v795_v18  ;;  %v799_v18 = vadd.s32 128, %v8777_v3  ;;  %v8542_v3 = vld [vmem:[%s9594_s0] sm:$0xff] }
 0x2b8   :  { %2927 = vmatprep.subr.bf16.mxu0 %v6828_v20  ;;  %v6745_v6 = vpack.c.bf16 %v8542_v3, %v8542_v3  ;;  %v1203_v20 = vld [vmem:[#allocation6 + $0x120] sm:$0xff] }
 0x2b9   :  { %2928 = vmatpush1.bf16.msra.mxu0 %v6827_v25  ;;  %v800_v28 = vcvt.s32.f32 %v799_v18  ;;  %v6775_v25 = vcombine.low %v1191_v41, %v1195_v43  ;;  %v6784_v30 = vcombine.high %v1199_v14, %v1203_v20 }
 0x2ba   :  { %2929 = vmatprep.subr.bf16.mxu0 %v6836_v44  ;;  %v1211_v44 = vld [vmem:[#allocation6 + $0x160] sm:$0xff] }
 0x2bb   :  { %v6792_v61 = vcombine.high %v1207_v35, %v1211_v44 }
 0x2bd   :  { %2930 = vmatpush1.bf16.msra.mxu0 %v6835_v51  ;;  %v6783_v51 = vcombine.low %v1199_v14, %v1203_v20  ;;  %v9708_v20 = vld [vmem:[#allocation13_spill] sm:$0xff] }
 0x2be   :  { %2931 = vmatprep.subr.bf16.mxu0 %v6844_v0  ;;  %v1219_v0 = vld [vmem:[#allocation6 + $0x1a0] sm:$0xff] }
 0x2bf   :  { %v6800_v4 = vcombine.high %v1215_v1, %v1219_v0 }
 0x2c1   :  { %2932 = vmatpush1.bf16.msra.mxu0 %v6843_v10  ;;  %v6791_v10 = vcombine.low %v1207_v35, %v1211_v44  ;;  %v9432_v35 = vsub.s32 1, %v9708_v20 }
 0x2c2   :  { %2933 = vmatprep.subr.bf16.mxu0 %v6852_v21  ;;  %v1227_v21 = vld [vmem:[#allocation6 + $0x1e0] sm:$0xff] }
 0x2c3   :  { %v6808_v62 = vcombine.high %v1223_v17, %v1227_v21 }
 0x2c5   :  { %2934 = vmatpush1.bf16.msra.mxu0 %v6851_v23  ;;  %v6799_v23 = vcombine.low %v1215_v1, %v1219_v0 }
 0x2c6   :  { %2935 = vmatprep.subr.bf16.mxu0 %v6860_v49  ;;  %v1235_v49 = vld [vmem:[#allocation6 + $0x220] sm:$0xff] }
 0x2c7   :  { %v6816_v18 = vcombine.high %v1231_v39, %v1235_v49 }
 0x2c9   :  { %2936 = vmatpush1.bf16.msra.mxu0 %v6859_v48  ;;  %v6807_v48 = vcombine.low %v1223_v17, %v1227_v21 }
 0x344   :  { %v797_v5 = vpop.xlane.xlu0 %796 }
 0x345   :  { %v798_v26 = vmul.f32 16.0, %v797_v5  ;;  %v1239_v5 = vld [vmem:[#allocation6 + $0x240] sm:$0xff] }
 0x347   :  { %v803_v34 = vadd.f32 16.0, %v798_v26  ;;  %vm802_vm3 = vcmp.ge.f32.partialorder %v800_v28, %v798_v26  ;;  %vm801_vm4 = vcmp.ge.f32.partialorder %v9395_v46, %v798_v26  ;;  %v1243_v26 = vld [vmem:[#allocation6 + $0x260] sm:$0xff] }
 0x348   :  { %v6823_v9 = vcombine.low %v1239_v5, %v1243_v26 }
 0x349   :  { %vm805_vm12 = vcmp.lt.f32.partialorder %v800_v28, %v803_v34  ;;  %vm804_vm8 = vcmp.lt.f32.partialorder %v9395_v46, %v803_v34  ;;  %v7846_v46 = vld [vmem:[#allocation2 + $0x28] ss:$16 sps:$4 sm:$0xff]   ;;  %v6815_v28 = vcombine.low %v1231_v39, %v1235_v49  ;;  %v6824_v34 = vcombine.high %v1239_v5, %v1243_v26 }
 0x34a   :  { %vm807_vm14 = vmand %vm802_vm3, %vm805_vm12  ;;  %v1307_v39 = vld [vmem:[#allocation6 + $0x460] sm:$0xff]  ;;  %v1305_v49 = vld [vmem:[#allocation6 + $0x450] sm:$0xff] }
 0x34b   :  { %v809_v57 = vsel %vm807_vm14, %v8541_v52, 0.0  ;;  %vm9404_vm7 = vmand %vm801_vm4, %vm804_vm8  ;;  %v1247_v52 = vld [vmem:[#allocation6 + $0x280] sm:$0xff] }
 0x34c   :  { %v811_v7 = vpack.c.bf16 %v809_v57, %v809_v57  ;;  %vm6744_vm9 = vmpackc.low %vm9404_vm7, %vm9404_vm7  ;;  %v1251_v57 = vld [vmem:[#allocation6 + $0x2a0] sm:$0xff] }
 0x34d   :  { %v6832_v3 = vcombine.high %v1247_v52, %v1251_v57 }
 0x34e   :  { %6743 = vmatprep.mubr.msk.bf16.mxu1 %vm9706_vm13, %v811_v7 }
 0x34f   :  { %6746 = vmatmul.mubr.msk.bf16.vlgmr.msra.gmra.mrb[0].mxu1 %vm6744_vm9, %v6745_v6 }
 0x350   :  { %1119 = vmatpush1.bf16.msra.mxu1 %v7843_v40  ;;  %6747 = vmatprep.mubr.msk.bf16.mxu1 %vm9707_vm10, %v811_v7  ;;  %v1259_v7 = vld [vmem:[#allocation6 + $0x2e0] sm:$0xff]  ;;  %v6831_v40 = vcombine.low %v1247_v52, %v1251_v57  ;;  %v1313_v57 = vld [vmem:[#allocation6 + $0x490] sm:$0xff] }
 0x351   :  { %1120 = vmatprep.subr.bf16.mxu1 %v7848_v19  ;;  %v1315_v52 = vld [vmem:[#allocation6 + $0x4a0] sm:$0xff] }
 0x354   :  { %1121 = vmatpush1.bf16.msra.mxu1 %v7846_v46  ;;  %v1263_v46 = vld [vmem:[#allocation6 + $0x300] sm:$0xff] }
 0x355   :  { %1122 = vmatprep.subr.bf16.mxu1 %v7851_v56  ;;  %v1267_v56 = vld [vmem:[#allocation6 + $0x320] sm:$0xff] }
 0x358   :  { %1123 = vmatpush1.bf16.msra.mxu1 %v7849_v59 }
 0x359   :  { %1124 = vmatprep.subr.bf16.mxu1 %v7854_v54  ;;  %v1281_v54 = vld [vmem:[#allocation6 + $0x390] sm:$0xff] }
 0x35c   :  { %1125 = vmatpush1.bf16.msra.mxu1 %v7852_v32  ;;  %v6848_v32 = vcombine.high %v1263_v46, %v1267_v56 }
 0x35d   :  { %1126 = vmatprep.subr.bf16.mxu1 %v7857_v12  ;;  %v1285_v12 = vld [vmem:[#allocation6 + $0x3b0] sm:$0xff] }
 0x360   :  { %1127 = vmatpush1.bf16.msra.mxu1 %v7855_v36  ;;  %v1271_v36 = vld [vmem:[#allocation6 + $0x340] sm:$0xff] }
 0x361   :  { %1128 = vmatprep.subr.bf16.mxu1 %v7860_v24  ;;  %v1275_v24 = vld [vmem:[#allocation6 + $0x360] sm:$0xff] }
 0x364   :  { %1129 = vmatpush1.bf16.msra.mxu1 %v7858_v38  ;;  %v6867_v38 = vcombine.low %v1281_v54, %v1285_v12 }
 0x365   :  { %1130 = vmatprep.subr.bf16.mxu1 %v7863_v33  ;;  %v6868_v33 = vcombine.high %v1281_v54, %v1285_v12 }
 0x367   :  { %2937 = vmatprep.subr.bf16.mxu0 %v6868_v33  ;;  %v1329_v33 = vld [vmem:[#allocation6 + $0x510] sm:$0xff] }
 0x368   :  { %1131 = vmatpush1.bf16.msra.mxu1 %v7861_v29  ;;  %v6847_v29 = vcombine.low %v1263_v46, %v1267_v56  ;;  %2938 = vmatpush1.bf16.msra.mxu0 %v6867_v38  ;;  %v1323_v46 = vld [vmem:[#allocation6 + $0x4e0] sm:$0xff]  ;;  %v1321_v56 = vld [vmem:[#allocation6 + $0x4d0] sm:$0xff] }
 0x369   :  { %1132 = vmatprep.subr.bf16.mxu1 %v7866_v63  ;;  %v1289_v63 = vld [vmem:[#allocation6 + $0x3d0] sm:$0xff]  ;;  %v1331_v38 = vld [vmem:[#allocation6 + $0x520] sm:$0xff] }
 0x36c   :  { %1133 = vmatpush1.bf16.msra.mxu1 %v7864_v45  ;;  %v6856_v45 = vcombine.high %v1271_v36, %v1275_v24 }
 0x36d   :  { %1134 = vmatprep.subr.bf16.mxu1 %v7869_v55  ;;  %v1293_v55 = vld [vmem:[#allocation6 + $0x3f0] sm:$0xff] }
 0x36e   :  { %v6875_v37 = vcombine.low %v1289_v63, %v1293_v55  ;;  %v6876_v47 = vcombine.high %v1289_v63, %v1293_v55 }
 0x370   :  { %1135 = vmatpush1.bf16.msra.mxu1 %v7867_v42  ;;  %v1279_v42 = vld [vmem:[#allocation6 + $0x380] sm:$0xff]  ;;  %2939 = vmatprep.subr.bf16.mxu0 %v6876_v47  ;;  %v1337_v47 = vld [vmem:[#allocation6 + $0x550] sm:$0xff] }
 0x371   :  { %1136 = vmatprep.subr.bf16.mxu1 %v7872_v53  ;;  %v1283_v53 = vld [vmem:[#allocation6 + $0x3a0] sm:$0xff]  ;;  %2940 = vmatpush1.bf16.msra.mxu0 %v6875_v37 }
 0x372   :  { %v6863_v43 = vcombine.low %v1279_v42, %v1283_v53  ;;  %v1339_v37 = vld [vmem:[#allocation6 + $0x560] sm:$0xff] }
 0x374   :  { %1137 = vmatpush1.bf16.msra.mxu1 %v7870_v31  ;;  %v6855_v31 = vcombine.low %v1271_v36, %v1275_v24  ;;  %v1327_v24 = vld [vmem:[#allocation6 + $0x500] sm:$0xff] }
 0x375   :  { %2745 = vmatprep.subr.bf16.mxu1 %v6752_v2  ;;  %v1295_v2 = vld [vmem:[#allocation6 + $0x400] sm:$0xff]  ;;  %v6912_v55 = vcombine.high %v1327_v24, %v1331_v38 }
 0x376   :  { %v6880_v14 = vcombine.high %v1295_v2, %v1299_v16 }
 0x377   :  { %6750 = vmatmul.mubr.msk.bf16.vlgmr.msra.gmra.mrb[4].mxu1 %vm6744_vm9, %v6745_v6  ;;  %v1255_v6 = vld [vmem:[#allocation6 + $0x2c0] sm:$0xff] }
 0x378   :  { %2746 = vmatpush1.bf16.msra.mxu1 %v6751_v50  ;;  %v6840_v19 = vcombine.high %v1255_v6, %v1259_v7  ;;  %v6839_v59 = vcombine.low %v1255_v6, %v1259_v7  ;;  %v6864_v50 = vcombine.high %v1279_v42, %v1283_v53  ;;  %v1335_v53 = vld [vmem:[#allocation6 + $0x540] sm:$0xff] }
 0x379   :  { %2747 = vmatprep.subr.bf16.mxu1 %v6760_v58  ;;  %v1301_v58 = vld [vmem:[#allocation6 + $0x430] sm:$0xff] }
 0x37a   :  { %v6884_v41 = vcombine.high %v1297_v15, %v1301_v58 }
 0x37c   :  { %2748 = vmatpush1.bf16.msra.mxu1 %v6759_v22  ;;  %v6879_v22 = vcombine.low %v1295_v2, %v1299_v16  ;;  %2950 = vmatprep.subr.bf16.mxu0 %v6884_v41  ;;  %v6911_v2 = vcombine.low %v1327_v24, %v1331_v38 }
 0x37d   :  { %2749 = vmatprep.subr.bf16.mxu1 %v6768_v27  ;;  %v6883_v27 = vcombine.low %v1297_v15, %v1301_v58  ;;  %v6920_v15 = vcombine.high %v1335_v53, %v1339_v37  ;;  %v1343_v58 = vld [vmem:[#allocation6 + $0x580] sm:$0xff] }
 0x380   :  { %2750 = vmatpush1.bf16.msra.mxu1 %v6767_v60  ;;  %v6872_v60 = vcombine.high %v1287_v13, %v1291_v8 }
 0x381   :  { %2751 = vmatprep.subr.bf16.mxu1 %v6776_v11  ;;  %v6871_v11 = vcombine.low %v1287_v13, %v1291_v8  ;;  %v1347_v13 = vld [vmem:[#allocation6 + $0x5a0] sm:$0xff]  ;;  %v1345_v8 = vld [vmem:[#allocation6 + $0x590] sm:$0xff] }
 0x384   :  { %2752 = vmatpush1.bf16.msra.mxu1 %v6775_v25  ;;  %v9427_v25 = vsub.s32 0, %v9708_v20 }
 0x385   :  { %2753 = vmatprep.subr.bf16.mxu1 %v6784_v30  ;;  %v9429_v30 = vld [vmem:[#allocation4] sm:$0xf] }
 0x386   :  { %v857_v44 = vrot.slane %v9429_v30, %v9427_v25 }
 0x388   :  { %2754 = vmatpush1.bf16.msra.mxu1 %v6783_v51  ;;  %v861_v51 = vrot.slane %v9429_v30, %v9432_v35 }
 0x389   :  { %2755 = vmatprep.subr.bf16.mxu1 %v6792_v61 }
 0x38c   :  { %2756 = vmatpush1.bf16.msra.mxu1 %v6791_v10 }
 0x38d   :  { %2757 = vmatprep.subr.bf16.mxu1 %v6800_v4 }
 0x390   :  { %2758 = vmatpush1.bf16.msra.mxu1 %v6799_v23  ;;  %v1303_v23 = vld [vmem:[#allocation6 + $0x440] sm:$0xff] }
 0x391   :  { %2759 = vmatprep.subr.bf16.mxu1 %v6808_v62  ;;  %v6888_v26 = vcombine.high %v1303_v23, %v1307_v39 }
 0x394   :  { %2760 = vmatpush1.bf16.msra.mxu1 %v6807_v48  ;;  %v1309_v48 = vld [vmem:[#allocation6 + $0x470] sm:$0xff] }
 0x395   :  { %2761 = vmatprep.subr.bf16.mxu1 %v6816_v18  ;;  %v6891_v6 = vcombine.low %v1305_v49, %v1309_v48 }
 0x398   :  { %2762 = vmatpush1.bf16.msra.mxu1 %v6815_v28  ;;  %v6892_v28 = vcombine.high %v1305_v49, %v1309_v48  ;;  %v9447_v49 = vsub.s32 3, %v9708_v20 }
 0x399   :  { %2763 = vmatprep.subr.bf16.mxu1 %v6824_v34  ;;  %v1311_v34 = vld [vmem:[#allocation6 + $0x480] sm:$0xff] }
 0x39a   :  { %v6896_v7 = vcombine.high %v1311_v34, %v1315_v52  ;;  %v6895_v54 = vcombine.low %v1311_v34, %v1315_v52  ;;  %v1371_v34 = vld [vmem:[#allocation6 + $0x660] sm:$0xff]  ;;  %v1369_v52 = vld [vmem:[#allocation6 + $0x650] sm:$0xff] }
 0x39c   :  { %2764 = vmatpush1.bf16.msra.mxu1 %v6823_v9  ;;  %v1317_v9 = vld [vmem:[#allocation6 + $0x4b0] sm:$0xff] }
 0x39d   :  { %2765 = vmatprep.subr.bf16.mxu1 %v6832_v3  ;;  %v6887_v3 = vcombine.low %v1303_v23, %v1307_v39  ;;  %v1365_v23 = vld [vmem:[#allocation6 + $0x630] sm:$0xff] }
 0x3a0   :  { %2766 = vmatpush1.bf16.msra.mxu1 %v6831_v40  ;;  %v6900_v40 = vcombine.high %v1313_v57, %v1317_v9 }
 0x3a1   :  { %2767 = vmatprep.subr.bf16.mxu1 %v6840_v19  ;;  %v1319_v19 = vld [vmem:[#allocation6 + $0x4c0] sm:$0xff] }
 0x3a2   :  { %v6904_v12 = vcombine.high %v1319_v19, %v1323_v46  ;;  %v6903_v63 = vcombine.low %v1319_v19, %v1323_v46  ;;  %v1375_v19 = vld [vmem:[#allocation6 + $0x680] sm:$0xff] }
 0x3a4   :  { %2768 = vmatpush1.bf16.msra.mxu1 %v6839_v59  ;;  %v1325_v59 = vld [vmem:[#allocation6 + $0x4f0] sm:$0xff] }
 0x3a5   :  { %2769 = vmatprep.subr.bf16.mxu1 %v6848_v32  ;;  %v6899_v32 = vcombine.low %v1313_v57, %v1317_v9  ;;  %v6908_v36 = vcombine.high %v1321_v56, %v1325_v59  ;;  %v1373_v57 = vld [vmem:[#allocation6 + $0x670] sm:$0xff]  ;;  %v869_v9 = vrot.slane %v9429_v30, %v9447_v49 }
 0x3a6   :  { %v6955_v38 = vcombine.low %v1369_v52, %v1373_v57 }
 0x3a8   :  { %2770 = vmatpush1.bf16.msra.mxu1 %v6847_v29  ;;  %v1333_v29 = vld [vmem:[#allocation6 + $0x530] sm:$0xff] }
 0x3a9   :  { %2771 = vmatprep.subr.bf16.mxu1 %v6856_v45  ;;  %v6907_v45 = vcombine.low %v1321_v56, %v1325_v59  ;;  %v6916_v42 = vcombine.high %v1329_v33, %v1333_v29  ;;  %v6915_v16 = vcombine.low %v1329_v33, %v1333_v29  ;;  %v1379_v56 = vld [vmem:[#allocation6 + $0x6a0] sm:$0xff]  ;;  %v1377_v59 = vld [vmem:[#allocation6 + $0x690] sm:$0xff] }
 0x3aa   :  { %v6960_v29 = vcombine.high %v1375_v19, %v1379_v56 }
 0x3ac   :  { %2772 = vmatpush1.bf16.msra.mxu1 %v6855_v31  ;;  %v1341_v31 = vld [vmem:[#allocation6 + $0x570] sm:$0xff] }
 0x3ad   :  { %2773 = vmatprep.subr.bf16.mxu1 %v6864_v50  ;;  %v6924_v50 = vcombine.high %v1337_v47, %v1341_v31  ;;  %v6923_v41 = vcombine.low %v1337_v47, %v1341_v31  ;;  %v6959_v31 = vcombine.low %v1375_v19, %v1379_v56  ;;  %v1168_v56 = vld [vmem:[#allocation6 + $0x8] sm:$0xff] }
 0x3b0   :  { %2774 = vmatpush1.bf16.msra.mxu1 %v6863_v43  ;;  %v6928_v43 = vcombine.high %v1343_v58, %v1347_v13 }
 0x3b1   :  { %2775 = vmatprep.subr.bf16.mxu1 %v6872_v60 }
 0x3b4   :  { %2776 = vmatpush1.bf16.msra.mxu1 %v6871_v11  ;;  %v1351_v11 = vld [vmem:[#allocation6 + $0x5c0] sm:$0xff] }
 0x3b5   :  { %2786 = vmatprep.subr.bf16.mxu1 %v6880_v14  ;;  %v1355_v14 = vld [vmem:[#allocation6 + $0x5e0] sm:$0xff] }
 0x422   :  { %v1111_v61 = vpop.f32.mrb[0].mxu1 }
 0x423   :  { %v1112_v1 = vadd.f32 %v1111_v61, %v857_v44  ;;  %v1113_v0 = vpop.f32.mrb[1].mxu1  ;;  %v1353_v44 = vld [vmem:[#allocation6 + $0x5d0] sm:$0xff]  ;;  %v6927_v61 = vcombine.low %v1343_v58, %v1347_v13  ;;  %v1395_v58 = vld [vmem:[#allocation6 + $0x720] sm:$0xff] }
 0x424   :  { %v1114_v10 = vadd.f32 %v1113_v0, %v861_v51  ;;  %v1115_v4 = vpop.f32.mrb[2].mxu1  ;;  %v1357_v51 = vld [vmem:[#allocation6 + $0x5f0] sm:$0xff]  ;;  %v6936_v0 = vcombine.high %v1351_v11, %v1355_v14 }
 0x425   :  { %v1159_v17 = vmax.f32 %v1112_v1, 0.0  ;;  %v1116_v21 = vpop.f32.mrb[3].mxu1  ;;  %v1359_v4 = vld [vmem:[#allocation6 + $0x600] sm:$0xff]  ;;  %v6939_v39 = vcombine.low %v1353_v44, %v1357_v51  ;;  %v1393_v13 = vld [vmem:[#allocation6 + $0x710] sm:$0xff] }
 0x426   :  { %v1160_v62 = vmax.f32 %v1114_v10, 0.0  ;;  %v6940_v10 = vcombine.high %v1353_v44, %v1357_v51  ;;  %v1361_v21 = vld [vmem:[#allocation6 + $0x610] sm:$0xff] }
 0x427   :  { %v9440_v5 = vpack.c.bf16 %v1159_v17, %v1159_v17  ;;  %v1363_v17 = vld [vmem:[#allocation6 + $0x620] sm:$0xff]  ;;  %v1405_v44 = vld [vmem:[#allocation6 + $0x770] sm:$0xff] }
 0x428   :  { %v9438_v18 = vpack.c.bf16 %v1160_v62, %v1160_v62  ;;  %v6935_v62 = vcombine.low %v1351_v11, %v1355_v14  ;;  %v6944_v48 = vcombine.high %v1359_v4, %v1363_v17  ;;  %v1403_v11 = vld [vmem:[#allocation6 + $0x760] sm:$0xff]  ;;  %v1401_v14 = vld [vmem:[#allocation6 + $0x750] sm:$0xff] }
 0x42a   :  { %2777 = vmatprep.mubr.bf16.mxu1 %v9438_v18  ;;  %2941 = vmatprep.mubr.bf16.mxu0 %v9438_v18 }
 0x42b   :  { %2778 = vmatmul.mubr.bf16.vlgmr.msra.gmra.mrb[8].mxu1 %v9440_v5  ;;  %2942 = vmatmul.mubr.bf16.vlgmr.msra.gmra.mrb[4].mxu0 %v9440_v5 }
 0x42c   :  { %2787 = vmatpush1.bf16.msra.mxu1 %v6879_v22  ;;  %2951 = vmatpush1.bf16.msra.mxu0 %v6883_v27  ;;  %v1349_v22 = vld [vmem:[#allocation6 + $0x5b0] sm:$0xff]  ;;  %v6919_v27 = vcombine.low %v1335_v53, %v1339_v37 }
 0x42d   :  { %2788 = vmatprep.subr.bf16.mxu1 %v6888_v26  ;;  %2952 = vmatprep.subr.bf16.mxu0 %v6892_v28  ;;  %v6932_v60 = vcombine.high %v1345_v8, %v1349_v22  ;;  %v6931_v1 = vcombine.low %v1345_v8, %v1349_v22  ;;  %v6948_v26 = vcombine.high %v1361_v21, %v1365_v23  ;;  %v1367_v28 = vld [vmem:[#allocation6 + $0x640] sm:$0xff]  ;;  %v1385_v53 = vld [vmem:[#allocation6 + $0x6d0] sm:$0xff] }
 0x42e   :  { %v6951_v24 = vcombine.low %v1367_v28, %v1371_v34  ;;  %v1389_v37 = vld [vmem:[#allocation6 + $0x6f0] sm:$0xff] }
 0x42f   :  { %v1397_v8 = vld [vmem:[#allocation6 + $0x730] sm:$0xff] }
 0x430   :  { %2789 = vmatpush1.bf16.msra.mxu1 %v6887_v3  ;;  %2953 = vmatpush1.bf16.msra.mxu0 %v6891_v6  ;;  %v6943_v3 = vcombine.low %v1359_v4, %v1363_v17  ;;  %v6947_v6 = vcombine.low %v1361_v21, %v1365_v23  ;;  %v1407_v4 = vld [vmem:[#allocation6 + $0x780] sm:$0xff]  ;;  %v1409_v21 = vld [vmem:[#allocation6 + $0x790] sm:$0xff] }
 0x431   :  { %2790 = vmatprep.subr.bf16.mxu1 %v6896_v7  ;;  %2954 = vmatprep.subr.bf16.mxu0 %v6900_v40  ;;  %v6952_v7 = vcombine.high %v1367_v28, %v1371_v34  ;;  %v6956_v40 = vcombine.high %v1369_v52, %v1373_v57  ;;  %v1411_v17 = vld [vmem:[#allocation6 + $0x7a0] sm:$0xff]  ;;  %v1413_v23 = vld [vmem:[#allocation6 + $0x7b0] sm:$0xff] }
 0x432   :  { %v6996_v28 = vcombine.high %v1409_v21, %v1413_v23  ;;  %v1415_v34 = vld [vmem:[#allocation6 + $0x7c0] sm:$0xff]  ;;  %v1417_v57 = vld [vmem:[#allocation6 + $0x7d0] sm:$0xff] }
 0x433   :  { %v1419_v52 = vld [vmem:[#allocation6 + $0x7e0] sm:$0xff] }
 0x434   :  { %2791 = vmatpush1.bf16.msra.mxu1 %v6895_v54  ;;  %2955 = vmatpush1.bf16.msra.mxu0 %v6899_v32  ;;  %v1381_v54 = vld [vmem:[#allocation6 + $0x6b0] sm:$0xff] }
 0x435   :  { %2792 = vmatprep.subr.bf16.mxu1 %v6904_v12  ;;  %2956 = vmatprep.subr.bf16.mxu0 %v6908_v36 }
 0x438   :  { %2793 = vmatpush1.bf16.msra.mxu1 %v6903_v63  ;;  %2957 = vmatpush1.bf16.msra.mxu0 %v6907_v45  ;;  %v6964_v63 = vcombine.high %v1377_v59, %v1381_v54  ;;  %v1383_v45 = vld [vmem:[#allocation6 + $0x6c0] sm:$0xff] }
 0x439   :  { %2794 = vmatprep.subr.bf16.mxu1 %v6912_v55  ;;  %2958 = vmatprep.subr.bf16.mxu0 %v6916_v42  ;;  %v1387_v42 = vld [vmem:[#allocation6 + $0x6e0] sm:$0xff] }
 0x43a   :  { %v6967_v22 = vcombine.low %v1383_v45, %v1387_v42 }
 0x43c   :  { %2795 = vmatpush1.bf16.msra.mxu1 %v6911_v2  ;;  %2959 = vmatpush1.bf16.msra.mxu0 %v6915_v16  ;;  %v6963_v2 = vcombine.low %v1377_v59, %v1381_v54  ;;  %v6968_v16 = vcombine.high %v1383_v45, %v1387_v42  ;;  %v6999_v59 = vcombine.low %v1415_v34, %v1419_v52  ;;  %v1192_v42 = vld [vmem:[#allocation6 + $0xc8] sm:$0xff] }
 0x43d   :  { %2796 = vmatprep.subr.bf16.mxu1 %v6920_v15  ;;  %2960 = vmatprep.subr.bf16.mxu0 %v6924_v50  ;;  %v6972_v15 = vcombine.high %v1385_v53, %v1389_v37  ;;  %v1391_v50 = vld [vmem:[#allocation6 + $0x700] sm:$0xff] }
 0x43e   :  { %v6975_v51 = vcombine.low %v1391_v50, %v1395_v58 }
 0x440   :  { %2797 = vmatpush1.bf16.msra.mxu1 %v6919_v27  ;;  %2961 = vmatpush1.bf16.msra.mxu0 %v6923_v41  ;;  %v6971_v27 = vcombine.low %v1385_v53, %v1389_v37  ;;  %v6976_v41 = vcombine.high %v1391_v50, %v1395_v58  ;;  %v1196_v53 = vld [vmem:[#allocation6 + $0xe8] sm:$0xff] }
 0x441   :  { %2798 = vmatprep.subr.bf16.mxu1 %v6928_v43  ;;  %2962 = vmatprep.subr.bf16.mxu0 %v6932_v60  ;;  %v6980_v43 = vcombine.high %v1393_v13, %v1397_v8  ;;  %v1399_v60 = vld [vmem:[#allocation6 + $0x740] sm:$0xff]  ;;  %v1208_v58 = vld [vmem:[#allocation6 + $0x148] sm:$0xff] }
 0x444   :  { %2799 = vmatpush1.bf16.msra.mxu1 %v6927_v61  ;;  %2963 = vmatpush1.bf16.msra.mxu0 %v6931_v1  ;;  %v6979_v61 = vcombine.low %v1393_v13, %v1397_v8  ;;  %v9458_v1 = vsub.s32 2, %v9708_v20  ;;  %v1212_v13 = vld [vmem:[#allocation6 + $0x168] sm:$0xff] }
 0x445   :  { %2800 = vmatprep.subr.bf16.mxu1 %v6936_v0  ;;  %2964 = vmatprep.subr.bf16.mxu0 %v6940_v10  ;;  %v6984_v0 = vcombine.high %v1399_v60, %v1403_v11  ;;  %v6988_v10 = vcombine.high %v1401_v14, %v1405_v44 }
 0x448   :  { %2801 = vmatpush1.bf16.msra.mxu1 %v6935_v62  ;;  %2965 = vmatpush1.bf16.msra.mxu0 %v6939_v39  ;;  %v6983_v62 = vcombine.low %v1399_v60, %v1403_v11  ;;  %v6987_v39 = vcombine.low %v1401_v14, %v1405_v44  ;;  %v1224_v11 = vld [vmem:[#allocation6 + $0x1c8] sm:$0xff] }
 0x449   :  { %2802 = vmatprep.subr.bf16.mxu1 %v6944_v48  ;;  %2966 = vmatprep.subr.bf16.mxu0 %v6948_v26  ;;  %v865_v48 = vrot.slane %v9429_v30, %v9458_v1  ;;  %v6992_v26 = vcombine.high %v1407_v4, %v1411_v17  ;;  %v1172_v30 = vld [vmem:[#allocation6 + $0x28] sm:$0xff] }
 0x44a   :  { %v9451_v46 = vpop.f32.mrb[4].mxu1  ;;  %v1228_v14 = vld [vmem:[#allocation6 + $0x1e8] sm:$0xff] }
 0x44b   :  { %v1154_v32 = vpop.f32.mrb[5].mxu1 }
 0x44c   :  { %v1155_v12 = vadd.f32 %v1154_v32, %v869_v9  ;;  %v1156_v36 = vpop.f32.mrb[6].mxu1  ;;  %2803 = vmatpush1.bf16.msra.mxu1 %v6943_v3  ;;  %2967 = vmatpush1.bf16.msra.mxu0 %v6947_v6  ;;  %v1421_v9 = vld [vmem:[#allocation6 + $0x7f0] sm:$0xff]  ;;  %v6991_v3 = vcombine.low %v1407_v4, %v1411_v17  ;;  %v6995_v6 = vcombine.low %v1409_v21, %v1413_v23  ;;  %v7873_v17 = vld [vmem:[#allocation9] ss:$28 sps:$4 sm:$0xff]  }
 0x44d   :  { %v1157_v33 = vpop.f32.mrb[7].mxu1  ;;  %2804 = vmatprep.subr.bf16.mxu1 %v6952_v7  ;;  %2968 = vmatprep.subr.bf16.mxu0 %v6956_v40  ;;  %v1153_v7 = vadd.f32 %v9451_v46, %v865_v48  ;;  %v7000_v40 = vcombine.high %v1415_v34, %v1419_v52  ;;  %v7004_v19 = vcombine.high %v1417_v57, %v1421_v9  ;;  %v1176_v36 = vld [vmem:[#allocation6 + $0x48] sm:$0xff] }
 0x44e   :  { %v1162_v55 = vmax.f32 %v1155_v12, 0.0  ;;  %v7003_v54 = vcombine.low %v1417_v57, %v1421_v9  ;;  %v6754_v12 = vcombine.high %v1168_v56, %v1172_v30  ;;  %v7875_v21 = vld [vmem:[#allocation9 + $0x4] ss:$28 sps:$4 sm:$0xff]  }
 0x44f   :  { %v1161_v32 = vmax.f32 %v1153_v7, 0.0  ;;  %v1240_v23 = vld [vmem:[#allocation6 + $0x248] sm:$0xff] }
 0x450   :  { %v9453_v47 = vpack.c.bf16 %v1162_v55, %v1162_v55  ;;  %2805 = vmatpush1.bf16.msra.mxu1 %v6951_v24  ;;  %2969 = vmatpush1.bf16.msra.mxu0 %v6955_v38  ;;  %v1180_v24 = vld [vmem:[#allocation6 + $0x68] sm:$0xff]  ;;  %v6753_v38 = vcombine.low %v1168_v56, %v1172_v30 }
 0x451   :  { %2806 = vmatprep.subr.bf16.mxu1 %v6960_v29  ;;  %2970 = vmatprep.subr.bf16.mxu0 %v6964_v63  ;;  %v9463_v46 = vpack.c.bf16 %v1161_v32, %v1161_v32  ;;  %v6762_v33 = vcombine.high %v1176_v36, %v1180_v24  ;;  %v1184_v29 = vld [vmem:[#allocation6 + $0x88] sm:$0xff]  ;;  %v6761_v45 = vcombine.low %v1176_v36, %v1180_v24 }
 0x452   :  { %2818 = vmatprep.mubr.bf16.mxu1 %v9453_v47  ;;  %2982 = vmatprep.mubr.bf16.mxu0 %v9453_v47  ;;  %v1188_v63 = vld [vmem:[#allocation6 + $0xa8] sm:$0xff] }
 0x453   :  { %v6770_v55 = vcombine.high %v1184_v29, %v1188_v63  ;;  %v6769_v37 = vcombine.low %v1184_v29, %v1188_v63  ;;  %v1248_v34 = vld [vmem:[#allocation6 + $0x288] sm:$0xff] }
 0x454   :  { %2807 = vmatpush1.bf16.msra.mxu1 %v6959_v31  ;;  %2971 = vmatpush1.bf16.msra.mxu0 %v6963_v2  ;;  %v6778_v31 = vcombine.high %v1192_v42, %v1196_v53  ;;  %v1200_v2 = vld [vmem:[#allocation6 + $0x108] sm:$0xff] }
 0x455   :  { %2808 = vmatprep.subr.bf16.mxu1 %v6968_v16  ;;  %2972 = vmatprep.subr.bf16.mxu0 %v6972_v15  ;;  %v1204_v16 = vld [vmem:[#allocation6 + $0x128] sm:$0xff]  ;;  %v6777_v15 = vcombine.low %v1192_v42, %v1196_v53  ;;  %v7890_v42 = vld [vmem:[#allocation9 + $0x11c] ss:$28 sps:$4 sm:$0xff]  }
 0x456   :  { %v6786_v50 = vcombine.high %v1200_v2, %v1204_v16  ;;  %v6785_v8 = vcombine.low %v1200_v2, %v1204_v16  ;;  %v1252_v52 = vld [vmem:[#allocation6 + $0x2a8] sm:$0xff]  ;;  %v7891_v16 = vld [vmem:[#allocation9 + $0x150] ss:$28 sps:$4 sm:$0xff]  }
 0x457   :  { %v6834_v9 = vcombine.high %v1248_v34, %v1252_v52  ;;  %v1256_v7 = vld [vmem:[#allocation6 + $0x2c8] sm:$0xff] }
 0x458   :  { %2809 = vmatpush1.bf16.msra.mxu1 %v6967_v22  ;;  %2973 = vmatpush1.bf16.msra.mxu0 %v6971_v27  ;;  %v6794_v22 = vcombine.high %v1208_v58, %v1212_v13  ;;  %v1216_v27 = vld [vmem:[#allocation6 + $0x188] sm:$0xff] }
 0x459   :  { %2810 = vmatprep.subr.bf16.mxu1 %v6976_v41  ;;  %2974 = vmatprep.subr.bf16.mxu0 %v6980_v43  ;;  %v1220_v41 = vld [vmem:[#allocation6 + $0x1a8] sm:$0xff]  ;;  %v6793_v43 = vcombine.low %v1208_v58, %v1212_v13 }
 0x45a   :  { %v6802_v60 = vcombine.high %v1216_v27, %v1220_v41  ;;  %v6801_v44 = vcombine.low %v1216_v27, %v1220_v41  ;;  %v7882_v30 = vld [vmem:[#allocation9 + $0xa8] ss:$28 sps:$4 sm:$0xff]   ;;  %v7885_v24 = vld [vmem:[#allocation9 + $0xe0] ss:$28 sps:$4 sm:$0xff]  }
 0x45b   :  { %v1268_v32 = vld [vmem:[#allocation6 + $0x328] sm:$0xff]  ;;  %v7896_v27 = vld [vmem:[#allocation9 + $0x18c] ss:$28 sps:$4 sm:$0xff]  }
 0x45c   :  { %2811 = vmatpush1.bf16.msra.mxu1 %v6975_v51  ;;  %2975 = vmatpush1.bf16.msra.mxu0 %v6979_v61  ;;  %v6810_v51 = vcombine.high %v1224_v11, %v1228_v14  ;;  %v1232_v61 = vld [vmem:[#allocation6 + $0x208] sm:$0xff] }
 0x45d   :  { %2812 = vmatprep.subr.bf16.mxu1 %v6984_v0  ;;  %2976 = vmatprep.subr.bf16.mxu0 %v6988_v10  ;;  %v1236_v0 = vld [vmem:[#allocation6 + $0x228] sm:$0xff]  ;;  %v6809_v10 = vcombine.low %v1224_v11, %v1228_v14 }
 0x45e   :  { %v6818_v4 = vcombine.high %v1232_v61, %v1236_v0  ;;  %v1276_v29 = vld [vmem:[#allocation6 + $0x368] sm:$0xff] }
 0x45f   :  { %v1280_v53 = vld [vmem:[#allocation6 + $0x388] sm:$0xff] }
 0x460   :  { %2813 = vmatpush1.bf16.msra.mxu1 %v6983_v62  ;;  %2977 = vmatpush1.bf16.msra.mxu0 %v6987_v39  ;;  %v1244_v62 = vld [vmem:[#allocation6 + $0x268] sm:$0xff]  ;;  %v6817_v39 = vcombine.low %v1232_v61, %v1236_v0 }
 0x461   :  { %2814 = vmatprep.subr.bf16.mxu1 %v6992_v26  ;;  %2978 = vmatprep.subr.bf16.mxu0 %v6996_v28  ;;  %v6826_v48 = vcombine.high %v1240_v23, %v1244_v62  ;;  %v7876_v26 = vld [vmem:[#allocation9 + $0x38] ss:$28 sps:$4 sm:$0xff]   ;;  %v6825_v57 = vcombine.low %v1240_v23, %v1244_v62  ;;  %v1292_v58 = vld [vmem:[#allocation6 + $0x3e8] sm:$0xff] }
 0x462   :  { %v7878_v28 = vld [vmem:[#allocation9 + $0x3c] ss:$28 sps:$4 sm:$0xff]   ;;  %v1296_v41 = vld [vmem:[#allocation6 + $0x408] sm:$0xff] }
 0x463   :  { %v7897_v14 = vld [vmem:[#allocation9 + $0x1c0] ss:$28 sps:$4 sm:$0xff]   ;;  %v7900_v23 = vld [vmem:[#allocation9 + $0x1f8] ss:$28 sps:$4 sm:$0xff]  }
 0x464   :  { %2815 = vmatpush1.bf16.msra.mxu1 %v6991_v3  ;;  %2979 = vmatpush1.bf16.msra.mxu0 %v6995_v6  ;;  %v7879_v3 = vld [vmem:[#allocation9 + $0x70] ss:$28 sps:$4 sm:$0xff]   ;;  %v1308_v61 = vld [vmem:[#allocation6 + $0x468] sm:$0xff] }
 0x465   :  { %2816 = vmatprep.subr.bf16.mxu1 %v7000_v40  ;;  %2980 = vmatprep.subr.bf16.mxu0 %v7004_v19  ;;  %v7881_v6 = vld [vmem:[#allocation9 + $0x74] ss:$28 sps:$4 sm:$0xff]   ;;  %v1260_v40 = vld [vmem:[#allocation6 + $0x2e8] sm:$0xff]  ;;  %v6833_v19 = vcombine.low %v1248_v34, %v1252_v52 }
 0x466   :  { %v6842_v56 = vcombine.high %v1256_v7, %v1260_v40  ;;  %v1324_v34 = vld [vmem:[#allocation6 + $0x4e8] sm:$0xff] }
 0x468   :  { %2817 = vmatpush1.bf16.msra.mxu1 %v6999_v59  ;;  %2981 = vmatpush1.bf16.msra.mxu0 %v7003_v54  ;;  %v7884_v59 = vld [vmem:[#allocation9 + $0xac] ss:$28 sps:$4 sm:$0xff]   ;;  %v1264_v54 = vld [vmem:[#allocation6 + $0x308] sm:$0xff] }
 0x469   :  { %2827 = vmatprep.subr.bf16.mxu1 %v6754_v12  ;;  %5942 = vmatprep.subr.bf16.mxu0 %v7875_v21  ;;  %v6841_v12 = vcombine.low %v1256_v7, %v1260_v40  ;;  %v6850_v36 = vcombine.high %v1264_v54, %v1268_v32  ;;  %v6849_v63 = vcombine.low %v1264_v54, %v1268_v32  ;;  %v1316_v21 = vld [vmem:[#allocation6 + $0x4a8] sm:$0xff] }
 0x46a   :  { %v1332_v7 = vld [vmem:[#allocation6 + $0x528] sm:$0xff] }
 0x46b   :  { %2819 = vmatmul.mubr.bf16.vlgmr.msra.gmra.mrb[8].mxu1 %v9463_v46  ;;  %2983 = vmatmul.mubr.bf16.vlgmr.msra.gmra.mrb[4].mxu0 %v9463_v46  ;;  %v1340_v54 = vld [vmem:[#allocation6 + $0x568] sm:$0xff] }
 0x46c   :  { %2828 = vmatpush1.bf16.msra.mxu1 %v6753_v38  ;;  %2859 = vmatprep.mubr.bf16.mxu1 %v9438_v18  ;;  %v7887_v38 = vld [vmem:[#allocation9 + $0xe4] ss:$28 sps:$4 sm:$0xff]  }
 0x46d   :  { %2829 = vmatprep.subr.bf16.mxu1 %v6762_v33  ;;  %5943 = vmatpush1.bf16.msra.mxu0 %v7873_v17  ;;  %v1272_v33 = vld [vmem:[#allocation6 + $0x348] sm:$0xff] }
 0x46e   :  { %5944 = vmatprep.subr.bf16.mxu0 %v7878_v28  ;;  %v1312_v17 = vld [vmem:[#allocation6 + $0x488] sm:$0xff] }
 0x46f   :  { %v1320_v28 = vld [vmem:[#allocation6 + $0x4c8] sm:$0xff]  ;;  %v6897_v52 = vcombine.low %v1312_v17, %v1316_v21 }
 0x470   :  { %2830 = vmatpush1.bf16.msra.mxu1 %v6761_v45  ;;  %v6858_v45 = vcombine.high %v1272_v33, %v1276_v29  ;;  %v6905_v40 = vcombine.low %v1320_v28, %v1324_v34 }
 0x471   :  { %2831 = vmatprep.subr.bf16.mxu1 %v6770_v55  ;;  %5945 = vmatpush1.bf16.msra.mxu0 %v7876_v26  ;;  %v7888_v55 = vld [vmem:[#allocation9 + $0x118] ss:$28 sps:$4 sm:$0xff]  }
 0x472   :  { %5946 = vmatprep.subr.bf16.mxu0 %v7881_v6  ;;  %v7905_v26 = vld [vmem:[#allocation9 + $0x234] ss:$28 sps:$4 sm:$0xff]   ;;  %v1328_v6 = vld [vmem:[#allocation6 + $0x508] sm:$0xff] }
 0x473   :  { %v6913_v32 = vcombine.low %v1328_v6, %v1332_v7 }
 0x474   :  { %2832 = vmatpush1.bf16.msra.mxu1 %v6769_v37  ;;  %v1284_v37 = vld [vmem:[#allocation6 + $0x3a8] sm:$0xff] }
 0x475   :  { %2833 = vmatprep.subr.bf16.mxu1 %v6778_v31  ;;  %5947 = vmatpush1.bf16.msra.mxu0 %v7879_v3  ;;  %v6857_v31 = vcombine.low %v1272_v33, %v1276_v29  ;;  %v6866_v2 = vcombine.high %v1280_v53, %v1284_v37  ;;  %v6865_v13 = vcombine.low %v1280_v53, %v1284_v37  ;;  %v7908_v3 = vld [vmem:[#allocation9 + $0x26c] ss:$28 sps:$4 sm:$0xff]   ;;  %v1348_v33 = vld [vmem:[#allocation6 + $0x5a8] sm:$0xff] }
 0x476   :  { %5948 = vmatprep.subr.bf16.mxu0 %v7884_v59  ;;  %v1336_v59 = vld [vmem:[#allocation6 + $0x548] sm:$0xff]  ;;  %v7915_v53 = vld [vmem:[#allocation9 + $0x310] ss:$28 sps:$4 sm:$0xff]  }
 0x477   :  { %v6921_v29 = vcombine.low %v1336_v59, %v1340_v54 }
 0x478   :  { %2834 = vmatpush1.bf16.msra.mxu1 %v6777_v15  ;;  %v7893_v15 = vld [vmem:[#allocation9 + $0x154] ss:$28 sps:$4 sm:$0xff]  }
 0x479   :  { %2835 = vmatprep.subr.bf16.mxu1 %v6786_v50  ;;  %5949 = vmatpush1.bf16.msra.mxu0 %v7882_v30  ;;  %v1288_v50 = vld [vmem:[#allocation6 + $0x3c8] sm:$0xff] }
 0x47a   :  { %5950 = vmatprep.subr.bf16.mxu0 %v7887_v38  ;;  %v7911_v30 = vld [vmem:[#allocation9 + $0x2a4] ss:$28 sps:$4 sm:$0xff]  }
 0x47b   :  { %v1344_v38 = vld [vmem:[#allocation6 + $0x588] sm:$0xff] }
 0x47c   :  { %2836 = vmatpush1.bf16.msra.mxu1 %v6785_v8  ;;  %v6874_v8 = vcombine.high %v1288_v50, %v1292_v58  ;;  %v6929_v37 = vcombine.low %v1344_v38, %v1348_v33 }
 0x47d   :  { %2837 = vmatprep.subr.bf16.mxu1 %v6794_v22  ;;  %5951 = vmatpush1.bf16.msra.mxu0 %v7885_v24  ;;  %v7894_v22 = vld [vmem:[#allocation9 + $0x188] ss:$28 sps:$4 sm:$0xff]   ;;  %v7914_v24 = vld [vmem:[#allocation9 + $0x2dc] ss:$28 sps:$4 sm:$0xff]  }
 0x47e   :  { %5952 = vmatprep.subr.bf16.mxu0 %v7890_v42  ;;  %v1356_v42 = vld [vmem:[#allocation6 + $0x5e8] sm:$0xff] }
 0x480   :  { %2838 = vmatpush1.bf16.msra.mxu1 %v6793_v43  ;;  %v1300_v43 = vld [vmem:[#allocation6 + $0x428] sm:$0xff] }
 0x481   :  { %2839 = vmatprep.subr.bf16.mxu1 %v6802_v60  ;;  %5953 = vmatpush1.bf16.msra.mxu0 %v7888_v55  ;;  %v6873_v60 = vcombine.low %v1288_v50, %v1292_v58  ;;  %v6882_v11 = vcombine.high %v1296_v41, %v1300_v43  ;;  %v6881_v0 = vcombine.low %v1296_v41, %v1300_v43  ;;  %v1352_v55 = vld [vmem:[#allocation6 + $0x5c8] sm:$0xff] }
 0x482   :  { %5954 = vmatprep.subr.bf16.mxu0 %v7893_v15  ;;  %v1364_v15 = vld [vmem:[#allocation6 + $0x628] sm:$0xff]  ;;  %v6937_v58 = vcombine.low %v1352_v55, %v1356_v42 }
 0x483   :  { %v7918_v50 = vld [vmem:[#allocation9 + $0x348] ss:$28 sps:$4 sm:$0xff]  }
 0x484   :  { %2840 = vmatpush1.bf16.msra.mxu1 %v6801_v44  ;;  %v7899_v44 = vld [vmem:[#allocation9 + $0x1c4] ss:$28 sps:$4 sm:$0xff]  }
 0x485   :  { %2841 = vmatprep.subr.bf16.mxu1 %v6810_v51  ;;  %5955 = vmatpush1.bf16.msra.mxu0 %v7891_v16  ;;  %v1304_v51 = vld [vmem:[#allocation6 + $0x448] sm:$0xff] }
 0x486   :  { %5956 = vmatprep.subr.bf16.mxu0 %v7896_v27  ;;  %v6889_v62 = vcombine.low %v1304_v51, %v1308_v61  ;;  %v1360_v16 = vld [vmem:[#allocation6 + $0x608] sm:$0xff] }
 0x487   :  { %v6945_v27 = vcombine.low %v1360_v16, %v1364_v15  ;;  %v1376_v43 = vld [vmem:[#allocation6 + $0x688] sm:$0xff] }
 0x488   :  { %2842 = vmatpush1.bf16.msra.mxu1 %v6809_v10  ;;  %v6890_v10 = vcombine.high %v1304_v51, %v1308_v61  ;;  %v1388_v51 = vld [vmem:[#allocation6 + $0x6e8] sm:$0xff] }
 0x489   :  { %2843 = vmatprep.subr.bf16.mxu1 %v6818_v4  ;;  %5957 = vmatpush1.bf16.msra.mxu0 %v7894_v22  ;;  %v7902_v4 = vld [vmem:[#allocation9 + $0x1fc] ss:$28 sps:$4 sm:$0xff]   ;;  %v1372_v22 = vld [vmem:[#allocation6 + $0x668] sm:$0xff] }
 0x48a   :  { %5958 = vmatprep.subr.bf16.mxu0 %v7899_v44  ;;  %v1384_v44 = vld [vmem:[#allocation6 + $0x6c8] sm:$0xff] }
 0x48c   :  { %2844 = vmatpush1.bf16.msra.mxu1 %v6817_v39  ;;  %v6898_v39 = vcombine.high %v1312_v17, %v1316_v21  ;;  %v6969_v17 = vcombine.low %v1384_v44, %v1388_v51 }
 0x48d   :  { %2845 = vmatprep.subr.bf16.mxu1 %v6826_v48  ;;  %5959 = vmatpush1.bf16.msra.mxu0 %v7897_v14  ;;  %v7903_v48 = vld [vmem:[#allocation9 + $0x230] ss:$28 sps:$4 sm:$0xff]  }
 0x48e   :  { %5960 = vmatprep.subr.bf16.mxu0 %v7902_v4  ;;  %v1396_v4 = vld [vmem:[#allocation6 + $0x728] sm:$0xff] }
 0x490   :  { %2846 = vmatpush1.bf16.msra.mxu1 %v6825_v57  ;;  %v6906_v57 = vcombine.high %v1320_v28, %v1324_v34  ;;  %v1412_v28 = vld [vmem:[#allocation6 + $0x7a8] sm:$0xff] }
 0x491   :  { %2847 = vmatprep.subr.bf16.mxu1 %v6834_v9  ;;  %5961 = vmatpush1.bf16.msra.mxu0 %v7900_v23  ;;  %v7906_v9 = vld [vmem:[#allocation9 + $0x268] ss:$28 sps:$4 sm:$0xff]  }
 0x492   :  { %5962 = vmatprep.subr.bf16.mxu0 %v7905_v26  ;;  %v1400_v23 = vld [vmem:[#allocation6 + $0x748] sm:$0xff] }
 0x493   :  { %v1408_v26 = vld [vmem:[#allocation6 + $0x788] sm:$0xff] }
 0x494   :  { %2848 = vmatpush1.bf16.msra.mxu1 %v6833_v19  ;;  %v6914_v19 = vcombine.high %v1328_v6, %v1332_v7  ;;  %v1170_v7 = vld [vmem:[#allocation6 + $0x18] sm:$0xff] }
 0x495   :  { %2849 = vmatprep.subr.bf16.mxu1 %v6842_v56  ;;  %5963 = vmatpush1.bf16.msra.mxu0 %v7903_v48  ;;  %v7909_v56 = vld [vmem:[#allocation9 + $0x2a0] ss:$28 sps:$4 sm:$0xff]  }
 0x496   :  { %5964 = vmatprep.subr.bf16.mxu0 %v7908_v3  ;;  %v6993_v3 = vcombine.low %v1408_v26, %v1412_v28 }
 0x498   :  { %2850 = vmatpush1.bf16.msra.mxu1 %v6841_v12  ;;  %v6922_v12 = vcombine.high %v1336_v59, %v1340_v54  ;;  %v1182_v59 = vld [vmem:[#allocation6 + $0x78] sm:$0xff] }
 0x499   :  { %2851 = vmatprep.subr.bf16.mxu1 %v6850_v36  ;;  %5965 = vmatpush1.bf16.msra.mxu0 %v7906_v9  ;;  %v7912_v36 = vld [vmem:[#allocation9 + $0x2d8] ss:$28 sps:$4 sm:$0xff]   ;;  %v1420_v9 = vld [vmem:[#allocation6 + $0x7e8] sm:$0xff] }
 0x49a   :  { %5966 = vmatprep.subr.bf16.mxu0 %v7911_v30  ;;  %v1178_v30 = vld [vmem:[#allocation6 + $0x58] sm:$0xff] }
 0x49c   :  { %2852 = vmatpush1.bf16.msra.mxu1 %v6849_v63  ;;  %v6930_v63 = vcombine.high %v1344_v38, %v1348_v33  ;;  %v1194_v33 = vld [vmem:[#allocation6 + $0xd8] sm:$0xff] }
 0x49d   :  { %2853 = vmatprep.subr.bf16.mxu1 %v6858_v45  ;;  %5967 = vmatpush1.bf16.msra.mxu0 %v7909_v56  ;;  %v7917_v45 = vld [vmem:[#allocation9 + $0x314] ss:$28 sps:$4 sm:$0xff]  }
 0x49e   :  { %5968 = vmatprep.subr.bf16.mxu0 %v7914_v24  ;;  %v6765_v24 = vcombine.low %v1178_v30, %v1182_v59 }
 0x4a0   :  { %2854 = vmatpush1.bf16.msra.mxu1 %v6857_v31  ;;  %v6938_v31 = vcombine.high %v1352_v55, %v1356_v42  ;;  %v1202_v55 = vld [vmem:[#allocation6 + $0x118] sm:$0xff] }
 0x4a1   :  { %2855 = vmatprep.subr.bf16.mxu1 %v6866_v2  ;;  %5969 = vmatpush1.bf16.msra.mxu0 %v7912_v36  ;;  %v7920_v2 = vld [vmem:[#allocation9 + $0x34c] ss:$28 sps:$4 sm:$0xff]   ;;  %v1190_v36 = vld [vmem:[#allocation6 + $0xb8] sm:$0xff] }
 0x4a2   :  { %5970 = vmatprep.subr.bf16.mxu0 %v7917_v45  ;;  %v1206_v42 = vld [vmem:[#allocation6 + $0x138] sm:$0xff] }
 0x4a4   :  { %2856 = vmatpush1.bf16.msra.mxu1 %v6865_v13  ;;  %v6946_v13 = vcombine.high %v1360_v16, %v1364_v15  ;;  %v6789_v16 = vcombine.low %v1202_v55, %v1206_v42  ;;  %v1218_v15 = vld [vmem:[#allocation6 + $0x198] sm:$0xff] }
 0x4a5   :  { %2857 = vmatprep.subr.bf16.mxu1 %v6874_v8  ;;  %5971 = vmatpush1.bf16.msra.mxu0 %v7915_v53  ;;  %v1368_v8 = vld [vmem:[#allocation6 + $0x648] sm:$0xff] }
 0x4a6   :  { %5972 = vmatprep.subr.bf16.mxu0 %v7920_v2  ;;  %v6954_v41 = vcombine.high %v1368_v8, %v1372_v22  ;;  %v1214_v2 = vld [vmem:[#allocation6 + $0x178] sm:$0xff] }
 0x4a8   :  { %2858 = vmatpush1.bf16.msra.mxu1 %v6873_v60  ;;  %v1380_v60 = vld [vmem:[#allocation6 + $0x6a8] sm:$0xff] }
 0x4a9   :  { %2868 = vmatprep.subr.bf16.mxu1 %v6882_v11  ;;  %5973 = vmatpush1.bf16.msra.mxu0 %v7918_v50  ;;  %v6953_v11 = vcombine.low %v1368_v8, %v1372_v22  ;;  %v6962_v14 = vcombine.high %v1376_v43, %v1380_v60  ;;  %v6961_v61 = vcombine.low %v1376_v43, %v1380_v60  ;;  %v1222_v50 = vld [vmem:[#allocation6 + $0x1b8] sm:$0xff] }
 0x4aa   :  { %v1226_v8 = vld [vmem:[#allocation6 + $0x1d8] sm:$0xff] }
 0x4ab   :  { %2860 = vmatmul.mubr.bf16.vlgmr.msra.gmra.mrb[12].mxu1 %v9440_v5  ;;  %v1230_v22 = vld [vmem:[#allocation6 + $0x1f8] sm:$0xff] }
 0x4ac   :  { %2869 = vmatpush1.bf16.msra.mxu1 %v6881_v0  ;;  %2900 = vmatprep.mubr.bf16.mxu1 %v9453_v47  ;;  %v6970_v0 = vcombine.high %v1384_v44, %v1388_v51  ;;  %v1234_v43 = vld [vmem:[#allocation6 + $0x218] sm:$0xff] }
 0x4ad   :  { %2870 = vmatprep.subr.bf16.mxu1 %v6890_v10  ;;  %v1392_v10 = vld [vmem:[#allocation6 + $0x708] sm:$0xff]  ;;  %v1238_v60 = vld [vmem:[#allocation6 + $0x238] sm:$0xff] }
 0x4ae   :  { %v6978_v21 = vcombine.high %v1392_v10, %v1396_v4  ;;  %v6822_v44 = vcombine.high %v1234_v43, %v1238_v60  ;;  %v1242_v51 = vld [vmem:[#allocation6 + $0x258] sm:$0xff] }
 0x4b0   :  { %2871 = vmatpush1.bf16.msra.mxu1 %v6889_v62  ;;  %v1404_v62 = vld [vmem:[#allocation6 + $0x768] sm:$0xff] }
 0x4b1   :  { %2872 = vmatprep.subr.bf16.mxu1 %v6898_v39  ;;  %v6977_v39 = vcombine.low %v1392_v10, %v1396_v4  ;;  %v6986_v48 = vcombine.high %v1400_v23, %v1404_v62  ;;  %v6985_v34 = vcombine.low %v1400_v23, %v1404_v62  ;;  %v1250_v4 = vld [vmem:[#allocation6 + $0x298] sm:$0xff] }
 0x4b2   :  { %v1258_v62 = vld [vmem:[#allocation6 + $0x2d8] sm:$0xff] }
 0x4b4   :  { %2873 = vmatpush1.bf16.msra.mxu1 %v6897_v52  ;;  %v6994_v52 = vcombine.high %v1408_v26, %v1412_v28  ;;  %v1266_v28 = vld [vmem:[#allocation6 + $0x318] sm:$0xff] }
 0x4b5   :  { %2874 = vmatprep.subr.bf16.mxu1 %v6906_v57  ;;  %v1416_v57 = vld [vmem:[#allocation6 + $0x7c8] sm:$0xff] }
 0x4b6   :  { %v7002_v6 = vcombine.high %v1416_v57, %v1420_v9 }
 0x4b8   :  { %2875 = vmatpush1.bf16.msra.mxu1 %v6905_v40  ;;  %v1174_v40 = vld [vmem:[#allocation6 + $0x38] sm:$0xff] }
 0x4b9   :  { %2876 = vmatprep.subr.bf16.mxu1 %v6914_v19  ;;  %v7001_v19 = vcombine.low %v1416_v57, %v1420_v9  ;;  %v6758_v56 = vcombine.high %v1170_v7, %v1174_v40  ;;  %v6757_v54 = vcombine.low %v1170_v7, %v1174_v40  ;;  %v1274_v9 = vld [vmem:[#allocation6 + $0x358] sm:$0xff] }
 0x4ba   :  { %v1282_v40 = vld [vmem:[#allocation6 + $0x398] sm:$0xff] }
 0x4bc   :  { %2877 = vmatpush1.bf16.msra.mxu1 %v6913_v32  ;;  %v6766_v32 = vcombine.high %v1178_v30, %v1182_v59  ;;  %v1290_v59 = vld [vmem:[#allocation6 + $0x3d8] sm:$0xff] }
 0x4bd   :  { %2878 = vmatprep.subr.bf16.mxu1 %v6922_v12  ;;  %v1186_v12 = vld [vmem:[#allocation6 + $0x98] sm:$0xff] }
 0x4be   :  { %v6774_v38 = vcombine.high %v1186_v12, %v1190_v36 }
 0x4c0   :  { %2879 = vmatpush1.bf16.msra.mxu1 %v6921_v29  ;;  %v1198_v29 = vld [vmem:[#allocation6 + $0xf8] sm:$0xff] }
 0x4c1   :  { %2880 = vmatprep.subr.bf16.mxu1 %v6930_v63  ;;  %v6773_v63 = vcombine.low %v1186_v12, %v1190_v36  ;;  %v6782_v45 = vcombine.high %v1194_v33, %v1198_v29  ;;  %v6781_v53 = vcombine.low %v1194_v33, %v1198_v29  ;;  %v1298_v36 = vld [vmem:[#allocation6 + $0x418] sm:$0xff] }
 0x4c2   :  { %v1306_v29 = vld [vmem:[#allocation6 + $0x458] sm:$0xff] }
 0x4c4   :  { %2881 = vmatpush1.bf16.msra.mxu1 %v6929_v37  ;;  %v6790_v37 = vcombine.high %v1202_v55, %v1206_v42  ;;  %v1314_v42 = vld [vmem:[#allocation6 + $0x498] sm:$0xff] }
 0x4c5   :  { %2882 = vmatprep.subr.bf16.mxu1 %v6938_v31  ;;  %v1210_v31 = vld [vmem:[#allocation6 + $0x158] sm:$0xff] }
 0x4c8   :  { %2883 = vmatpush1.bf16.msra.mxu1 %v6937_v58  ;;  %v6797_v58 = vcombine.low %v1210_v31, %v1214_v2 }
 0x4c9   :  { %2884 = vmatprep.subr.bf16.mxu1 %v6946_v13  ;;  %v6806_v13 = vcombine.high %v1218_v15, %v1222_v50 }
 0x4cc   :  { %2885 = vmatpush1.bf16.msra.mxu1 %v6945_v27  ;;  %v6805_v27 = vcombine.low %v1218_v15, %v1222_v50  ;;  %v1330_v50 = vld [vmem:[#allocation6 + $0x518] sm:$0xff] }
 0x4cd   :  { %2886 = vmatprep.subr.bf16.mxu1 %v6954_v41  ;;  %v6814_v41 = vcombine.high %v1226_v8, %v1230_v22 }
 0x4d0   :  { %2887 = vmatpush1.bf16.msra.mxu1 %v6953_v11  ;;  %v6813_v11 = vcombine.low %v1226_v8, %v1230_v22  ;;  %v1338_v22 = vld [vmem:[#allocation6 + $0x558] sm:$0xff] }
 0x4d1   :  { %2888 = vmatprep.subr.bf16.mxu1 %v6962_v14  ;;  %v7944_v14 = vld [vmem:[#allocation9 + $0x384] ss:$28 sps:$4 sm:$0xff]  }
 0x4d2   :  { %5983 = vmatprep.subr.bf16.mxu0 %v7944_v14 }
 0x4d4   :  { %2889 = vmatpush1.bf16.msra.mxu1 %v6961_v61  ;;  %v1246_v61 = vld [vmem:[#allocation6 + $0x278] sm:$0xff] }
 0x4d5   :  { %2890 = vmatprep.subr.bf16.mxu1 %v6970_v0  ;;  %v6821_v0 = vcombine.low %v1234_v43, %v1238_v60  ;;  %v6830_v10 = vcombine.high %v1242_v51, %v1246_v61  ;;  %v1346_v43 = vld [vmem:[#allocation6 + $0x598] sm:$0xff] }
 0x4d6   :  { %v1350_v60 = vld [vmem:[#allocation6 + $0x5b8] sm:$0xff] }
 0x4d8   :  { %2891 = vmatpush1.bf16.msra.mxu1 %v6969_v17  ;;  %v1254_v17 = vld [vmem:[#allocation6 + $0x2b8] sm:$0xff] }
 0x4d9   :  { %2892 = vmatprep.subr.bf16.mxu1 %v6978_v21  ;;  %v6829_v21 = vcombine.low %v1242_v51, %v1246_v61  ;;  %v6838_v23 = vcombine.high %v1250_v4, %v1254_v17  ;;  %v6934_v51 = vcombine.high %v1346_v43, %v1350_v60 }
 0x4dc   :  { %2893 = vmatpush1.bf16.msra.mxu1 %v6977_v39  ;;  %v1262_v39 = vld [vmem:[#allocation6 + $0x2f8] sm:$0xff] }
 0x4dd   :  { %2894 = vmatprep.subr.bf16.mxu1 %v6986_v48  ;;  %v6837_v48 = vcombine.low %v1250_v4, %v1254_v17  ;;  %v6846_v26 = vcombine.high %v1258_v62, %v1262_v39  ;;  %v1358_v4 = vld [vmem:[#allocation6 + $0x5f8] sm:$0xff] }
 0x4e0   :  { %2895 = vmatpush1.bf16.msra.mxu1 %v6985_v34  ;;  %v1270_v34 = vld [vmem:[#allocation6 + $0x338] sm:$0xff] }
 0x4e1   :  { %2896 = vmatprep.subr.bf16.mxu1 %v6994_v52  ;;  %v6845_v52 = vcombine.low %v1258_v62, %v1262_v39  ;;  %v6854_v57 = vcombine.high %v1266_v28, %v1270_v34 }
 0x4e4   :  { %2897 = vmatpush1.bf16.msra.mxu1 %v6993_v3  ;;  %v1278_v3 = vld [vmem:[#allocation6 + $0x378] sm:$0xff] }
 0x4e5   :  { %2898 = vmatprep.subr.bf16.mxu1 %v7002_v6  ;;  %v6853_v6 = vcombine.low %v1266_v28, %v1270_v34  ;;  %v6862_v7 = vcombine.high %v1274_v9, %v1278_v3 }
 0x4e8   :  { %2899 = vmatpush1.bf16.msra.mxu1 %v7001_v19  ;;  %v1286_v19 = vld [vmem:[#allocation6 + $0x3b8] sm:$0xff] }
 0x4e9   :  { %2991 = vmatprep.subr.bf16.mxu1 %v6758_v56  ;;  %v6861_v56 = vcombine.low %v1274_v9, %v1278_v3  ;;  %v6870_v30 = vcombine.high %v1282_v40, %v1286_v19  ;;  %v1362_v3 = vld [vmem:[#allocation6 + $0x618] sm:$0xff] }
 0x4eb   :  { %2901 = vmatmul.mubr.bf16.vlgmr.msra.gmra.mrb[12].mxu1 %v9463_v46 }
 0x4ec   :  { %2992 = vmatpush1.bf16.msra.mxu1 %v6757_v54  ;;  %3023 = vmatprep.mubr.bf16.mxu1 %v9438_v18  ;;  %v6798_v18 = vcombine.high %v1210_v31, %v1214_v2  ;;  %v1294_v54 = vld [vmem:[#allocation6 + $0x3f8] sm:$0xff] }
 0x4ed   :  { %2993 = vmatprep.subr.bf16.mxu1 %v6766_v32  ;;  %v6869_v32 = vcombine.low %v1282_v40, %v1286_v19  ;;  %v6878_v12 = vcombine.high %v1290_v59, %v1294_v54  ;;  %v1322_v2 = vld [vmem:[#allocation6 + $0x4d8] sm:$0xff]  ;;  %v7942_v19 = vld [vmem:[#allocation9 + $0x380] ss:$28 sps:$4 sm:$0xff]  }
 0x4f0   :  { %2994 = vmatpush1.bf16.msra.mxu1 %v6765_v24  ;;  %v1302_v24 = vld [vmem:[#allocation6 + $0x438] sm:$0xff] }
 0x4f1   :  { %2995 = vmatprep.subr.bf16.mxu1 %v6774_v38  ;;  %v6877_v38 = vcombine.low %v1290_v59, %v1294_v54  ;;  %v6886_v33 = vcombine.high %v1298_v36, %v1302_v24  ;;  %v7950_v59 = vld [vmem:[#allocation9 + $0x3bc] ss:$28 sps:$4 sm:$0xff]   ;;  %v1370_v54 = vld [vmem:[#allocation6 + $0x658] sm:$0xff] }
 0x4f4   :  { %2996 = vmatpush1.bf16.msra.mxu1 %v6773_v63  ;;  %v1310_v63 = vld [vmem:[#allocation6 + $0x478] sm:$0xff] }
 0x4f5   :  { %2997 = vmatprep.subr.bf16.mxu1 %v6782_v45  ;;  %v6885_v45 = vcombine.low %v1298_v36, %v1302_v24  ;;  %v6894_v55 = vcombine.high %v1306_v29, %v1310_v63  ;;  %v7948_v36 = vld [vmem:[#allocation9 + $0x3b8] ss:$28 sps:$4 sm:$0xff]  }
 0x4f8   :  { %2998 = vmatpush1.bf16.msra.mxu1 %v6781_v53  ;;  %v1318_v53 = vld [vmem:[#allocation6 + $0x4b8] sm:$0xff] }
 0x4f9   :  { %2999 = vmatprep.subr.bf16.mxu1 %v6790_v37  ;;  %v6893_v37 = vcombine.low %v1306_v29, %v1310_v63  ;;  %v6902_v31 = vcombine.high %v1314_v42, %v1318_v53  ;;  %v1382_v29 = vld [vmem:[#allocation6 + $0x6b8] sm:$0xff] }
 0x4fc   :  { %3000 = vmatpush1.bf16.msra.mxu1 %v6789_v16  ;;  %v1326_v16 = vld [vmem:[#allocation6 + $0x4f8] sm:$0xff] }
 0x4fd   :  { %3001 = vmatprep.subr.bf16.mxu1 %v6798_v18  ;;  %v6901_v18 = vcombine.low %v1314_v42, %v1318_v53  ;;  %v6910_v15 = vcombine.high %v1322_v2, %v1326_v16  ;;  %v7962_v42 = vld [vmem:[#allocation9 + $0x42c] ss:$28 sps:$4 sm:$0xff]   ;;  %v1386_v53 = vld [vmem:[#allocation6 + $0x6d8] sm:$0xff] }
 0x500   :  { %3002 = vmatpush1.bf16.msra.mxu1 %v6797_v58  ;;  %v1334_v58 = vld [vmem:[#allocation6 + $0x538] sm:$0xff] }
 0x501   :  { %3003 = vmatprep.subr.bf16.mxu1 %v6806_v13  ;;  %v6909_v13 = vcombine.low %v1322_v2, %v1326_v16  ;;  %v6918_v8 = vcombine.high %v1330_v50, %v1334_v58  ;;  %v7960_v2 = vld [vmem:[#allocation9 + $0x428] ss:$28 sps:$4 sm:$0xff]  }
 0x504   :  { %3004 = vmatpush1.bf16.msra.mxu1 %v6805_v27  ;;  %v6917_v27 = vcombine.low %v1330_v50, %v1334_v58  ;;  %v1398_v50 = vld [vmem:[#allocation6 + $0x738] sm:$0xff] }
 0x505   :  { %3005 = vmatprep.subr.bf16.mxu1 %v6814_v41 }
 0x508   :  { %3006 = vmatpush1.bf16.msra.mxu1 %v6813_v11 }
 0x509   :  { %3007 = vmatprep.subr.bf16.mxu1 %v6822_v44 }
 0x50c   :  { %3008 = vmatpush1.bf16.msra.mxu1 %v6821_v0 }
 0x50d   :  { %3009 = vmatprep.subr.bf16.mxu1 %v6830_v10  ;;  %v1354_v10 = vld [vmem:[#allocation6 + $0x5d8] sm:$0xff] }
 0x50e   :  { %v6941_v40 = vcombine.low %v1354_v10, %v1358_v4 }
 0x510   :  { %3010 = vmatpush1.bf16.msra.mxu1 %v6829_v21 }
 0x511   :  { %3011 = vmatprep.subr.bf16.mxu1 %v6838_v23 }
 0x514   :  { %3012 = vmatpush1.bf16.msra.mxu1 %v6837_v48 }
 0x515   :  { %3013 = vmatprep.subr.bf16.mxu1 %v6846_v26  ;;  %v6933_v26 = vcombine.low %v1346_v43, %v1350_v60  ;;  %v7972_v43 = vld [vmem:[#allocation9 + $0x498] ss:$28 sps:$4 sm:$0xff]  }
 0x518   :  { %3014 = vmatpush1.bf16.msra.mxu1 %v6845_v52 }
 0x519   :  { %3015 = vmatprep.subr.bf16.mxu1 %v6854_v57  ;;  %v6942_v57 = vcombine.high %v1354_v10, %v1358_v4  ;;  %v7986_v4 = vld [vmem:[#allocation9 + $0x50c] ss:$28 sps:$4 sm:$0xff]  }
 0x51c   :  { %3016 = vmatpush1.bf16.msra.mxu1 %v6853_v6  ;;  %v1366_v6 = vld [vmem:[#allocation6 + $0x638] sm:$0xff] }
 0x51d   :  { %3017 = vmatprep.subr.bf16.mxu1 %v6862_v7 }
 0x520   :  { %3018 = vmatpush1.bf16.msra.mxu1 %v6861_v56 }
 0x521   :  { %3019 = vmatprep.subr.bf16.mxu1 %v6870_v30  ;;  %v6950_v30 = vcombine.high %v1362_v3, %v1366_v6 }
 0x524   :  { %3020 = vmatpush1.bf16.msra.mxu1 %v6869_v32  ;;  %v1374_v32 = vld [vmem:[#allocation6 + $0x678] sm:$0xff] }
 0x525   :  { %3021 = vmatprep.subr.bf16.mxu1 %v6878_v12  ;;  %v6949_v12 = vcombine.low %v1362_v3, %v1366_v6  ;;  %v6958_v24 = vcombine.high %v1370_v54, %v1374_v32  ;;  %v6957_v63 = vcombine.low %v1370_v54, %v1374_v32  ;;  %v7926_v3 = vld [vmem:[#allocation9 + $0x44] ss:$28 sps:$4 sm:$0xff]   ;;  %v7996_v6 = vld [vmem:[#allocation9 + $0x578] ss:$28 sps:$4 sm:$0xff]   ;;  %v8010_v54 = vld [vmem:[#allocation9 + $0x5ec] ss:$28 sps:$4 sm:$0xff]  }
 0x526   :  { %v7927_v32 = vld [vmem:[#allocation9 + $0x78] ss:$28 sps:$4 sm:$0xff]  }
 0x528   :  { %3022 = vmatpush1.bf16.msra.mxu1 %v6877_v38  ;;  %v7956_v38 = vld [vmem:[#allocation9 + $0x3f4] ss:$28 sps:$4 sm:$0xff]  }
 0x529   :  { %3032 = vmatprep.subr.bf16.mxu1 %v6886_v33  ;;  %v1378_v33 = vld [vmem:[#allocation6 + $0x698] sm:$0xff] }
 0x52b   :  { %3024 = vmatmul.mubr.bf16.vlgmr.msra.gmra.mrb[16].mxu1 %v9440_v5  ;;  %v1342_v5 = vld [vmem:[#allocation6 + $0x578] sm:$0xff] }
 0x52c   :  { %3033 = vmatpush1.bf16.msra.mxu1 %v6885_v45  ;;  %3064 = vmatprep.mubr.bf16.mxu1 %v9453_v47  ;;  %v9474_v47 = vld [vmem:[#allocation7] sm:$0xff]  ;;  %v6926_v41 = vcombine.high %v1338_v22, %v1342_v5  ;;  %v6925_v44 = vcombine.low %v1338_v22, %v1342_v5  ;;  %v7954_v45 = vld [vmem:[#allocation9 + $0x3f0] ss:$28 sps:$4 sm:$0xff]  }
 0x52d   :  { %3034 = vmatprep.subr.bf16.mxu1 %v6894_v55  ;;  %v1428_v11 = vrot.slane %v9474_v47, %v9427_v25  ;;  %v1432_v14 = vrot.slane %v9474_v47, %v9432_v35  ;;  %v6966_v55 = vcombine.high %v1378_v33, %v1382_v29  ;;  %v7974_v22 = vld [vmem:[#allocation9 + $0x49c] ss:$28 sps:$4 sm:$0xff]   ;;  %v1402_v5 = vld [vmem:[#allocation6 + $0x758] sm:$0xff] }
 0x530   :  { %3035 = vmatpush1.bf16.msra.mxu1 %v6893_v37  ;;  %v1390_v37 = vld [vmem:[#allocation6 + $0x6f8] sm:$0xff] }
 0x531   :  { %3036 = vmatprep.subr.bf16.mxu1 %v6902_v31  ;;  %v6965_v31 = vcombine.low %v1378_v33, %v1382_v29  ;;  %v6974_v16 = vcombine.high %v1386_v53, %v1390_v37  ;;  %v6973_v58 = vcombine.low %v1386_v53, %v1390_v37  ;;  %v8014_v33 = vld [vmem:[#allocation9 + $0x620] ss:$28 sps:$4 sm:$0xff]  }
 0x532   :  { %v8022_v29 = vld [vmem:[#allocation9 + $0x65c] ss:$28 sps:$4 sm:$0xff]  }
 0x533   :  { %v7936_v53 = vld [vmem:[#allocation9 + $0x120] ss:$28 sps:$4 sm:$0xff]  }
 0x534   :  { %3037 = vmatpush1.bf16.msra.mxu1 %v6901_v18  ;;  %v7968_v18 = vld [vmem:[#allocation9 + $0x464] ss:$28 sps:$4 sm:$0xff]   ;;  %v7941_v37 = vld [vmem:[#allocation9 + $0x15c] ss:$28 sps:$4 sm:$0xff]  }
 0x535   :  { %3038 = vmatprep.subr.bf16.mxu1 %v6910_v15  ;;  %v1394_v15 = vld [vmem:[#allocation6 + $0x718] sm:$0xff] }
 0x538   :  { %3039 = vmatpush1.bf16.msra.mxu1 %v6909_v13  ;;  %v7966_v13 = vld [vmem:[#allocation9 + $0x460] ss:$28 sps:$4 sm:$0xff]  }
 0x539   :  { %3040 = vmatprep.subr.bf16.mxu1 %v6918_v8  ;;  %v6982_v8 = vcombine.high %v1394_v15, %v1398_v50 }
 0x53c   :  { %3041 = vmatpush1.bf16.msra.mxu1 %v6917_v27  ;;  %v1406_v27 = vld [vmem:[#allocation6 + $0x778] sm:$0xff] }
 0x53d   :  { %3042 = vmatprep.subr.bf16.mxu1 %v6926_v41  ;;  %v6981_v41 = vcombine.low %v1394_v15, %v1398_v50  ;;  %v6990_v60 = vcombine.high %v1402_v5, %v1406_v27  ;;  %v8032_v15 = vld [vmem:[#allocation9 + $0x6c8] ss:$28 sps:$4 sm:$0xff]  }
 0x53e   :  { %v2820_v61 = vpop.f32.mrb[8].mxu1  ;;  %v9480_v0 = vpop.f32.mrb[4].mxu0  ;;  %v8040_v50 = vld [vmem:[#allocation9 + $0x704] ss:$28 sps:$4 sm:$0xff]  }
 0x53f   :  { %v7723_v17 = vadd.f32 %v2820_v61, %v1428_v11  ;;  %v2822_v21 = vpop.f32.mrb[9].mxu1  ;;  %v9482_v23 = vpop.f32.mrb[5].mxu0  ;;  %v7980_v11 = vld [vmem:[#allocation9 + $0x4d4] ss:$28 sps:$4 sm:$0xff]  }
 0x540   :  { %v7724_v62 = vadd.f32 %v2822_v21, %v1432_v14  ;;  %v2824_v39 = vpop.f32.mrb[10].mxu1  ;;  %v2988_v48 = vpop.f32.mrb[6].mxu0  ;;  %3043 = vmatpush1.bf16.msra.mxu1 %v6925_v44  ;;  %v1410_v14 = vld [vmem:[#allocation6 + $0x798] sm:$0xff] }
 0x541   :  { %v3073_v28 = vmax.f32 %v7723_v17, 0.0  ;;  %v2825_v34 = vpop.f32.mrb[11].mxu1  ;;  %v2989_v52 = vpop.f32.mrb[7].mxu0  ;;  %3044 = vmatprep.subr.bf16.mxu1 %v6934_v51  ;;  %v1414_v44 = vld [vmem:[#allocation6 + $0x7b8] sm:$0xff]  ;;  %v6989_v51 = vcombine.low %v1402_v5, %v1406_v27  ;;  %v7984_v39 = vld [vmem:[#allocation9 + $0x508] ss:$28 sps:$4 sm:$0xff]  }
 0x542   :  { %v3074_v9 = vmax.f32 %v7724_v62, 0.0  ;;  %v7978_v61 = vld [vmem:[#allocation9 + $0x4d0] ss:$28 sps:$4 sm:$0xff]   ;;  %v6998_v10 = vcombine.high %v1410_v14, %v1414_v44  ;;  %v6997_v62 = vcombine.low %v1410_v14, %v1414_v44  ;;  %v7990_v34 = vld [vmem:[#allocation9 + $0x540] ss:$28 sps:$4 sm:$0xff]  }
 0x543   :  { %v9486_v56 = vpack.c.bf16 %v3073_v28, %v3073_v28  ;;  %v1418_v17 = vld [vmem:[#allocation6 + $0x7d8] sm:$0xff]  ;;  %v7923_v52 = vld [vmem:[#allocation9 + $0xc] ss:$28 sps:$4 sm:$0xff]   ;;  %v7957_v5 = vld [vmem:[#allocation9 + $0x200] ss:$28 sps:$4 sm:$0xff]  }
 0x544   :  { %v9484_v7 = vpack.c.bf16 %v3074_v9, %v3074_v9  ;;  %3045 = vmatpush1.bf16.msra.mxu1 %v6933_v26  ;;  %v1422_v21 = vld [vmem:[#allocation6 + $0x7f8] sm:$0xff]  ;;  %v7992_v26 = vld [vmem:[#allocation9 + $0x544] ss:$28 sps:$4 sm:$0xff]   ;;  %v7965_v27 = vld [vmem:[#allocation9 + $0x23c] ss:$28 sps:$4 sm:$0xff]  }
 0x545   :  { %3046 = vmatprep.subr.bf16.mxu1 %v6942_v57  ;;  %v7006_v48 = vcombine.high %v1418_v17, %v1422_v21  ;;  %v7005_v28 = vcombine.low %v1418_v17, %v1422_v21  ;;  %v7998_v57 = vld [vmem:[#allocation9 + $0x57c] ss:$28 sps:$4 sm:$0xff]   ;;  %v7921_v9 = vld [vmem:[#allocation9 + $0x8] ss:$28 sps:$4 sm:$0xff]   ;;  %v7993_v17 = vld [vmem:[#allocation9 + $0x350] ss:$28 sps:$4 sm:$0xff]  }
 0x546   :  { %5974 = vmatprep.mubr.bf16.mxu0 %v9484_v7  ;;  %v7975_v14 = vld [vmem:[#allocation9 + $0x2a8] ss:$28 sps:$4 sm:$0xff]  }
 0x547   :  { %5975 = vmatmul.mubr.bf16.vlgmr.msra.gmra.mrb[8].mxu0 %v9486_v56  ;;  %v7983_v44 = vld [vmem:[#allocation9 + $0x2e4] ss:$28 sps:$4 sm:$0xff]   ;;  %v8001_v21 = vld [vmem:[#allocation9 + $0x38c] ss:$28 sps:$4 sm:$0xff]  }
 0x548   :  { %3047 = vmatpush1.bf16.msra.mxu1 %v6941_v40  ;;  %5984 = vmatpush1.bf16.msra.mxu0 %v7942_v19  ;;  %v8004_v40 = vld [vmem:[#allocation9 + $0x5b4] ss:$28 sps:$4 sm:$0xff]   ;;  %v7924_v19 = vld [vmem:[#allocation9 + $0x40] ss:$28 sps:$4 sm:$0xff]  }
 0x549   :  { %3048 = vmatprep.subr.bf16.mxu1 %v6950_v30  ;;  %5985 = vmatprep.subr.bf16.mxu0 %v7950_v59  ;;  %v7929_v30 = vld [vmem:[#allocation9 + $0x7c] ss:$28 sps:$4 sm:$0xff]   ;;  %v8002_v59 = vld [vmem:[#allocation9 + $0x5b0] ss:$28 sps:$4 sm:$0xff]  }
 0x54c   :  { %3049 = vmatpush1.bf16.msra.mxu1 %v6949_v12  ;;  %5986 = vmatpush1.bf16.msra.mxu0 %v7948_v36  ;;  %v7932_v12 = vld [vmem:[#allocation9 + $0xb4] ss:$28 sps:$4 sm:$0xff]   ;;  %v8008_v36 = vld [vmem:[#allocation9 + $0x5e8] ss:$28 sps:$4 sm:$0xff]  }
 0x54d   :  { %3050 = vmatprep.subr.bf16.mxu1 %v6958_v24  ;;  %5987 = vmatprep.subr.bf16.mxu0 %v7956_v38  ;;  %v8016_v24 = vld [vmem:[#allocation9 + $0x624] ss:$28 sps:$4 sm:$0xff]   ;;  %v7935_v38 = vld [vmem:[#allocation9 + $0xec] ss:$28 sps:$4 sm:$0xff]  }
 0x550   :  { %3051 = vmatpush1.bf16.msra.mxu1 %v6957_v63  ;;  %5988 = vmatpush1.bf16.msra.mxu0 %v7954_v45  ;;  %v7933_v63 = vld [vmem:[#allocation9 + $0xe8] ss:$28 sps:$4 sm:$0xff]  }
 0x551   :  { %3052 = vmatprep.subr.bf16.mxu1 %v6966_v55  ;;  %5989 = vmatprep.subr.bf16.mxu0 %v7962_v42  ;;  %v7938_v45 = vld [vmem:[#allocation9 + $0x124] ss:$28 sps:$4 sm:$0xff]   ;;  %v8020_v55 = vld [vmem:[#allocation9 + $0x658] ss:$28 sps:$4 sm:$0xff]  }
 0x552   :  { %v8028_v42 = vld [vmem:[#allocation9 + $0x694] ss:$28 sps:$4 sm:$0xff]  }
 0x554   :  { %3053 = vmatpush1.bf16.msra.mxu1 %v6965_v31  ;;  %5990 = vmatpush1.bf16.msra.mxu0 %v7960_v2  ;;  %v8026_v31 = vld [vmem:[#allocation9 + $0x690] ss:$28 sps:$4 sm:$0xff]  }
 0x555   :  { %3054 = vmatprep.subr.bf16.mxu1 %v6974_v16  ;;  %5991 = vmatprep.subr.bf16.mxu0 %v7968_v18  ;;  %v8034_v2 = vld [vmem:[#allocation9 + $0x6cc] ss:$28 sps:$4 sm:$0xff]   ;;  %v7939_v16 = vld [vmem:[#allocation9 + $0x158] ss:$28 sps:$4 sm:$0xff]  }
 0x556   :  { %v7947_v18 = vld [vmem:[#allocation9 + $0x194] ss:$28 sps:$4 sm:$0xff]  }
 0x558   :  { %3055 = vmatpush1.bf16.msra.mxu1 %v6973_v58  ;;  %5992 = vmatpush1.bf16.msra.mxu0 %v7966_v13  ;;  %v7945_v58 = vld [vmem:[#allocation9 + $0x190] ss:$28 sps:$4 sm:$0xff]  }
 0x559   :  { %3056 = vmatprep.subr.bf16.mxu1 %v6982_v8  ;;  %5993 = vmatprep.subr.bf16.mxu0 %v7974_v22  ;;  %v7953_v13 = vld [vmem:[#allocation9 + $0x1cc] ss:$28 sps:$4 sm:$0xff]   ;;  %v7959_v22 = vld [vmem:[#allocation9 + $0x204] ss:$28 sps:$4 sm:$0xff]  }
 0x55a   :  { %v7951_v8 = vld [vmem:[#allocation9 + $0x1c8] ss:$28 sps:$4 sm:$0xff]  }
 0x55c   :  { %3057 = vmatpush1.bf16.msra.mxu1 %v6981_v41  ;;  %5994 = vmatpush1.bf16.msra.mxu0 %v7972_v43  ;;  %v7963_v41 = vld [vmem:[#allocation9 + $0x238] ss:$28 sps:$4 sm:$0xff]  }
 0x55d   :  { %3058 = vmatprep.subr.bf16.mxu1 %v6990_v60  ;;  %5995 = vmatprep.subr.bf16.mxu0 %v7980_v11  ;;  %v7971_v43 = vld [vmem:[#allocation9 + $0x274] ss:$28 sps:$4 sm:$0xff]   ;;  %v7977_v11 = vld [vmem:[#allocation9 + $0x2ac] ss:$28 sps:$4 sm:$0xff]  }
 0x55e   :  { %v7969_v60 = vld [vmem:[#allocation9 + $0x270] ss:$28 sps:$4 sm:$0xff]  }
 0x560   :  { %3059 = vmatpush1.bf16.msra.mxu1 %v6989_v51  ;;  %5996 = vmatpush1.bf16.msra.mxu0 %v7978_v61  ;;  %v7981_v51 = vld [vmem:[#allocation9 + $0x2e0] ss:$28 sps:$4 sm:$0xff]  }
 0x561   :  { %3060 = vmatprep.subr.bf16.mxu1 %v6998_v10  ;;  %5997 = vmatprep.subr.bf16.mxu0 %v7986_v4  ;;  %v7989_v61 = vld [vmem:[#allocation9 + $0x31c] ss:$28 sps:$4 sm:$0xff]   ;;  %v7995_v4 = vld [vmem:[#allocation9 + $0x354] ss:$28 sps:$4 sm:$0xff]  }
 0x562   :  { %v7987_v10 = vld [vmem:[#allocation9 + $0x318] ss:$28 sps:$4 sm:$0xff]  }
 0x564   :  { %3061 = vmatpush1.bf16.msra.mxu1 %v6997_v62  ;;  %5998 = vmatpush1.bf16.msra.mxu0 %v7984_v39  ;;  %v7999_v62 = vld [vmem:[#allocation9 + $0x388] ss:$28 sps:$4 sm:$0xff]  }
 0x565   :  { %3062 = vmatprep.subr.bf16.mxu1 %v7006_v48  ;;  %5999 = vmatprep.subr.bf16.mxu0 %v7992_v26  ;;  %v8007_v39 = vld [vmem:[#allocation9 + $0x3c4] ss:$28 sps:$4 sm:$0xff]   ;;  %v8013_v26 = vld [vmem:[#allocation9 + $0x3fc] ss:$28 sps:$4 sm:$0xff]  }
 0x566   :  { %v8005_v48 = vld [vmem:[#allocation9 + $0x3c0] ss:$28 sps:$4 sm:$0xff]  }
 0x568   :  { %3063 = vmatpush1.bf16.msra.mxu1 %v7005_v28  ;;  %6000 = vmatpush1.bf16.msra.mxu0 %v7990_v34  ;;  %v8011_v28 = vld [vmem:[#allocation9 + $0x3f8] ss:$28 sps:$4 sm:$0xff]  }
 0x569   :  { %6106 = vmatprep.subr.bf16.mxu1 %v7923_v52  ;;  %6001 = vmatprep.subr.bf16.mxu0 %v7998_v57  ;;  %v8019_v34 = vld [vmem:[#allocation9 + $0x434] ss:$28 sps:$4 sm:$0xff]   ;;  %v8025_v57 = vld [vmem:[#allocation9 + $0x46c] ss:$28 sps:$4 sm:$0xff]  }
 0x56a   :  { %v8017_v52 = vld [vmem:[#allocation9 + $0x430] ss:$28 sps:$4 sm:$0xff]  }
 0x56b   :  { %3065 = vmatmul.mubr.bf16.vlgmr.msra.gmra.mrb[16].mxu1 %v9463_v46  ;;  %v7930_v46 = vld [vmem:[#allocation9 + $0xb0] ss:$28 sps:$4 sm:$0xff]  }
 0x56c   :  { %6107 = vmatpush1.bf16.msra.mxu1 %v7921_v9  ;;  %6138 = vmatprep.mubr.bf16.mxu1 %v9484_v7  ;;  %v1447_v9 = vsub.s32 5, %v9708_v20 }
 0x56d   :  { %6108 = vmatprep.subr.bf16.mxu1 %v7926_v3  ;;  %6002 = vmatpush1.bf16.msra.mxu0 %v7996_v6  ;;  %v8023_v3 = vld [vmem:[#allocation9 + $0x468] ss:$28 sps:$4 sm:$0xff]  }
 0x56e   :  { %6003 = vmatprep.subr.bf16.mxu0 %v8004_v40  ;;  %v8031_v6 = vld [vmem:[#allocation9 + $0x4a4] ss:$28 sps:$4 sm:$0xff]   ;;  %v1448_v40 = vrot.slane %v9474_v47, %v1447_v9 }
 0x570   :  { %6109 = vmatpush1.bf16.msra.mxu1 %v7924_v19  ;;  %v1436_v19 = vrot.slane %v9474_v47, %v9458_v1 }
 0x571   :  { %6110 = vmatprep.subr.bf16.mxu1 %v7929_v30  ;;  %6004 = vmatpush1.bf16.msra.mxu0 %v8002_v59  ;;  %v1440_v30 = vrot.slane %v9474_v47, %v9447_v49  ;;  %v8029_v59 = vld [vmem:[#allocation9 + $0x4a0] ss:$28 sps:$4 sm:$0xff]  }
 0x572   :  { %6005 = vmatprep.subr.bf16.mxu0 %v8010_v54  ;;  %v8037_v54 = vld [vmem:[#allocation9 + $0x4dc] ss:$28 sps:$4 sm:$0xff]  }
 0x574   :  { %6111 = vmatpush1.bf16.msra.mxu1 %v7927_v32  ;;  %v7728_v32 = vadd.f32 %v9482_v23, %v1448_v40  ;;  %v8041_v23 = vld [vmem:[#allocation9 + $0x510] ss:$28 sps:$4 sm:$0xff]   ;;  %v8094_v40 = vld [vmem:[#allocation9 + $0x8fc] ss:$28 sps:$4 sm:$0xff]  }
 0x575   :  { %6112 = vmatprep.subr.bf16.mxu1 %v7932_v12  ;;  %6006 = vmatpush1.bf16.msra.mxu0 %v8008_v36 }
 0x576   :  { %6007 = vmatprep.subr.bf16.mxu0 %v8016_v24 }
 0x578   :  { %6113 = vmatpush1.bf16.msra.mxu1 %v7930_v46 }
 0x579   :  { %6114 = vmatprep.subr.bf16.mxu1 %v7935_v38  ;;  %6008 = vmatpush1.bf16.msra.mxu0 %v8014_v33  ;;  %v8035_v33 = vld [vmem:[#allocation9 + $0x4d8] ss:$28 sps:$4 sm:$0xff]  }
 0x57a   :  { %6009 = vmatprep.subr.bf16.mxu0 %v8022_v29 }
 0x57c   :  { %6115 = vmatpush1.bf16.msra.mxu1 %v7933_v63 }
 0x57d   :  { %6116 = vmatprep.subr.bf16.mxu1 %v7938_v45  ;;  %6010 = vmatpush1.bf16.msra.mxu0 %v8020_v55  ;;  %v8043_v45 = vld [vmem:[#allocation9 + $0x514] ss:$28 sps:$4 sm:$0xff]   ;;  %v3078_v55 = vmax.f32 %v7728_v32, 0.0  ;;  %v8103_v32 = vld [vmem:[#allocation9 + $0x744] ss:$28 sps:$4 sm:$0xff]  }
 0x57e   :  { %6011 = vmatprep.subr.bf16.mxu0 %v8028_v42 }
 0x580   :  { %6117 = vmatpush1.bf16.msra.mxu1 %v7936_v53 }
 0x581   :  { %6118 = vmatprep.subr.bf16.mxu1 %v7941_v37  ;;  %6012 = vmatpush1.bf16.msra.mxu0 %v8026_v31  ;;  %v8038_v37 = vld [vmem:[#allocation9 + $0x700] ss:$28 sps:$4 sm:$0xff]  }
 0x582   :  { %6013 = vmatprep.subr.bf16.mxu0 %v8034_v2  ;;  %v8046_v2 = vld [vmem:[#allocation9 + $0x73c] ss:$28 sps:$4 sm:$0xff]  }
 0x584   :  { %6119 = vmatpush1.bf16.msra.mxu1 %v7939_v16  ;;  %v9506_v16 = vpack.c.bf16 %v3078_v55, %v3078_v55  ;;  %v1443_v55 = vsub.s32 4, %v9708_v20 }
 0x585   :  { %6120 = vmatprep.subr.bf16.mxu1 %v7947_v18  ;;  %6014 = vmatpush1.bf16.msra.mxu0 %v8032_v15  ;;  %v8049_v18 = vld [vmem:[#allocation9 + $0x54c] ss:$28 sps:$4 sm:$0xff]   ;;  %v8044_v15 = vld [vmem:[#allocation9 + $0x738] ss:$28 sps:$4 sm:$0xff]  }
 0x586   :  { %6024 = vmatprep.subr.bf16.mxu0 %v8040_v50  ;;  %v8047_v50 = vld [vmem:[#allocation9 + $0x548] ss:$28 sps:$4 sm:$0xff]  }
 0x588   :  { %6121 = vmatpush1.bf16.msra.mxu1 %v7945_v58  ;;  %v8052_v58 = vld [vmem:[#allocation9 + $0x774] ss:$28 sps:$4 sm:$0xff]  }
 0x589   :  { %6122 = vmatprep.subr.bf16.mxu1 %v7953_v13  ;;  %v8055_v13 = vld [vmem:[#allocation9 + $0x584] ss:$28 sps:$4 sm:$0xff]  }
 0x58c   :  { %6123 = vmatpush1.bf16.msra.mxu1 %v7951_v8  ;;  %v8050_v8 = vld [vmem:[#allocation9 + $0x770] ss:$28 sps:$4 sm:$0xff]  }
 0x58d   :  { %6124 = vmatprep.subr.bf16.mxu1 %v7959_v22  ;;  %v8053_v22 = vld [vmem:[#allocation9 + $0x580] ss:$28 sps:$4 sm:$0xff]  }
 0x590   :  { %6125 = vmatpush1.bf16.msra.mxu1 %v7957_v5  ;;  %v8058_v5 = vld [vmem:[#allocation9 + $0x7ac] ss:$28 sps:$4 sm:$0xff]  }
 0x591   :  { %6126 = vmatprep.subr.bf16.mxu1 %v7965_v27  ;;  %v8061_v27 = vld [vmem:[#allocation9 + $0x5bc] ss:$28 sps:$4 sm:$0xff]  }
 0x594   :  { %6127 = vmatpush1.bf16.msra.mxu1 %v7963_v41  ;;  %v8056_v41 = vld [vmem:[#allocation9 + $0x7a8] ss:$28 sps:$4 sm:$0xff]  }
 0x595   :  { %6128 = vmatprep.subr.bf16.mxu1 %v7971_v43  ;;  %v8059_v43 = vld [vmem:[#allocation9 + $0x5b8] ss:$28 sps:$4 sm:$0xff]  }
 0x598   :  { %6129 = vmatpush1.bf16.msra.mxu1 %v7969_v60  ;;  %v8064_v60 = vld [vmem:[#allocation9 + $0x7e4] ss:$28 sps:$4 sm:$0xff]  }
 0x599   :  { %6130 = vmatprep.subr.bf16.mxu1 %v7977_v11  ;;  %v8067_v11 = vld [vmem:[#allocation9 + $0x5f4] ss:$28 sps:$4 sm:$0xff]  }
 0x59c   :  { %6131 = vmatpush1.bf16.msra.mxu1 %v7975_v14  ;;  %v8062_v14 = vld [vmem:[#allocation9 + $0x7e0] ss:$28 sps:$4 sm:$0xff]  }
 0x59d   :  { %6132 = vmatprep.subr.bf16.mxu1 %v7983_v44  ;;  %v8065_v44 = vld [vmem:[#allocation9 + $0x5f0] ss:$28 sps:$4 sm:$0xff]  }
 0x5a0   :  { %6133 = vmatpush1.bf16.msra.mxu1 %v7981_v51  ;;  %v8070_v51 = vld [vmem:[#allocation9 + $0x81c] ss:$28 sps:$4 sm:$0xff]  }
 0x5a1   :  { %6134 = vmatprep.subr.bf16.mxu1 %v7989_v61  ;;  %v8073_v61 = vld [vmem:[#allocation9 + $0x62c] ss:$28 sps:$4 sm:$0xff]  }
 0x5a4   :  { %6135 = vmatpush1.bf16.msra.mxu1 %v7987_v10  ;;  %v8068_v10 = vld [vmem:[#allocation9 + $0x818] ss:$28 sps:$4 sm:$0xff]  }
 0x5a5   :  { %6136 = vmatprep.subr.bf16.mxu1 %v7995_v4  ;;  %v8071_v4 = vld [vmem:[#allocation9 + $0x628] ss:$28 sps:$4 sm:$0xff]  }
 0x5a8   :  { %6137 = vmatpush1.bf16.msra.mxu1 %v7993_v17  ;;  %v8076_v17 = vld [vmem:[#allocation9 + $0x854] ss:$28 sps:$4 sm:$0xff]  }
 0x5a9   :  { %6147 = vmatprep.subr.bf16.mxu1 %v8001_v21  ;;  %v8079_v21 = vld [vmem:[#allocation9 + $0x664] ss:$28 sps:$4 sm:$0xff]  }
 0x5ab   :  { %6139 = vmatmul.mubr.bf16.vlgmr.msra.gmra.mrb[20].mxu1 %v9486_v56 }
 0x5ac   :  { %6148 = vmatpush1.bf16.msra.mxu1 %v7999_v62  ;;  %v8074_v62 = vld [vmem:[#allocation9 + $0x850] ss:$28 sps:$4 sm:$0xff]  }
 0x5ad   :  { %6149 = vmatprep.subr.bf16.mxu1 %v8007_v39  ;;  %v8077_v39 = vld [vmem:[#allocation9 + $0x660] ss:$28 sps:$4 sm:$0xff]  }
 0x5b0   :  { %6150 = vmatpush1.bf16.msra.mxu1 %v8005_v48  ;;  %v8082_v48 = vld [vmem:[#allocation9 + $0x88c] ss:$28 sps:$4 sm:$0xff]  }
 0x5b1   :  { %6151 = vmatprep.subr.bf16.mxu1 %v8013_v26  ;;  %v8085_v26 = vld [vmem:[#allocation9 + $0x69c] ss:$28 sps:$4 sm:$0xff]  }
 0x5b4   :  { %6152 = vmatpush1.bf16.msra.mxu1 %v8011_v28  ;;  %v8080_v28 = vld [vmem:[#allocation9 + $0x888] ss:$28 sps:$4 sm:$0xff]  }
 0x5b5   :  { %6153 = vmatprep.subr.bf16.mxu1 %v8019_v34  ;;  %v8083_v34 = vld [vmem:[#allocation9 + $0x698] ss:$28 sps:$4 sm:$0xff]  }
 0x5b8   :  { %6154 = vmatpush1.bf16.msra.mxu1 %v8017_v52  ;;  %v8088_v52 = vld [vmem:[#allocation9 + $0x8c4] ss:$28 sps:$4 sm:$0xff]  }
 0x5b9   :  { %6155 = vmatprep.subr.bf16.mxu1 %v8025_v57  ;;  %v8091_v57 = vld [vmem:[#allocation9 + $0x6d4] ss:$28 sps:$4 sm:$0xff]  }
 0x5bc   :  { %6156 = vmatpush1.bf16.msra.mxu1 %v8023_v3  ;;  %v8086_v3 = vld [vmem:[#allocation9 + $0x8c0] ss:$28 sps:$4 sm:$0xff]  }
 0x5bd   :  { %6157 = vmatprep.subr.bf16.mxu1 %v8031_v6  ;;  %v8089_v6 = vld [vmem:[#allocation9 + $0x6d0] ss:$28 sps:$4 sm:$0xff]  }
 0x5be   :  { %v2902_v12 = vpop.f32.mrb[12].mxu1 }
 0x5bf   :  { %v7725_v36 = vadd.f32 %v2902_v12, %v1436_v19  ;;  %v2904_v24 = vpop.f32.mrb[13].mxu1  ;;  %v8097_v19 = vld [vmem:[#allocation9 + $0x70c] ss:$28 sps:$4 sm:$0xff]  }
 0x5c0   :  { %v7726_v46 = vadd.f32 %v2904_v24, %v1440_v30  ;;  %v2906_v38 = vpop.f32.mrb[14].mxu1  ;;  %6158 = vmatpush1.bf16.msra.mxu1 %v8029_v59  ;;  %v8092_v30 = vld [vmem:[#allocation9 + $0x8f8] ss:$28 sps:$4 sm:$0xff]   ;;  %v8095_v59 = vld [vmem:[#allocation9 + $0x708] ss:$28 sps:$4 sm:$0xff]  }
 0x5c1   :  { %v3075_v29 = vmax.f32 %v7725_v36, 0.0  ;;  %v2907_v63 = vpop.f32.mrb[15].mxu1  ;;  %6159 = vmatprep.subr.bf16.mxu1 %v8037_v54  ;;  %v8100_v54 = vld [vmem:[#allocation9 + $0x934] ss:$28 sps:$4 sm:$0xff]   ;;  %v8101_v36 = vld [vmem:[#allocation9 + $0x740] ss:$28 sps:$4 sm:$0xff]  }
 0x5c2   :  { %v3076_v42 = vmax.f32 %v7726_v46, 0.0  ;;  %v8098_v12 = vld [vmem:[#allocation9 + $0x930] ss:$28 sps:$4 sm:$0xff]   ;;  %v8109_v46 = vld [vmem:[#allocation9 + $0x77c] ss:$28 sps:$4 sm:$0xff]  }
 0x5c3   :  { %v9504_v31 = vpack.c.bf16 %v3075_v29, %v3075_v29  ;;  %v8106_v24 = vld [vmem:[#allocation9 + $0x96c] ss:$28 sps:$4 sm:$0xff]   ;;  %v8112_v29 = vld [vmem:[#allocation9 + $0x9a4] ss:$28 sps:$4 sm:$0xff]   ;;  %v8115_v63 = vld [vmem:[#allocation9 + $0x7b4] ss:$28 sps:$4 sm:$0xff]  }
 0x5c4   :  { %v9502_v53 = vpack.c.bf16 %v3076_v42, %v3076_v42  ;;  %6160 = vmatpush1.bf16.msra.mxu1 %v8035_v33  ;;  %v8104_v38 = vld [vmem:[#allocation9 + $0x968] ss:$28 sps:$4 sm:$0xff]   ;;  %v8107_v33 = vld [vmem:[#allocation9 + $0x778] ss:$28 sps:$4 sm:$0xff]   ;;  %v8113_v42 = vld [vmem:[#allocation9 + $0x7b0] ss:$28 sps:$4 sm:$0xff]  }
 0x5c5   :  { %6161 = vmatprep.subr.bf16.mxu1 %v8043_v45  ;;  %v8110_v45 = vld [vmem:[#allocation9 + $0x9a0] ss:$28 sps:$4 sm:$0xff]  }
 0x5c6   :  { %6015 = vmatprep.mubr.bf16.mxu0 %v9502_v53  ;;  %6179 = vmatprep.mubr.bf16.mxu1 %v9502_v53 }
 0x5c7   :  { %6016 = vmatmul.mubr.bf16.vlgmr.msra.gmra.mrb[8].mxu0 %v9504_v31 }
 0x5c8   :  { %6025 = vmatpush1.bf16.msra.mxu0 %v8038_v37  ;;  %6056 = vmatprep.mubr.bf16.mxu0 %v9506_v16  ;;  %v8118_v37 = vld [vmem:[#allocation9 + $0x9dc] ss:$28 sps:$4 sm:$0xff]  }
 0x5c9   :  { %6162 = vmatpush1.bf16.msra.mxu1 %v8041_v23  ;;  %6026 = vmatprep.subr.bf16.mxu0 %v8046_v2  ;;  %v8121_v23 = vld [vmem:[#allocation9 + $0x7ec] ss:$28 sps:$4 sm:$0xff]   ;;  %v8116_v2 = vld [vmem:[#allocation9 + $0x9d8] ss:$28 sps:$4 sm:$0xff]  }
 0x5ca   :  { %6163 = vmatprep.subr.bf16.mxu1 %v8049_v18  ;;  %v1444_v18 = vrot.slane %v9474_v47, %v1443_v55  ;;  %v8131_v47 = vld [vmem:[#allocation9 + $0x858] ss:$28 sps:$4 sm:$0xff]  }
 0x5cc   :  { %6027 = vmatpush1.bf16.msra.mxu0 %v8044_v15  ;;  %v8119_v15 = vld [vmem:[#allocation9 + $0x7e8] ss:$28 sps:$4 sm:$0xff]  }
 0x5cd   :  { %6164 = vmatpush1.bf16.msra.mxu1 %v8047_v50  ;;  %6028 = vmatprep.subr.bf16.mxu0 %v8052_v58  ;;  %v8124_v50 = vld [vmem:[#allocation9 + $0xa14] ss:$28 sps:$4 sm:$0xff]   ;;  %v8127_v58 = vld [vmem:[#allocation9 + $0x824] ss:$28 sps:$4 sm:$0xff]  }
 0x5ce   :  { %6165 = vmatprep.subr.bf16.mxu1 %v8055_v13  ;;  %v8122_v13 = vld [vmem:[#allocation9 + $0xa10] ss:$28 sps:$4 sm:$0xff]  }
 0x5d0   :  { %6029 = vmatpush1.bf16.msra.mxu0 %v8050_v8  ;;  %v7727_v8 = vadd.f32 %v9480_v0, %v1444_v18  ;;  %v8137_v0 = vld [vmem:[#allocation9 + $0x890] ss:$28 sps:$4 sm:$0xff]   ;;  %v8191_v18 = vld [vmem:[#allocation9 + $0xa88] ss:$28 sps:$4 sm:$0xff]  }
 0x5d1   :  { %6166 = vmatpush1.bf16.msra.mxu1 %v8053_v22  ;;  %6030 = vmatprep.subr.bf16.mxu0 %v8058_v5  ;;  %v8125_v22 = vld [vmem:[#allocation9 + $0x820] ss:$28 sps:$4 sm:$0xff]   ;;  %v8130_v5 = vld [vmem:[#allocation9 + $0xa4c] ss:$28 sps:$4 sm:$0xff]  }
 0x5d2   :  { %6167 = vmatprep.subr.bf16.mxu1 %v8061_v27  ;;  %v8133_v27 = vld [vmem:[#allocation9 + $0x85c] ss:$28 sps:$4 sm:$0xff]  }
 0x5d4   :  { %6031 = vmatpush1.bf16.msra.mxu0 %v8056_v41  ;;  %v8128_v41 = vld [vmem:[#allocation9 + $0xa48] ss:$28 sps:$4 sm:$0xff]  }
 0x5d5   :  { %6168 = vmatpush1.bf16.msra.mxu1 %v8059_v43  ;;  %6032 = vmatprep.subr.bf16.mxu0 %v8064_v60  ;;  %v3077_v43 = vmax.f32 %v7727_v8, 0.0  ;;  %v8136_v60 = vld [vmem:[#allocation9 + $0xa84] ss:$28 sps:$4 sm:$0xff]   ;;  %v8202_v8 = vld [vmem:[#allocation9 + $0xcec] ss:$28 sps:$4 sm:$0xff]  }
 0x5d6   :  { %6169 = vmatprep.subr.bf16.mxu1 %v8067_v11  ;;  %v8139_v11 = vld [vmem:[#allocation9 + $0x894] ss:$28 sps:$4 sm:$0xff]  }
 0x5d8   :  { %6033 = vmatpush1.bf16.msra.mxu0 %v8062_v14  ;;  %v8134_v14 = vld [vmem:[#allocation9 + $0xa80] ss:$28 sps:$4 sm:$0xff]  }
 0x5d9   :  { %6170 = vmatpush1.bf16.msra.mxu1 %v8065_v44  ;;  %6034 = vmatprep.subr.bf16.mxu0 %v8070_v51  ;;  %v9519_v44 = vpack.c.bf16 %v3077_v43, %v3077_v43  ;;  %v8142_v51 = vld [vmem:[#allocation9 + $0xabc] ss:$28 sps:$4 sm:$0xff]   ;;  %v8211_v43 = vld [vmem:[#allocation9 + $0xb34] ss:$28 sps:$4 sm:$0xff]  }
 0x5da   :  { %6171 = vmatprep.subr.bf16.mxu1 %v8073_v61  ;;  %v8145_v61 = vld [vmem:[#allocation9 + $0x8cc] ss:$28 sps:$4 sm:$0xff]  }
 0x5dc   :  { %6035 = vmatpush1.bf16.msra.mxu0 %v8068_v10  ;;  %v8140_v10 = vld [vmem:[#allocation9 + $0xab8] ss:$28 sps:$4 sm:$0xff]  }
 0x5dd   :  { %6172 = vmatpush1.bf16.msra.mxu1 %v8071_v4  ;;  %6036 = vmatprep.subr.bf16.mxu0 %v8076_v17  ;;  %v8143_v4 = vld [vmem:[#allocation9 + $0x8c8] ss:$28 sps:$4 sm:$0xff]   ;;  %v8148_v17 = vld [vmem:[#allocation9 + $0xaf4] ss:$28 sps:$4 sm:$0xff]  }
 0x5de   :  { %6173 = vmatprep.subr.bf16.mxu1 %v8079_v21  ;;  %v8151_v21 = vld [vmem:[#allocation9 + $0x904] ss:$28 sps:$4 sm:$0xff]  }
 0x5e0   :  { %6037 = vmatpush1.bf16.msra.mxu0 %v8074_v62  ;;  %v8146_v62 = vld [vmem:[#allocation9 + $0xaf0] ss:$28 sps:$4 sm:$0xff]  }
 0x5e1   :  { %6174 = vmatpush1.bf16.msra.mxu1 %v8077_v39  ;;  %6038 = vmatprep.subr.bf16.mxu0 %v8082_v48  ;;  %v8149_v39 = vld [vmem:[#allocation9 + $0x900] ss:$28 sps:$4 sm:$0xff]   ;;  %v8154_v48 = vld [vmem:[#allocation9 + $0xb2c] ss:$28 sps:$4 sm:$0xff]  }
 0x5e2   :  { %6175 = vmatprep.subr.bf16.mxu1 %v8085_v26  ;;  %v8157_v26 = vld [vmem:[#allocation9 + $0x93c] ss:$28 sps:$4 sm:$0xff]  }
 0x5e4   :  { %6039 = vmatpush1.bf16.msra.mxu0 %v8080_v28  ;;  %v8152_v28 = vld [vmem:[#allocation9 + $0xb28] ss:$28 sps:$4 sm:$0xff]  }
 0x5e5   :  { %6176 = vmatpush1.bf16.msra.mxu1 %v8083_v34  ;;  %6040 = vmatprep.subr.bf16.mxu0 %v8088_v52  ;;  %v8155_v34 = vld [vmem:[#allocation9 + $0x938] ss:$28 sps:$4 sm:$0xff]   ;;  %v8160_v52 = vld [vmem:[#allocation9 + $0xb64] ss:$28 sps:$4 sm:$0xff]  }
 0x5e6   :  { %6177 = vmatprep.subr.bf16.mxu1 %v8091_v57  ;;  %v8163_v57 = vld [vmem:[#allocation9 + $0x974] ss:$28 sps:$4 sm:$0xff]  }
 0x5e8   :  { %6041 = vmatpush1.bf16.msra.mxu0 %v8086_v3  ;;  %v8158_v3 = vld [vmem:[#allocation9 + $0xb60] ss:$28 sps:$4 sm:$0xff]  }
 0x5e9   :  { %6178 = vmatpush1.bf16.msra.mxu1 %v8089_v6  ;;  %6042 = vmatprep.subr.bf16.mxu0 %v8094_v40  ;;  %v8161_v6 = vld [vmem:[#allocation9 + $0x970] ss:$28 sps:$4 sm:$0xff]   ;;  %v8166_v40 = vld [vmem:[#allocation9 + $0xb9c] ss:$28 sps:$4 sm:$0xff]  }
 0x5ea   :  { %6188 = vmatprep.subr.bf16.mxu1 %v8097_v19  ;;  %v8169_v19 = vld [vmem:[#allocation9 + $0x9ac] ss:$28 sps:$4 sm:$0xff]  }
 0x5ec   :  { %6043 = vmatpush1.bf16.msra.mxu0 %v8092_v30  ;;  %6180 = vmatmul.mubr.bf16.vlgmr.msra.gmra.mrb[20].mxu1 %v9504_v31  ;;  %v8164_v30 = vld [vmem:[#allocation9 + $0xb98] ss:$28 sps:$4 sm:$0xff]  }
 0x5ed   :  { %6189 = vmatpush1.bf16.msra.mxu1 %v8095_v59  ;;  %6220 = vmatprep.mubr.bf16.mxu1 %v9506_v16  ;;  %v8167_v59 = vld [vmem:[#allocation9 + $0x9a8] ss:$28 sps:$4 sm:$0xff]  }
 0x5ee   :  { %6044 = vmatprep.subr.bf16.mxu0 %v8100_v54  ;;  %6190 = vmatprep.subr.bf16.mxu1 %v8103_v32  ;;  %v8172_v54 = vld [vmem:[#allocation9 + $0xbd4] ss:$28 sps:$4 sm:$0xff]   ;;  %v8175_v32 = vld [vmem:[#allocation9 + $0x9e4] ss:$28 sps:$4 sm:$0xff]  }
 0x5f0   :  { %6045 = vmatpush1.bf16.msra.mxu0 %v8098_v12  ;;  %v8170_v12 = vld [vmem:[#allocation9 + $0xbd0] ss:$28 sps:$4 sm:$0xff]  }
 0x5f1   :  { %6191 = vmatpush1.bf16.msra.mxu1 %v8101_v36  ;;  %6046 = vmatprep.subr.bf16.mxu0 %v8106_v24  ;;  %v8173_v36 = vld [vmem:[#allocation9 + $0x9e0] ss:$28 sps:$4 sm:$0xff]   ;;  %v8178_v24 = vld [vmem:[#allocation9 + $0xc0c] ss:$28 sps:$4 sm:$0xff]  }
 0x5f2   :  { %6192 = vmatprep.subr.bf16.mxu1 %v8109_v46  ;;  %v8181_v46 = vld [vmem:[#allocation9 + $0xa1c] ss:$28 sps:$4 sm:$0xff]  }
 0x5f4   :  { %6047 = vmatpush1.bf16.msra.mxu0 %v8104_v38  ;;  %v8176_v38 = vld [vmem:[#allocation9 + $0xc08] ss:$28 sps:$4 sm:$0xff]  }
 0x5f5   :  { %6193 = vmatpush1.bf16.msra.mxu1 %v8107_v33  ;;  %6048 = vmatprep.subr.bf16.mxu0 %v8112_v29  ;;  %v8179_v33 = vld [vmem:[#allocation9 + $0xa18] ss:$28 sps:$4 sm:$0xff]   ;;  %v8184_v29 = vld [vmem:[#allocation9 + $0xc44] ss:$28 sps:$4 sm:$0xff]  }
 0x5f6   :  { %6194 = vmatprep.subr.bf16.mxu1 %v8115_v63  ;;  %v8187_v63 = vld [vmem:[#allocation9 + $0xa54] ss:$28 sps:$4 sm:$0xff]  }
 0x5f8   :  { %6049 = vmatpush1.bf16.msra.mxu0 %v8110_v45  ;;  %v8182_v45 = vld [vmem:[#allocation9 + $0xc40] ss:$28 sps:$4 sm:$0xff]  }
 0x5f9   :  { %6195 = vmatpush1.bf16.msra.mxu1 %v8113_v42  ;;  %6050 = vmatprep.subr.bf16.mxu0 %v8118_v37  ;;  %v8185_v42 = vld [vmem:[#allocation9 + $0xa50] ss:$28 sps:$4 sm:$0xff]   ;;  %v8190_v37 = vld [vmem:[#allocation9 + $0xc7c] ss:$28 sps:$4 sm:$0xff]  }
 0x5fa   :  { %6196 = vmatprep.subr.bf16.mxu1 %v8121_v23  ;;  %v8193_v23 = vld [vmem:[#allocation9 + $0xa8c] ss:$28 sps:$4 sm:$0xff]  }
 0x5fc   :  { %6051 = vmatpush1.bf16.msra.mxu0 %v8116_v2  ;;  %v8188_v2 = vld [vmem:[#allocation9 + $0xc78] ss:$28 sps:$4 sm:$0xff]  }
 0x5fd   :  { %6197 = vmatpush1.bf16.msra.mxu1 %v8119_v15  ;;  %6052 = vmatprep.subr.bf16.mxu0 %v8124_v50  ;;  %v8196_v15 = vld [vmem:[#allocation9 + $0xcb4] ss:$28 sps:$4 sm:$0xff]   ;;  %v8199_v50 = vld [vmem:[#allocation9 + $0xac4] ss:$28 sps:$4 sm:$0xff]  }
 0x5fe   :  { %6198 = vmatprep.subr.bf16.mxu1 %v8127_v58  ;;  %v8194_v58 = vld [vmem:[#allocation9 + $0xcb0] ss:$28 sps:$4 sm:$0xff]  }
 0x600   :  { %6053 = vmatpush1.bf16.msra.mxu0 %v8122_v13  ;;  %v8197_v13 = vld [vmem:[#allocation9 + $0xac0] ss:$28 sps:$4 sm:$0xff]  }
 0x601   :  { %6199 = vmatpush1.bf16.msra.mxu1 %v8125_v22  ;;  %6054 = vmatprep.subr.bf16.mxu0 %v8130_v5  ;;  %v8205_v22 = vld [vmem:[#allocation9 + $0xafc] ss:$28 sps:$4 sm:$0xff]   ;;  %v8200_v5 = vld [vmem:[#allocation9 + $0xce8] ss:$28 sps:$4 sm:$0xff]  }
 0x602   :  { %6200 = vmatprep.subr.bf16.mxu1 %v8133_v27  ;;  %v8203_v27 = vld [vmem:[#allocation9 + $0xaf8] ss:$28 sps:$4 sm:$0xff]  }
 0x604   :  { %6055 = vmatpush1.bf16.msra.mxu0 %v8128_v41  ;;  %v8208_v41 = vld [vmem:[#allocation9 + $0xd24] ss:$28 sps:$4 sm:$0xff]  }
 0x605   :  { %6201 = vmatpush1.bf16.msra.mxu1 %v8131_v47  ;;  %6065 = vmatprep.subr.bf16.mxu0 %v8136_v60  ;;  %v8206_v47 = vld [vmem:[#allocation9 + $0xd20] ss:$28 sps:$4 sm:$0xff]   ;;  %v8209_v60 = vld [vmem:[#allocation9 + $0xb30] ss:$28 sps:$4 sm:$0xff]  }
 0x606   :  { %6202 = vmatprep.subr.bf16.mxu1 %v8139_v11  ;;  %v8214_v11 = vld [vmem:[#allocation9 + $0xd5c] ss:$28 sps:$4 sm:$0xff]  }
 0x607   :  { %6057 = vmatmul.mubr.bf16.vlgmr.msra.gmra.mrb[8].mxu0 %v9519_v44 }
 0x608   :  { %6066 = vmatpush1.bf16.msra.mxu0 %v8134_v14  ;;  %v8217_v14 = vld [vmem:[#allocation9 + $0xb6c] ss:$28 sps:$4 sm:$0xff]  }
 0x609   :  { %6203 = vmatpush1.bf16.msra.mxu1 %v8137_v0  ;;  %6067 = vmatprep.subr.bf16.mxu0 %v8142_v51  ;;  %v1451_v0 = vsub.s32 6, %v9708_v20  ;;  %v8212_v51 = vld [vmem:[#allocation9 + $0xd58] ss:$28 sps:$4 sm:$0xff]  }
 0x60a   :  { %6204 = vmatprep.subr.bf16.mxu1 %v8145_v61  ;;  %v1455_v61 = vsub.s32 7, %v9708_v20 }
 0x60c   :  { %6068 = vmatpush1.bf16.msra.mxu0 %v8140_v10  ;;  %v8215_v10 = vld [vmem:[#allocation9 + $0xb68] ss:$28 sps:$4 sm:$0xff]  }
 0x60d   :  { %6205 = vmatpush1.bf16.msra.mxu1 %v8143_v4  ;;  %6069 = vmatprep.subr.bf16.mxu0 %v8148_v17  ;;  %v8220_v4 = vld [vmem:[#allocation9 + $0xd94] ss:$28 sps:$4 sm:$0xff]   ;;  %v8223_v17 = vld [vmem:[#allocation9 + $0xba4] ss:$28 sps:$4 sm:$0xff]  }
 0x60e   :  { %6206 = vmatprep.subr.bf16.mxu1 %v8151_v21  ;;  %v8543_v21 = vld [vmem:[#allocation7] sm:$0xff] }
 0x610   :  { %6070 = vmatpush1.bf16.msra.mxu0 %v8146_v62  ;;  %v1452_v62 = vrot.slane %v8543_v21, %v1451_v0 }
 0x611   :  { %6207 = vmatpush1.bf16.msra.mxu1 %v8149_v39  ;;  %6071 = vmatprep.subr.bf16.mxu0 %v8154_v48  ;;  %v8218_v39 = vld [vmem:[#allocation9 + $0xd90] ss:$28 sps:$4 sm:$0xff]   ;;  %v1456_v48 = vrot.slane %v8543_v21, %v1455_v61  ;;  %v8269_v61 = vld [vmem:[#allocation9 + $0xd60] ss:$28 sps:$4 sm:$0xff]   ;;  %v8275_v21 = vld [vmem:[#allocation9 + $0xd98] ss:$28 sps:$4 sm:$0xff]  }
 0x612   :  { %6208 = vmatprep.subr.bf16.mxu1 %v8157_v26  ;;  %v8221_v26 = vld [vmem:[#allocation9 + $0xba0] ss:$28 sps:$4 sm:$0xff]  }
 0x614   :  { %6072 = vmatpush1.bf16.msra.mxu0 %v8152_v28  ;;  %v8226_v28 = vld [vmem:[#allocation9 + $0xdcc] ss:$28 sps:$4 sm:$0xff]  }
 0x615   :  { %6209 = vmatpush1.bf16.msra.mxu1 %v8155_v34  ;;  %6073 = vmatprep.subr.bf16.mxu0 %v8160_v52  ;;  %v8229_v52 = vld [vmem:[#allocation9 + $0xbdc] ss:$28 sps:$4 sm:$0xff]  }
 0x616   :  { %6210 = vmatprep.subr.bf16.mxu1 %v8163_v57 }
 0x618   :  { %6074 = vmatpush1.bf16.msra.mxu0 %v8158_v3 }
 0x619   :  { %6211 = vmatpush1.bf16.msra.mxu1 %v8161_v6  ;;  %6075 = vmatprep.subr.bf16.mxu0 %v8166_v40 }
 0x61a   :  { %6212 = vmatprep.subr.bf16.mxu1 %v8169_v19  ;;  %v8224_v19 = vld [vmem:[#allocation9 + $0xdc8] ss:$28 sps:$4 sm:$0xff]  }
 0x61c   :  { %6076 = vmatpush1.bf16.msra.mxu0 %v8164_v30 }
 0x61d   :  { %6213 = vmatpush1.bf16.msra.mxu1 %v8167_v59  ;;  %6077 = vmatprep.subr.bf16.mxu0 %v8172_v54  ;;  %v8227_v54 = vld [vmem:[#allocation9 + $0xbd8] ss:$28 sps:$4 sm:$0xff]  }
 0x61e   :  { %6214 = vmatprep.subr.bf16.mxu1 %v8175_v32  ;;  %v8232_v32 = vld [vmem:[#allocation9 + $0x14] ss:$28 sps:$4 sm:$0xff]  }
 0x620   :  { %6078 = vmatpush1.bf16.msra.mxu0 %v8170_v12 }
 0x621   :  { %6215 = vmatpush1.bf16.msra.mxu1 %v8173_v36  ;;  %6079 = vmatprep.subr.bf16.mxu0 %v8178_v24  ;;  %v8235_v36 = vld [vmem:[#allocation9 + $0xc14] ss:$28 sps:$4 sm:$0xff]  }
 0x622   :  { %6216 = vmatprep.subr.bf16.mxu1 %v8181_v46  ;;  %v8230_v46 = vld [vmem:[#allocation9 + $0x10] ss:$28 sps:$4 sm:$0xff]  }
 0x624   :  { %6080 = vmatpush1.bf16.msra.mxu0 %v8176_v38 }
 0x625   :  { %6217 = vmatpush1.bf16.msra.mxu1 %v8179_v33  ;;  %6081 = vmatprep.subr.bf16.mxu0 %v8184_v29  ;;  %v8233_v33 = vld [vmem:[#allocation9 + $0xc10] ss:$28 sps:$4 sm:$0xff]  }
 0x626   :  { %6218 = vmatprep.subr.bf16.mxu1 %v8187_v63  ;;  %v8238_v29 = vld [vmem:[#allocation9 + $0x4c] ss:$28 sps:$4 sm:$0xff]  }
 0x627   :  { %v8241_v63 = vld [vmem:[#allocation9 + $0xc4c] ss:$28 sps:$4 sm:$0xff]  }
 0x628   :  { %6082 = vmatpush1.bf16.msra.mxu0 %v8182_v45  ;;  %v8236_v45 = vld [vmem:[#allocation9 + $0x48] ss:$28 sps:$4 sm:$0xff]  }
 0x629   :  { %6219 = vmatpush1.bf16.msra.mxu1 %v8185_v42  ;;  %6083 = vmatprep.subr.bf16.mxu0 %v8190_v37  ;;  %v8239_v42 = vld [vmem:[#allocation9 + $0xc48] ss:$28 sps:$4 sm:$0xff]  }
 0x62a   :  { %6229 = vmatprep.subr.bf16.mxu1 %v8193_v23  ;;  %v8244_v37 = vld [vmem:[#allocation9 + $0x84] ss:$28 sps:$4 sm:$0xff]  }
 0x62b   :  { %v8247_v23 = vld [vmem:[#allocation9 + $0xc84] ss:$28 sps:$4 sm:$0xff]  }
 0x62c   :  { %6084 = vmatpush1.bf16.msra.mxu0 %v8188_v2  ;;  %6221 = vmatmul.mubr.bf16.vlgmr.msra.gmra.mrb[20].mxu1 %v9519_v44  ;;  %v8242_v2 = vld [vmem:[#allocation9 + $0x80] ss:$28 sps:$4 sm:$0xff]  }
 0x62d   :  { %6230 = vmatpush1.bf16.msra.mxu1 %v8191_v18  ;;  %6085 = vmatprep.subr.bf16.mxu0 %v8196_v15  ;;  %v8245_v18 = vld [vmem:[#allocation9 + $0xc80] ss:$28 sps:$4 sm:$0xff]  }
 0x62e   :  { %6231 = vmatprep.subr.bf16.mxu1 %v8199_v50  ;;  %v8250_v15 = vld [vmem:[#allocation9 + $0xbc] ss:$28 sps:$4 sm:$0xff]  }
 0x62f   :  { %v8253_v50 = vld [vmem:[#allocation9 + $0xcbc] ss:$28 sps:$4 sm:$0xff]  }
 0x630   :  { %6086 = vmatpush1.bf16.msra.mxu0 %v8194_v58  ;;  %v8248_v58 = vld [vmem:[#allocation9 + $0xb8] ss:$28 sps:$4 sm:$0xff]  }
 0x631   :  { %6232 = vmatpush1.bf16.msra.mxu1 %v8197_v13  ;;  %6087 = vmatprep.subr.bf16.mxu0 %v8202_v8  ;;  %v8251_v13 = vld [vmem:[#allocation9 + $0xcb8] ss:$28 sps:$4 sm:$0xff]  }
 0x632   :  { %6233 = vmatprep.subr.bf16.mxu1 %v8205_v22  ;;  %v8256_v8 = vld [vmem:[#allocation9 + $0xf4] ss:$28 sps:$4 sm:$0xff]  }
 0x633   :  { %v8259_v22 = vld [vmem:[#allocation9 + $0xcf4] ss:$28 sps:$4 sm:$0xff]  }
 0x634   :  { %6088 = vmatpush1.bf16.msra.mxu0 %v8200_v5  ;;  %v8254_v5 = vld [vmem:[#allocation9 + $0xf0] ss:$28 sps:$4 sm:$0xff]  }
 0x635   :  { %6234 = vmatpush1.bf16.msra.mxu1 %v8203_v27  ;;  %6089 = vmatprep.subr.bf16.mxu0 %v8208_v41  ;;  %v8257_v27 = vld [vmem:[#allocation9 + $0xcf0] ss:$28 sps:$4 sm:$0xff]  }
 0x636   :  { %6235 = vmatprep.subr.bf16.mxu1 %v8211_v43  ;;  %v8262_v41 = vld [vmem:[#allocation9 + $0x12c] ss:$28 sps:$4 sm:$0xff]  }
 0x637   :  { %v8265_v43 = vld [vmem:[#allocation9 + $0xd2c] ss:$28 sps:$4 sm:$0xff]  }
 0x638   :  { %6090 = vmatpush1.bf16.msra.mxu0 %v8206_v47  ;;  %v8260_v47 = vld [vmem:[#allocation9 + $0x128] ss:$28 sps:$4 sm:$0xff]  }
 0x639   :  { %6236 = vmatpush1.bf16.msra.mxu1 %v8209_v60  ;;  %6091 = vmatprep.subr.bf16.mxu0 %v8214_v11  ;;  %v8263_v60 = vld [vmem:[#allocation9 + $0xd28] ss:$28 sps:$4 sm:$0xff]  }
 0x63a   :  { %6237 = vmatprep.subr.bf16.mxu1 %v8217_v14  ;;  %v8268_v11 = vld [vmem:[#allocation9 + $0x164] ss:$28 sps:$4 sm:$0xff]  }
 0x63b   :  { %v8271_v14 = vld [vmem:[#allocation9 + $0xd64] ss:$28 sps:$4 sm:$0xff]  }
 0x63c   :  { %6092 = vmatpush1.bf16.msra.mxu0 %v8212_v51  ;;  %v8266_v51 = vld [vmem:[#allocation9 + $0x160] ss:$28 sps:$4 sm:$0xff]  }
 0x63d   :  { %6238 = vmatpush1.bf16.msra.mxu1 %v8215_v10  ;;  %6093 = vmatprep.subr.bf16.mxu0 %v8220_v4  ;;  %v8274_v10 = vld [vmem:[#allocation9 + $0x19c] ss:$28 sps:$4 sm:$0xff]  }
 0x63e   :  { %v3066_v34 = vpop.f32.mrb[16].mxu1  ;;  %6239 = vmatprep.subr.bf16.mxu1 %v8223_v17  ;;  %v8277_v4 = vld [vmem:[#allocation9 + $0xd9c] ss:$28 sps:$4 sm:$0xff]  }
 0x63f   :  { %v7729_v57 = vadd.f32 %v3066_v34, %v1452_v62  ;;  %v3068_v3 = vpop.f32.mrb[17].mxu1  ;;  %v8272_v17 = vld [vmem:[#allocation9 + $0x198] ss:$28 sps:$4 sm:$0xff]  }
 0x640   :  { %v7730_v6 = vadd.f32 %v3068_v3, %v1456_v48  ;;  %6094 = vmatpush1.bf16.msra.mxu0 %v8218_v39  ;;  %v3070_v40 = vpop.f32.mrb[18].mxu1  ;;  %v8280_v62 = vld [vmem:[#allocation9 + $0x1d4] ss:$28 sps:$4 sm:$0xff]   ;;  %v8291_v3 = vld [vmem:[#allocation9 + $0x244] ss:$28 sps:$4 sm:$0xff]  }
 0x641   :  { %v3079_v30 = vmax.f32 %v7729_v57, 0.0  ;;  %6240 = vmatpush1.bf16.msra.mxu1 %v8221_v26  ;;  %v3071_v59 = vpop.f32.mrb[19].mxu1  ;;  %6095 = vmatprep.subr.bf16.mxu0 %v8226_v28  ;;  %v8283_v39 = vld [vmem:[#allocation9 + $0xdd4] ss:$28 sps:$4 sm:$0xff]   ;;  %v8286_v28 = vld [vmem:[#allocation9 + $0x20c] ss:$28 sps:$4 sm:$0xff]  }
 0x642   :  { %v3080_v12 = vmax.f32 %v7730_v6, 0.0  ;;  %6241 = vmatprep.subr.bf16.mxu1 %v8229_v52  ;;  %v8278_v48 = vld [vmem:[#allocation9 + $0x1d0] ss:$28 sps:$4 sm:$0xff]   ;;  %v8287_v34 = vld [vmem:[#allocation9 + $0x1d8] ss:$28 sps:$4 sm:$0xff]  }
 0x643   :  { %v9529_v38 = vpack.c.bf16 %v3079_v30, %v3079_v30  ;;  %v8281_v26 = vld [vmem:[#allocation9 + $0xdd0] ss:$28 sps:$4 sm:$0xff]   ;;  %v8284_v52 = vld [vmem:[#allocation9 + $0x208] ss:$28 sps:$4 sm:$0xff]   ;;  %v8288_v57 = vld [vmem:[#allocation9 + $0x18] ss:$28 sps:$4 sm:$0xff]  }
 0x644   :  { %v9527_v24 = vpack.c.bf16 %v3080_v12, %v3080_v12  ;;  %6096 = vmatpush1.bf16.msra.mxu0 %v8224_v19  ;;  %v8292_v6 = vld [vmem:[#allocation9 + $0x210] ss:$28 sps:$4 sm:$0xff]   ;;  %v8289_v40 = vld [vmem:[#allocation9 + $0x240] ss:$28 sps:$4 sm:$0xff]   ;;  %v8297_v59 = vld [vmem:[#allocation9 + $0x248] ss:$28 sps:$4 sm:$0xff]  }
 0x645   :  { %6242 = vmatpush1.bf16.msra.mxu1 %v8227_v54  ;;  %6270 = vmatprep.subr.bf16.mxu0 %v8232_v32  ;;  %v8293_v19 = vld [vmem:[#allocation9 + $0x50] ss:$28 sps:$4 sm:$0xff]   ;;  %v8296_v30 = vld [vmem:[#allocation9 + $0x27c] ss:$28 sps:$4 sm:$0xff]   ;;  %v8298_v32 = vld [vmem:[#allocation9 + $0x88] ss:$28 sps:$4 sm:$0xff]  }
 0x646   :  { %6097 = vmatprep.mubr.bf16.mxu0 %v9527_v24  ;;  %6261 = vmatprep.mubr.bf16.mxu1 %v9527_v24  ;;  %v8294_v54 = vld [vmem:[#allocation9 + $0x278] ss:$28 sps:$4 sm:$0xff]  }
 0x647   :  { %6098 = vmatmul.mubr.bf16.vlgmr.msra.gmra.mrb[8].mxu0 %v9529_v38  ;;  %6243 = vmatprep.subr.bf16.mxu1 %v8235_v36  ;;  %v8301_v12 = vld [vmem:[#allocation9 + $0x2b4] ss:$28 sps:$4 sm:$0xff]   ;;  %v8302_v36 = vld [vmem:[#allocation9 + $0x280] ss:$28 sps:$4 sm:$0xff]  }
 0x648   :  { %6271 = vmatpush1.bf16.msra.mxu0 %v8230_v46  ;;  %6302 = vmatprep.mubr.bf16.mxu0 %v9484_v7  ;;  %v8299_v46 = vld [vmem:[#allocation9 + $0x2b0] ss:$28 sps:$4 sm:$0xff]  }
 0x649   :  { %6244 = vmatpush1.bf16.msra.mxu1 %v8233_v33  ;;  %6272 = vmatprep.subr.bf16.mxu0 %v8238_v29  ;;  %v8303_v33 = vld [vmem:[#allocation9 + $0xc0] ss:$28 sps:$4 sm:$0xff]   ;;  %v8306_v29 = vld [vmem:[#allocation9 + $0x2ec] ss:$28 sps:$4 sm:$0xff]  }
 0x64a   :  { %6245 = vmatprep.subr.bf16.mxu1 %v8241_v63  ;;  %v8304_v63 = vld [vmem:[#allocation9 + $0x2e8] ss:$28 sps:$4 sm:$0xff]  }
 0x64c   :  { %6273 = vmatpush1.bf16.msra.mxu0 %v8236_v45  ;;  %v8308_v45 = vld [vmem:[#allocation9 + $0xf8] ss:$28 sps:$4 sm:$0xff]  }
 0x64d   :  { %6246 = vmatpush1.bf16.msra.mxu1 %v8239_v42  ;;  %6274 = vmatprep.subr.bf16.mxu0 %v8244_v37  ;;  %v8311_v42 = vld [vmem:[#allocation9 + $0x324] ss:$28 sps:$4 sm:$0xff]   ;;  %v8312_v37 = vld [vmem:[#allocation9 + $0x2f0] ss:$28 sps:$4 sm:$0xff]  }
 0x64e   :  { %6247 = vmatprep.subr.bf16.mxu1 %v8247_v23  ;;  %v8309_v23 = vld [vmem:[#allocation9 + $0x320] ss:$28 sps:$4 sm:$0xff]  }
 0x650   :  { %6275 = vmatpush1.bf16.msra.mxu0 %v8242_v2  ;;  %v8313_v2 = vld [vmem:[#allocation9 + $0x130] ss:$28 sps:$4 sm:$0xff]  }
 0x651   :  { %6248 = vmatpush1.bf16.msra.mxu1 %v8245_v18  ;;  %6276 = vmatprep.subr.bf16.mxu0 %v8250_v15  ;;  %v8316_v18 = vld [vmem:[#allocation9 + $0x35c] ss:$28 sps:$4 sm:$0xff]   ;;  %v8317_v15 = vld [vmem:[#allocation9 + $0x328] ss:$28 sps:$4 sm:$0xff]  }
 0x652   :  { %6249 = vmatprep.subr.bf16.mxu1 %v8253_v50  ;;  %v8314_v50 = vld [vmem:[#allocation9 + $0x358] ss:$28 sps:$4 sm:$0xff]  }
 0x654   :  { %6277 = vmatpush1.bf16.msra.mxu0 %v8248_v58  ;;  %v8318_v58 = vld [vmem:[#allocation9 + $0x168] ss:$28 sps:$4 sm:$0xff]  }
 0x655   :  { %6250 = vmatpush1.bf16.msra.mxu1 %v8251_v13  ;;  %6278 = vmatprep.subr.bf16.mxu0 %v8256_v8  ;;  %v8321_v13 = vld [vmem:[#allocation9 + $0x394] ss:$28 sps:$4 sm:$0xff]   ;;  %v8322_v8 = vld [vmem:[#allocation9 + $0x360] ss:$28 sps:$4 sm:$0xff]  }
 0x656   :  { %6251 = vmatprep.subr.bf16.mxu1 %v8259_v22  ;;  %v8319_v22 = vld [vmem:[#allocation9 + $0x390] ss:$28 sps:$4 sm:$0xff]  }
 0x658   :  { %6279 = vmatpush1.bf16.msra.mxu0 %v8254_v5  ;;  %v8323_v5 = vld [vmem:[#allocation9 + $0x1a0] ss:$28 sps:$4 sm:$0xff]  }
 0x659   :  { %6252 = vmatpush1.bf16.msra.mxu1 %v8257_v27  ;;  %6280 = vmatprep.subr.bf16.mxu0 %v8262_v41  ;;  %v8326_v27 = vld [vmem:[#allocation9 + $0x3cc] ss:$28 sps:$4 sm:$0xff]   ;;  %v8327_v41 = vld [vmem:[#allocation9 + $0x558] ss:$28 sps:$4 sm:$0xff]  }
 0x65a   :  { %6253 = vmatprep.subr.bf16.mxu1 %v8265_v43  ;;  %v8324_v43 = vld [vmem:[#allocation9 + $0x3c8] ss:$28 sps:$4 sm:$0xff]  }
 0x65c   :  { %6281 = vmatpush1.bf16.msra.mxu0 %v8260_v47  ;;  %v8328_v47 = vld [vmem:[#allocation9 + $0x398] ss:$28 sps:$4 sm:$0xff]  }
 0x65d   :  { %6254 = vmatpush1.bf16.msra.mxu1 %v8263_v60  ;;  %6282 = vmatprep.subr.bf16.mxu0 %v8268_v11  ;;  %v8331_v60 = vld [vmem:[#allocation9 + $0x404] ss:$28 sps:$4 sm:$0xff]   ;;  %v8332_v11 = vld [vmem:[#allocation9 + $0x590] ss:$28 sps:$4 sm:$0xff]  }
 0x65e   :  { %6255 = vmatprep.subr.bf16.mxu1 %v8271_v14  ;;  %v8329_v14 = vld [vmem:[#allocation9 + $0x400] ss:$28 sps:$4 sm:$0xff]  }
 0x660   :  { %6283 = vmatpush1.bf16.msra.mxu0 %v8266_v51  ;;  %v8333_v51 = vld [vmem:[#allocation9 + $0x3d0] ss:$28 sps:$4 sm:$0xff]  }
 0x661   :  { %6256 = vmatpush1.bf16.msra.mxu1 %v8269_v61  ;;  %6284 = vmatprep.subr.bf16.mxu0 %v8274_v10  ;;  %v8336_v61 = vld [vmem:[#allocation9 + $0x43c] ss:$28 sps:$4 sm:$0xff]   ;;  %v8337_v10 = vld [vmem:[#allocation9 + $0x5c8] ss:$28 sps:$4 sm:$0xff]  }
 0x662   :  { %6257 = vmatprep.subr.bf16.mxu1 %v8277_v4  ;;  %v8334_v4 = vld [vmem:[#allocation9 + $0x438] ss:$28 sps:$4 sm:$0xff]  }
 0x664   :  { %6285 = vmatpush1.bf16.msra.mxu0 %v8272_v17  ;;  %v8338_v17 = vld [vmem:[#allocation9 + $0x408] ss:$28 sps:$4 sm:$0xff]  }
 0x665   :  { %6258 = vmatpush1.bf16.msra.mxu1 %v8275_v21  ;;  %6286 = vmatprep.subr.bf16.mxu0 %v8280_v62  ;;  %v8341_v21 = vld [vmem:[#allocation9 + $0x474] ss:$28 sps:$4 sm:$0xff]   ;;  %v8342_v62 = vld [vmem:[#allocation9 + $0x600] ss:$28 sps:$4 sm:$0xff]  }
 0x666   :  { %6259 = vmatprep.subr.bf16.mxu1 %v8283_v39  ;;  %v8339_v39 = vld [vmem:[#allocation9 + $0x470] ss:$28 sps:$4 sm:$0xff]  }
 0x668   :  { %6287 = vmatpush1.bf16.msra.mxu0 %v8278_v48  ;;  %v8346_v48 = vld [vmem:[#allocation9 + $0x4ac] ss:$28 sps:$4 sm:$0xff]  }
 0x669   :  { %6260 = vmatpush1.bf16.msra.mxu1 %v8281_v26  ;;  %6288 = vmatprep.subr.bf16.mxu0 %v8286_v28  ;;  %v8344_v26 = vld [vmem:[#allocation9 + $0x4a8] ss:$28 sps:$4 sm:$0xff]   ;;  %v8348_v28 = vld [vmem:[#allocation9 + $0x478] ss:$28 sps:$4 sm:$0xff]  }
 0x66a   :  { %7455 = vmatprep.subr.bf16.mxu1 %v8287_v34  ;;  %v8351_v34 = vld [vmem:[#allocation9 + $0x4e4] ss:$28 sps:$4 sm:$0xff]  }
 0x66c   :  { %6262 = vmatmul.mubr.bf16.vlgmr.msra.gmra.mrb[20].mxu1 %v9529_v38  ;;  %6289 = vmatpush1.bf16.msra.mxu0 %v8284_v52  ;;  %v8352_v52 = vld [vmem:[#allocation9 + $0x670] ss:$28 sps:$4 sm:$0xff]  }
 0x66d   :  { %7456 = vmatpush3.bf16.msra.mxu1 %v8288_v57  ;;  %6466 = vmatprep.mubr.bf16.mxu1 %v9484_v7  ;;  %v8307_v7 = vld [vmem:[#allocation9 + $0x2b8] ss:$28 sps:$4 sm:$0xff]   ;;  %v8349_v57 = vld [vmem:[#allocation9 + $0x4e0] ss:$28 sps:$4 sm:$0xff]  }
 0x66e   :  { %6290 = vmatprep.subr.bf16.mxu0 %v8291_v3  ;;  %7457 = vmatprep.subr.bf16.mxu1 %v8292_v6  ;;  %v8353_v3 = vld [vmem:[#allocation9 + $0x4b0] ss:$28 sps:$4 sm:$0xff]   ;;  %v8356_v6 = vld [vmem:[#allocation9 + $0x51c] ss:$28 sps:$4 sm:$0xff]  }
 0x670   :  { %6291 = vmatpush1.bf16.msra.mxu0 %v8289_v40  ;;  %v8357_v40 = vld [vmem:[#allocation9 + $0x6a8] ss:$28 sps:$4 sm:$0xff]  }
 0x671   :  { %7458 = vmatpush3.bf16.msra.mxu1 %v8293_v19  ;;  %6292 = vmatprep.subr.bf16.mxu0 %v8296_v30  ;;  %v8354_v19 = vld [vmem:[#allocation9 + $0x518] ss:$28 sps:$4 sm:$0xff]   ;;  %v8358_v30 = vld [vmem:[#allocation9 + $0x4e8] ss:$28 sps:$4 sm:$0xff]  }
 0x672   :  { %7459 = vmatprep.subr.bf16.mxu1 %v8297_v59  ;;  %v8361_v59 = vld [vmem:[#allocation9 + $0x554] ss:$28 sps:$4 sm:$0xff]  }
 0x674   :  { %6293 = vmatpush1.bf16.msra.mxu0 %v8294_v54  ;;  %v8362_v54 = vld [vmem:[#allocation9 + $0x6e0] ss:$28 sps:$4 sm:$0xff]  }
 0x675   :  { %7460 = vmatpush3.bf16.msra.mxu1 %v8298_v32  ;;  %6294 = vmatprep.subr.bf16.mxu0 %v8301_v12  ;;  %v8359_v32 = vld [vmem:[#allocation9 + $0x550] ss:$28 sps:$4 sm:$0xff]   ;;  %v8363_v12 = vld [vmem:[#allocation9 + $0x520] ss:$28 sps:$4 sm:$0xff]  }
 0x676   :  { %7461 = vmatprep.subr.bf16.mxu1 %v8302_v36  ;;  %v8366_v36 = vld [vmem:[#allocation9 + $0x58c] ss:$28 sps:$4 sm:$0xff]  }
 0x678   :  { %6295 = vmatpush1.bf16.msra.mxu0 %v8299_v46  ;;  %v8367_v46 = vld [vmem:[#allocation9 + $0x8d8] ss:$28 sps:$4 sm:$0xff]  }
 0x679   :  { %7462 = vmatpush3.bf16.msra.mxu1 %v8303_v33  ;;  %6296 = vmatprep.subr.bf16.mxu0 %v8306_v29  ;;  %v8364_v33 = vld [vmem:[#allocation9 + $0x588] ss:$28 sps:$4 sm:$0xff]   ;;  %v8368_v29 = vld [vmem:[#allocation9 + $0x718] ss:$28 sps:$4 sm:$0xff]  }
 0x67a   :  { %7463 = vmatprep.subr.bf16.mxu1 %v8307_v7  ;;  %v8371_v7 = vld [vmem:[#allocation9 + $0x5c4] ss:$28 sps:$4 sm:$0xff]  }
 0x67c   :  { %6297 = vmatpush1.bf16.msra.mxu0 %v8304_v63  ;;  %v8372_v63 = vld [vmem:[#allocation9 + $0x910] ss:$28 sps:$4 sm:$0xff]  }
 0x67d   :  { %7464 = vmatpush3.bf16.msra.mxu1 %v8308_v45  ;;  %6298 = vmatprep.subr.bf16.mxu0 %v8311_v42  ;;  %v8369_v45 = vld [vmem:[#allocation9 + $0x5c0] ss:$28 sps:$4 sm:$0xff]   ;;  %v8373_v42 = vld [vmem:[#allocation9 + $0x750] ss:$28 sps:$4 sm:$0xff]  }
 0x67e   :  { %7465 = vmatprep.subr.bf16.mxu1 %v8312_v37  ;;  %v8376_v37 = vld [vmem:[#allocation9 + $0x5fc] ss:$28 sps:$4 sm:$0xff]  }
 0x680   :  { %6299 = vmatpush1.bf16.msra.mxu0 %v8309_v23  ;;  %v8377_v23 = vld [vmem:[#allocation9 + $0x948] ss:$28 sps:$4 sm:$0xff]  }
 0x681   :  { %7466 = vmatpush3.bf16.msra.mxu1 %v8313_v2  ;;  %6300 = vmatprep.subr.bf16.mxu0 %v8316_v18  ;;  %v8374_v2 = vld [vmem:[#allocation9 + $0x5f8] ss:$28 sps:$4 sm:$0xff]   ;;  %v8378_v18 = vld [vmem:[#allocation9 + $0x788] ss:$28 sps:$4 sm:$0xff]  }
 0x682   :  { %7467 = vmatprep.subr.bf16.mxu1 %v8317_v15  ;;  %v8381_v15 = vld [vmem:[#allocation9 + $0x634] ss:$28 sps:$4 sm:$0xff]  }
 0x684   :  { %6301 = vmatpush1.bf16.msra.mxu0 %v8314_v50  ;;  %v8382_v50 = vld [vmem:[#allocation9 + $0x980] ss:$28 sps:$4 sm:$0xff]  }
 0x685   :  { %7468 = vmatpush3.bf16.msra.mxu1 %v8318_v58  ;;  %6311 = vmatprep.subr.bf16.mxu0 %v8321_v13  ;;  %v8379_v58 = vld [vmem:[#allocation9 + $0x630] ss:$28 sps:$4 sm:$0xff]   ;;  %v8383_v13 = vld [vmem:[#allocation9 + $0x7c0] ss:$28 sps:$4 sm:$0xff]  }
 0x686   :  { %7469 = vmatprep.subr.bf16.mxu1 %v8322_v8  ;;  %v8386_v8 = vld [vmem:[#allocation9 + $0x66c] ss:$28 sps:$4 sm:$0xff]  }
 0x687   :  { %6303 = vmatmul.mubr.bf16.vlgmr.msra.gmra.mrb[12].mxu0 %v9486_v56 }
 0x688   :  { %6312 = vmatpush1.bf16.msra.mxu0 %v8319_v22  ;;  %6343 = vmatprep.mubr.bf16.mxu0 %v9502_v53  ;;  %v8387_v22 = vld [vmem:[#allocation9 + $0x9b8] ss:$28 sps:$4 sm:$0xff]  }
 0x689   :  { %7470 = vmatpush3.bf16.msra.mxu1 %v8323_v5  ;;  %6313 = vmatprep.subr.bf16.mxu0 %v8326_v27  ;;  %v8384_v5 = vld [vmem:[#allocation9 + $0x668] ss:$28 sps:$4 sm:$0xff]   ;;  %v8388_v27 = vld [vmem:[#allocation9 + $0x7f8] ss:$28 sps:$4 sm:$0xff]  }
 0x68a   :  { %7477 = vmatprep.subr.bf16.mxu1 %v8327_v41  ;;  %v8391_v41 = vld [vmem:[#allocation9 + $0x6a4] ss:$28 sps:$4 sm:$0xff]  }
 0x68c   :  { %6314 = vmatpush1.bf16.msra.mxu0 %v8324_v43  ;;  %6467 = vmatmul.mubr.bf16.vlgmr.msra.gmra.mrb[24].mxu1 %v9486_v56  ;;  %v8343_v56 = vld [vmem:[#allocation9 + $0x440] ss:$28 sps:$4 sm:$0xff]   ;;  %v8392_v43 = vld [vmem:[#allocation9 + $0x9f0] ss:$28 sps:$4 sm:$0xff]  }
 0x68d   :  { %7478 = vmatpush3.bf16.msra.mxu1 %v8328_v47  ;;  %6506 = vmatprep.mubr.bf16.mxu1 %v9502_v53  ;;  %v8347_v53 = vld [vmem:[#allocation9 + $0x638] ss:$28 sps:$4 sm:$0xff]   ;;  %v8389_v47 = vld [vmem:[#allocation9 + $0x6a0] ss:$28 sps:$4 sm:$0xff]  }
 0x68e   :  { %6315 = vmatprep.subr.bf16.mxu0 %v8331_v60  ;;  %7479 = vmatprep.subr.bf16.mxu1 %v8332_v11  ;;  %v8393_v60 = vld [vmem:[#allocation9 + $0x830] ss:$28 sps:$4 sm:$0xff]   ;;  %v8396_v11 = vld [vmem:[#allocation9 + $0x6dc] ss:$28 sps:$4 sm:$0xff]  }
 0x690   :  { %6316 = vmatpush1.bf16.msra.mxu0 %v8329_v14  ;;  %v8397_v14 = vld [vmem:[#allocation9 + $0xa28] ss:$28 sps:$4 sm:$0xff]  }
 0x691   :  { %7480 = vmatpush3.bf16.msra.mxu1 %v8333_v51  ;;  %6317 = vmatprep.subr.bf16.mxu0 %v8336_v61  ;;  %v8394_v51 = vld [vmem:[#allocation9 + $0x6d8] ss:$28 sps:$4 sm:$0xff]   ;;  %v8398_v61 = vld [vmem:[#allocation9 + $0x868] ss:$28 sps:$4 sm:$0xff]  }
 0x692   :  { %7481 = vmatprep.subr.bf16.mxu1 %v8337_v10  ;;  %v8401_v10 = vld [vmem:[#allocation9 + $0x714] ss:$28 sps:$4 sm:$0xff]  }
 0x694   :  { %6318 = vmatpush1.bf16.msra.mxu0 %v8334_v4  ;;  %v8402_v4 = vld [vmem:[#allocation9 + $0xa60] ss:$28 sps:$4 sm:$0xff]  }
 0x695   :  { %7482 = vmatpush3.bf16.msra.mxu1 %v8338_v17  ;;  %6319 = vmatprep.subr.bf16.mxu0 %v8341_v21  ;;  %v8399_v17 = vld [vmem:[#allocation9 + $0x710] ss:$28 sps:$4 sm:$0xff]   ;;  %v8403_v21 = vld [vmem:[#allocation9 + $0x8a0] ss:$28 sps:$4 sm:$0xff]  }
 0x696   :  { %7483 = vmatprep.subr.bf16.mxu1 %v8342_v62  ;;  %v8406_v62 = vld [vmem:[#allocation9 + $0x74c] ss:$28 sps:$4 sm:$0xff]  }
 0x698   :  { %6320 = vmatpush1.bf16.msra.mxu0 %v8339_v39  ;;  %v8407_v39 = vld [vmem:[#allocation9 + $0xc58] ss:$28 sps:$4 sm:$0xff]  }
 0x699   :  { %7484 = vmatpush3.bf16.msra.mxu1 %v8343_v56  ;;  %6321 = vmatprep.subr.bf16.mxu0 %v8346_v48  ;;  %v8404_v56 = vld [vmem:[#allocation9 + $0x748] ss:$28 sps:$4 sm:$0xff]   ;;  %v8408_v48 = vld [vmem:[#allocation9 + $0xa98] ss:$28 sps:$4 sm:$0xff]  }
 0x69a   :  { %7485 = vmatprep.subr.bf16.mxu1 %v8347_v53  ;;  %v8411_v53 = vld [vmem:[#allocation9 + $0x784] ss:$28 sps:$4 sm:$0xff]  }
 0x69c   :  { %6322 = vmatpush1.bf16.msra.mxu0 %v8344_v26  ;;  %v8412_v26 = vld [vmem:[#allocation9 + $0xc90] ss:$28 sps:$4 sm:$0xff]  }
 0x69d   :  { %7486 = vmatpush3.bf16.msra.mxu1 %v8348_v28  ;;  %6323 = vmatprep.subr.bf16.mxu0 %v8351_v34  ;;  %v8409_v28 = vld [vmem:[#allocation9 + $0x780] ss:$28 sps:$4 sm:$0xff]   ;;  %v8413_v34 = vld [vmem:[#allocation9 + $0xad0] ss:$28 sps:$4 sm:$0xff]  }
 0x69e   :  { %7487 = vmatprep.subr.bf16.mxu1 %v8352_v52  ;;  %v8416_v52 = vld [vmem:[#allocation9 + $0x7bc] ss:$28 sps:$4 sm:$0xff]  }
 0x6a0   :  { %6324 = vmatpush1.bf16.msra.mxu0 %v8349_v57  ;;  %v8418_v57 = vld [vmem:[#allocation9 + $0xb08] ss:$28 sps:$4 sm:$0xff]  }
 0x6a1   :  { %7488 = vmatpush3.bf16.msra.mxu1 %v8353_v3  ;;  %6325 = vmatprep.subr.bf16.mxu0 %v8356_v6  ;;  %v8421_v3 = vld [vmem:[#allocation9 + $0x7f4] ss:$28 sps:$4 sm:$0xff]   ;;  %v8422_v6 = vld [vmem:[#allocation9 + $0xd00] ss:$28 sps:$4 sm:$0xff]  }
 0x6a2   :  { %7489 = vmatprep.subr.bf16.mxu1 %v8357_v40  ;;  %v8419_v40 = vld [vmem:[#allocation9 + $0x7f0] ss:$28 sps:$4 sm:$0xff]  }
 0x6a4   :  { %6326 = vmatpush1.bf16.msra.mxu0 %v8354_v19  ;;  %v8423_v19 = vld [vmem:[#allocation9 + $0xb40] ss:$28 sps:$4 sm:$0xff]  }
 0x6a5   :  { %7490 = vmatpush3.bf16.msra.mxu1 %v8358_v30  ;;  %6327 = vmatprep.subr.bf16.mxu0 %v8361_v59  ;;  %v8426_v30 = vld [vmem:[#allocation9 + $0x82c] ss:$28 sps:$4 sm:$0xff]   ;;  %v8427_v59 = vld [vmem:[#allocation9 + $0xd38] ss:$28 sps:$4 sm:$0xff]  }
 0x6a6   :  { %7491 = vmatprep.subr.bf16.mxu1 %v8362_v54  ;;  %v8424_v54 = vld [vmem:[#allocation9 + $0x828] ss:$28 sps:$4 sm:$0xff]  }
 0x6a8   :  { %6328 = vmatpush1.bf16.msra.mxu0 %v8359_v32  ;;  %v8428_v32 = vld [vmem:[#allocation9 + $0xb78] ss:$28 sps:$4 sm:$0xff]  }
 0x6a9   :  { %7492 = vmatpush3.bf16.msra.mxu1 %v8363_v12  ;;  %6329 = vmatprep.subr.bf16.mxu0 %v8366_v36  ;;  %v8431_v12 = vld [vmem:[#allocation9 + $0x864] ss:$28 sps:$4 sm:$0xff]   ;;  %v8432_v36 = vld [vmem:[#allocation9 + $0xd70] ss:$28 sps:$4 sm:$0xff]  }
 0x6aa   :  { %7499 = vmatprep.subr.bf16.mxu1 %v8367_v46  ;;  %v8429_v46 = vld [vmem:[#allocation9 + $0x860] ss:$28 sps:$4 sm:$0xff]  }
 0x6ac   :  { %6330 = vmatpush1.bf16.msra.mxu0 %v8364_v33  ;;  %6507 = vmatmul.mubr.bf16.vlgmr.msra.gmra.mrb[28].mxu1 %v9504_v31  ;;  %v8433_v33 = vld [vmem:[#allocation9 + $0xbb0] ss:$28 sps:$4 sm:$0xff]  }
 0x6ad   :  { %7500 = vmatpush3.bf16.msra.mxu1 %v8368_v29  ;;  %6546 = vmatprep.mubr.bf16.mxu1 %v9506_v16  ;;  %v8436_v29 = vld [vmem:[#allocation9 + $0x89c] ss:$28 sps:$4 sm:$0xff]  }
 0x6ae   :  { %6331 = vmatprep.subr.bf16.mxu0 %v8371_v7  ;;  %7501 = vmatprep.subr.bf16.mxu1 %v8372_v63  ;;  %v8437_v7 = vld [vmem:[#allocation9 + $0xda8] ss:$28 sps:$4 sm:$0xff]   ;;  %v8434_v63 = vld [vmem:[#allocation9 + $0x898] ss:$28 sps:$4 sm:$0xff]  }
 0x6b0   :  { %6332 = vmatpush1.bf16.msra.mxu0 %v8369_v45  ;;  %v8438_v45 = vld [vmem:[#allocation9 + $0xbe8] ss:$28 sps:$4 sm:$0xff]  }
 0x6b1   :  { %7502 = vmatpush3.bf16.msra.mxu1 %v8373_v42  ;;  %6333 = vmatprep.subr.bf16.mxu0 %v8376_v37  ;;  %v8441_v42 = vld [vmem:[#allocation9 + $0x8d4] ss:$28 sps:$4 sm:$0xff]   ;;  %v8442_v37 = vld [vmem:[#allocation9 + $0xde0] ss:$28 sps:$4 sm:$0xff]  }
 0x6b2   :  { %7503 = vmatprep.subr.bf16.mxu1 %v8377_v23  ;;  %v8439_v23 = vld [vmem:[#allocation9 + $0x8d0] ss:$28 sps:$4 sm:$0xff]  }
 0x6b4   :  { %6334 = vmatpush1.bf16.msra.mxu0 %v8374_v2  ;;  %v8443_v2 = vld [vmem:[#allocation9 + $0xc20] ss:$28 sps:$4 sm:$0xff]  }
 0x6b5   :  { %7504 = vmatpush3.bf16.msra.mxu1 %v8378_v18  ;;  %6335 = vmatprep.subr.bf16.mxu0 %v8381_v15  ;;  %v8446_v18 = vld [vmem:[#allocation9 + $0x90c] ss:$28 sps:$4 sm:$0xff]  }
 0x6b6   :  { %7505 = vmatprep.subr.bf16.mxu1 %v8382_v50  ;;  %v8444_v15 = vld [vmem:[#allocation9 + $0x908] ss:$28 sps:$4 sm:$0xff]  }
 0x6b7   :  { %v8449_v50 = vld [vmem:[#allocation9 + $0x944] ss:$28 sps:$4 sm:$0xff]  }
 0x6b8   :  { %6336 = vmatpush1.bf16.msra.mxu0 %v8379_v58  ;;  %v8447_v58 = vld [vmem:[#allocation9 + $0x940] ss:$28 sps:$4 sm:$0xff]  }
 0x6b9   :  { %7506 = vmatpush3.bf16.msra.mxu1 %v8383_v13  ;;  %6337 = vmatprep.subr.bf16.mxu0 %v8386_v8  ;;  %v8452_v13 = vld [vmem:[#allocation9 + $0x97c] ss:$28 sps:$4 sm:$0xff]  }
 0x6ba   :  { %7507 = vmatprep.subr.bf16.mxu1 %v8387_v22  ;;  %v8450_v8 = vld [vmem:[#allocation9 + $0x978] ss:$28 sps:$4 sm:$0xff]  }
 0x6bb   :  { %v8455_v22 = vld [vmem:[#allocation9 + $0x9b4] ss:$28 sps:$4 sm:$0xff]  }
 0x6bc   :  { %6338 = vmatpush1.bf16.msra.mxu0 %v8384_v5  ;;  %v8453_v5 = vld [vmem:[#allocation9 + $0x9b0] ss:$28 sps:$4 sm:$0xff]  }
 0x6bd   :  { %7508 = vmatpush3.bf16.msra.mxu1 %v8388_v27  ;;  %6339 = vmatprep.subr.bf16.mxu0 %v8391_v41  ;;  %v8458_v27 = vld [vmem:[#allocation9 + $0x9ec] ss:$28 sps:$4 sm:$0xff]  }
 0x6be   :  { %7509 = vmatprep.subr.bf16.mxu1 %v8392_v43  ;;  %v8456_v41 = vld [vmem:[#allocation9 + $0x9e8] ss:$28 sps:$4 sm:$0xff]  }
 0x6bf   :  { %v8461_v43 = vld [vmem:[#allocation9 + $0xa24] ss:$28 sps:$4 sm:$0xff]  }
 0x6c0   :  { %6340 = vmatpush1.bf16.msra.mxu0 %v8389_v47  ;;  %v8459_v47 = vld [vmem:[#allocation9 + $0xa20] ss:$28 sps:$4 sm:$0xff]  }
 0x6c1   :  { %7510 = vmatpush3.bf16.msra.mxu1 %v8393_v60  ;;  %6341 = vmatprep.subr.bf16.mxu0 %v8396_v11  ;;  %v8464_v60 = vld [vmem:[#allocation9 + $0xa5c] ss:$28 sps:$4 sm:$0xff]  }
 0x6c2   :  { %7511 = vmatprep.subr.bf16.mxu1 %v8397_v14  ;;  %v8462_v11 = vld [vmem:[#allocation9 + $0xa58] ss:$28 sps:$4 sm:$0xff]  }
 0x6c3   :  { %v8467_v14 = vld [vmem:[#allocation9 + $0xa94] ss:$28 sps:$4 sm:$0xff]  }
 0x6c4   :  { %6342 = vmatpush1.bf16.msra.mxu0 %v8394_v51  ;;  %v8465_v51 = vld [vmem:[#allocation9 + $0xa90] ss:$28 sps:$4 sm:$0xff]  }
 0x6c5   :  { %7512 = vmatpush3.bf16.msra.mxu1 %v8398_v61  ;;  %6352 = vmatprep.subr.bf16.mxu0 %v8401_v10  ;;  %v8470_v61 = vld [vmem:[#allocation9 + $0xacc] ss:$28 sps:$4 sm:$0xff]  }
 0x6c6   :  { %7513 = vmatprep.subr.bf16.mxu1 %v8402_v4  ;;  %v8468_v10 = vld [vmem:[#allocation9 + $0xac8] ss:$28 sps:$4 sm:$0xff]  }
 0x6c7   :  { %6344 = vmatmul.mubr.bf16.vlgmr.msra.gmra.mrb[12].mxu0 %v9504_v31  ;;  %v8417_v31 = vld [vmem:[#allocation9 + $0xcc8] ss:$28 sps:$4 sm:$0xff]  }
 0x6c8   :  { %6353 = vmatpush1.bf16.msra.mxu0 %v8399_v17  ;;  %6384 = vmatprep.mubr.bf16.mxu0 %v9506_v16  ;;  %v8414_v16 = vld [vmem:[#allocation9 + $0x7b8] ss:$28 sps:$4 sm:$0xff]   ;;  %v8473_v4 = vld [vmem:[#allocation9 + $0xb04] ss:$28 sps:$4 sm:$0xff]  }
 0x6c9   :  { %7514 = vmatpush3.bf16.msra.mxu1 %v8403_v21  ;;  %6354 = vmatprep.subr.bf16.mxu0 %v8406_v62  ;;  %v8471_v17 = vld [vmem:[#allocation9 + $0xb00] ss:$28 sps:$4 sm:$0xff]   ;;  %v8474_v62 = vld [vmem:[#allocation9 + $0xb38] ss:$28 sps:$4 sm:$0xff]  }
 0x6ca   :  { %7521 = vmatprep.subr.bf16.mxu1 %v8407_v39  ;;  %v8476_v21 = vld [vmem:[#allocation9 + $0xb3c] ss:$28 sps:$4 sm:$0xff]   ;;  %v8479_v39 = vld [vmem:[#allocation9 + $0xb74] ss:$28 sps:$4 sm:$0xff]  }
 0x6cc   :  { %6355 = vmatpush1.bf16.msra.mxu0 %v8404_v56  ;;  %6547 = vmatmul.mubr.bf16.vlgmr.msra.gmra.mrb[32].mxu1 %v9519_v44  ;;  %v8477_v56 = vld [vmem:[#allocation9 + $0xb70] ss:$28 sps:$4 sm:$0xff]  }
 0x6cd   :  { %7522 = vmatpush3.bf16.msra.mxu1 %v8408_v48  ;;  %6586 = vmatprep.mubr.bf16.mxu1 %v9527_v24 }
 0x6ce   :  { %6356 = vmatprep.subr.bf16.mxu0 %v8411_v53  ;;  %7523 = vmatprep.subr.bf16.mxu1 %v8412_v26  ;;  %v8480_v53 = vld [vmem:[#allocation9 + $0xba8] ss:$28 sps:$4 sm:$0xff]  }
 0x6d0   :  { %6357 = vmatpush1.bf16.msra.mxu0 %v8409_v28  ;;  %v8485_v28 = vld [vmem:[#allocation9 + $0xbe4] ss:$28 sps:$4 sm:$0xff]  }
 0x6d1   :  { %7524 = vmatpush3.bf16.msra.mxu1 %v8413_v34  ;;  %6358 = vmatprep.subr.bf16.mxu0 %v8416_v52 }
 0x6d2   :  { %7525 = vmatprep.subr.bf16.mxu1 %v8417_v31 }
 0x6d4   :  { %6359 = vmatpush1.bf16.msra.mxu0 %v8414_v16 }
 0x6d5   :  { %7526 = vmatpush3.bf16.msra.mxu1 %v8418_v57  ;;  %6360 = vmatprep.subr.bf16.mxu0 %v8421_v3  ;;  %v8483_v3 = vld [vmem:[#allocation9 + $0xbe0] ss:$28 sps:$4 sm:$0xff]  }
 0x6d6   :  { %7527 = vmatprep.subr.bf16.mxu1 %v8422_v6 }
 0x6d8   :  { %6361 = vmatpush1.bf16.msra.mxu0 %v8419_v40 }
 0x6d9   :  { %7528 = vmatpush3.bf16.msra.mxu1 %v8423_v19  ;;  %6362 = vmatprep.subr.bf16.mxu0 %v8426_v30  ;;  %v8488_v19 = vld [vmem:[#allocation9 + $0xc1c] ss:$28 sps:$4 sm:$0xff]  }
 0x6da   :  { %7529 = vmatprep.subr.bf16.mxu1 %v8427_v59 }
 0x6dc   :  { %6363 = vmatpush1.bf16.msra.mxu0 %v8424_v54  ;;  %v8486_v54 = vld [vmem:[#allocation9 + $0xc18] ss:$28 sps:$4 sm:$0xff]  }
 0x6dd   :  { %7530 = vmatpush3.bf16.msra.mxu1 %v8428_v32  ;;  %6364 = vmatprep.subr.bf16.mxu0 %v8431_v12  ;;  %v8489_v32 = vld [vmem:[#allocation9 + $0xc50] ss:$28 sps:$4 sm:$0xff]  }
 0x6de   :  { %7531 = vmatprep.subr.bf16.mxu1 %v8432_v36  ;;  %v8494_v12 = vld [vmem:[#allocation9 + $0xc8c] ss:$28 sps:$4 sm:$0xff]  }
 0x6df   :  { %v8492_v36 = vld [vmem:[#allocation9 + $0xc88] ss:$28 sps:$4 sm:$0xff]  }
 0x6e0   :  { %6365 = vmatpush1.bf16.msra.mxu0 %v8429_v46  ;;  %v8497_v46 = vld [vmem:[#allocation9 + $0xcc4] ss:$28 sps:$4 sm:$0xff]  }
 0x6e1   :  { %7532 = vmatpush3.bf16.msra.mxu1 %v8433_v33  ;;  %6366 = vmatprep.subr.bf16.mxu0 %v8436_v29 }
 0x6e2   :  { %7533 = vmatprep.subr.bf16.mxu1 %v8437_v7 }
 0x6e4   :  { %6367 = vmatpush1.bf16.msra.mxu0 %v8434_v63  ;;  %v8495_v63 = vld [vmem:[#allocation9 + $0xcc0] ss:$28 sps:$4 sm:$0xff]  }
 0x6e5   :  { %7534 = vmatpush3.bf16.msra.mxu1 %v8438_v45  ;;  %6368 = vmatprep.subr.bf16.mxu0 %v8441_v42  ;;  %v8500_v42 = vld [vmem:[#allocation9 + $0xcfc] ss:$28 sps:$4 sm:$0xff]  }
 0x6e6   :  { %7535 = vmatprep.subr.bf16.mxu1 %v8442_v37  ;;  %v8498_v37 = vld [vmem:[#allocation9 + $0xcf8] ss:$28 sps:$4 sm:$0xff]  }
 0x6e8   :  { %6369 = vmatpush1.bf16.msra.mxu0 %v8439_v23  ;;  %v8503_v23 = vld [vmem:[#allocation9 + $0xd34] ss:$28 sps:$4 sm:$0xff]  }
 0x6e9   :  { %7536 = vmatpush3.bf16.msra.mxu1 %v8443_v2  ;;  %6370 = vmatprep.subr.bf16.mxu0 %v8446_v18  ;;  %v8501_v2 = vld [vmem:[#allocation9 + $0xd30] ss:$28 sps:$4 sm:$0xff]  }
 0x6ea   :  { %v8506_v18 = vld [vmem:[#allocation9 + $0xd6c] ss:$28 sps:$4 sm:$0xff]  }
 0x6ec   :  { %6371 = vmatpush1.bf16.msra.mxu0 %v8444_v15  ;;  %6587 = vmatmul.mubr.bf16.vlgmr.msra.gmra.mrb[36].mxu1 %v9529_v38 }
 0x6ed   :  { %6372 = vmatprep.subr.bf16.mxu0 %v8449_v50  ;;  %v8504_v50 = vld [vmem:[#allocation9 + $0xd68] ss:$28 sps:$4 sm:$0xff]  }
 0x6f0   :  { %6373 = vmatpush1.bf16.msra.mxu0 %v8447_v58 }
 0x6f1   :  { %6374 = vmatprep.subr.bf16.mxu0 %v8452_v13  ;;  %v8509_v13 = vld [vmem:[#allocation9 + $0xda4] ss:$28 sps:$4 sm:$0xff]  }
 0x6f4   :  { %6375 = vmatpush1.bf16.msra.mxu0 %v8450_v8 }
 0x6f5   :  { %6376 = vmatprep.subr.bf16.mxu0 %v8455_v22  ;;  %v8507_v22 = vld [vmem:[#allocation9 + $0xda0] ss:$28 sps:$4 sm:$0xff]  }
 0x6f8   :  { %6377 = vmatpush1.bf16.msra.mxu0 %v8453_v5 }
 0x6f9   :  { %6378 = vmatprep.subr.bf16.mxu0 %v8458_v27  ;;  %v8512_v27 = vld [vmem:[#allocation9 + $0xddc] ss:$28 sps:$4 sm:$0xff]  }
 0x6fc   :  { %6379 = vmatpush1.bf16.msra.mxu0 %v8456_v41 }
 0x6fd   :  { %6380 = vmatprep.subr.bf16.mxu0 %v8461_v43 }
 0x700   :  { %6381 = vmatpush1.bf16.msra.mxu0 %v8459_v47 }
 0x701   :  { %6382 = vmatprep.subr.bf16.mxu0 %v8464_v60  ;;  %v8510_v60 = vld [vmem:[#allocation9 + $0xdd8] ss:$28 sps:$4 sm:$0xff]  }
 0x704   :  { %6383 = vmatpush1.bf16.msra.mxu0 %v8462_v11 }
 0x705   :  { %6393 = vmatprep.subr.bf16.mxu0 %v8467_v14 }
 0x707   :  { %6385 = vmatmul.mubr.bf16.vlgmr.msra.gmra.mrb[12].mxu0 %v9519_v44  ;;  %v9553_v44 = vld [vmem:[%s9600_s6] sm:$0xff] }
 0x708   :  { %6394 = vmatpush1.bf16.msra.mxu0 %v8465_v51  ;;  %6425 = vmatprep.mubr.bf16.mxu0 %v9527_v24  ;;  %v8482_v24 = vld [vmem:[#allocation9 + $0xbac] ss:$28 sps:$4 sm:$0xff]   ;;  %v3606_v48 = vrot.slane %v9553_v44, %v9427_v25  ;;  %v3610_v26 = vrot.slane %v9553_v44, %v9432_v35  ;;  %v8491_v35 = vld [vmem:[#allocation9 + $0xc54] ss:$28 sps:$4 sm:$0xff]   ;;  %v3614_v8 = vrot.slane %v9553_v44, %v9458_v1 }
 0x709   :  { %6395 = vmatprep.subr.bf16.mxu0 %v8470_v61  ;;  %v3618_v5 = vrot.slane %v9553_v44, %v9447_v49 }
 0x70c   :  { %6396 = vmatpush1.bf16.msra.mxu0 %v8468_v10 }
 0x70d   :  { %6397 = vmatprep.subr.bf16.mxu0 %v8473_v4 }
 0x710   :  { %6398 = vmatpush1.bf16.msra.mxu0 %v8471_v17 }
 0x711   :  { %6399 = vmatprep.subr.bf16.mxu0 %v8476_v21 }
 0x714   :  { %6400 = vmatpush1.bf16.msra.mxu0 %v8474_v62 }
 0x715   :  { %6401 = vmatprep.subr.bf16.mxu0 %v8479_v39 }
 0x718   :  { %6402 = vmatpush1.bf16.msra.mxu0 %v8477_v56 }
 0x719   :  { %6403 = vmatprep.subr.bf16.mxu0 %v8482_v24 }
 0x71a   :  { %v6099_v34 = vpop.f32.mrb[8].mxu0 }
 0x71b   :  { %v7731_v52 = vadd.f32 %v6099_v34, %v3606_v48  ;;  %v6101_v31 = vpop.f32.mrb[9].mxu0 }
 0x71c   :  { %v7732_v16 = vadd.f32 %v6101_v31, %v3610_v26  ;;  %6404 = vmatpush1.bf16.msra.mxu0 %v8480_v53  ;;  %v6103_v57 = vpop.f32.mrb[10].mxu0 }
 0x71d   :  { %v6594_v6 = vsub.f32 0.0, %v7731_v52  ;;  %v6104_v40 = vpop.f32.mrb[11].mxu0  ;;  %6405 = vmatprep.subr.bf16.mxu0 %v8485_v28  ;;  %v3630_v28 = vrot.slane %v9553_v44, %v1451_v0 }
 0x71e   :  { %v6595_v30 = vsub.f32 0.0, %v7732_v16 }
 0x71f   :  { %v6601_v25 = vmul.f32 1.442695, %v6594_v6 }
 0x720   :  { %v6603_v59 = vmul.f32 1.442695, %v6595_v30  ;;  %6406 = vmatpush1.bf16.msra.mxu0 %v8483_v3 }
 0x721   :  { %8513 = vpow2.f32 %v6601_v25  ;;  %6407 = vmatprep.subr.bf16.mxu0 %v8488_v19 }
 0x722   :  { %8515 = vpow2.f32 %v6603_v59 }
 0x724   :  { %6408 = vmatpush1.bf16.msra.mxu0 %v8486_v54 }
 0x725   :  { %6409 = vmatprep.subr.bf16.mxu0 %v8491_v35 }
 0x728   :  { %6410 = vmatpush1.bf16.msra.mxu0 %v8489_v32 }
 0x729   :  { %6411 = vmatprep.subr.bf16.mxu0 %v8494_v12 }
 0x72b   :  { %v8514_v33 = vpop.eup %8513 }
 0x72c   :  { %v8516_v29 = vpop.eup %8515  ;;  %v6615_v7 = vadd.f32 1.0, %v8514_v33  ;;  %6412 = vmatpush1.bf16.msra.mxu0 %v8492_v36 }
 0x72d   :  { %v6616_v45 = vadd.f32 1.0, %v8516_v29  ;;  %6413 = vmatprep.subr.bf16.mxu0 %v8497_v46 }
 0x72e   :  { %8517 = vrcp.f32 %v6615_v7 }
 0x72f   :  { %8519 = vrcp.f32 %v6616_v45 }
 0x730   :  { %6414 = vmatpush1.bf16.msra.mxu0 %v8495_v63 }
 0x731   :  { %6415 = vmatprep.subr.bf16.mxu0 %v8500_v42  ;;  %v3622_v42 = vrot.slane %v9553_v44, %v1443_v55 }
 0x734   :  { %6416 = vmatpush1.bf16.msra.mxu0 %v8498_v37  ;;  %v3626_v37 = vrot.slane %v9553_v44, %v1447_v9 }
 0x735   :  { %6417 = vmatprep.subr.bf16.mxu0 %v8503_v23 }
 0x738   :  { %v8518_v15 = vpop.eup %8517  ;;  %6418 = vmatpush1.bf16.msra.mxu0 %v8501_v2 }
 0x739   :  { %v8520_v58 = vpop.eup %8519  ;;  %6629 = vst [vmem:[%s9601_s7] sm:$0xff] %v8518_v15  ;;  %6419 = vmatprep.subr.bf16.mxu0 %v8506_v18 }
 0x73a   :  { %6630 = vst [vmem:[%s9601_s7 + $0x8] sm:$0xff] %v8520_v58 }
 0x73c   :  { %6420 = vmatpush1.bf16.msra.mxu0 %v8504_v50 }
 0x73d   :  { %6421 = vmatprep.subr.bf16.mxu0 %v8509_v13 }
 0x73f   :  { %v6263_v41 = vpop.f32.mrb[20].mxu1 }
 0x740   :  { %v7733_v43 = vadd.f32 %v6263_v41, %v3614_v8  ;;  %v6265_v47 = vpop.f32.mrb[21].mxu1  ;;  %6422 = vmatpush1.bf16.msra.mxu0 %v8507_v22 }
 0x741   :  { %v7734_v11 = vadd.f32 %v6265_v47, %v3618_v5  ;;  %v6267_v14 = vpop.f32.mrb[22].mxu1  ;;  %6423 = vmatprep.subr.bf16.mxu0 %v8512_v27 }
 0x742   :  { %v6596_v51 = vsub.f32 0.0, %v7733_v43  ;;  %v6268_v61 = vpop.f32.mrb[23].mxu1 }
 0x743   :  { %v6597_v10 = vsub.f32 0.0, %v7734_v11 }
 0x744   :  { %v6605_v4 = vmul.f32 1.442695, %v6596_v51  ;;  %6424 = vmatpush1.bf16.msra.mxu0 %v8510_v60 }
 0x745   :  { %v6607_v1 = vmul.f32 1.442695, %v6597_v10 }
 0x746   :  { %8521 = vpow2.f32 %v6605_v4 }
 0x747   :  { %8523 = vpow2.f32 %v6607_v1  ;;  %6426 = vmatmul.mubr.bf16.vlgmr.msra.gmra.mrb[12].mxu0 %v9529_v38 }
 0x750   :  { %v8522_v49 = vpop.eup %8521 }
 0x751   :  { %v8524_v17 = vpop.eup %8523  ;;  %v6617_v21 = vadd.f32 1.0, %v8522_v49 }
 0x752   :  { %v6618_v62 = vadd.f32 1.0, %v8524_v17 }
 0x753   :  { %8525 = vrcp.f32 %v6617_v21 }
 0x754   :  { %8527 = vrcp.f32 %v6618_v62 }
 0x75d   :  { %v8526_v39 = vpop.eup %8525 }
 0x75e   :  { %v8528_v56 = vpop.eup %8527  ;;  %6631 = vst [vmem:[%s9601_s7 + $0x10] sm:$0xff] %v8526_v39 }
 0x75f   :  { %6632 = vst [vmem:[%s9601_s7 + $0x18] sm:$0xff] %v8528_v56  ;;  %v7471_v24 = vpop.f32.mrb[24].mxu1 }
 0x760   :  { %v7472_v48 = vpop.f32.mrb[25].mxu1 }
 0x761   :  { %v7473_v53 = vadd.f32 %v7472_v48, %v7471_v24  ;;  %v7474_v38 = vpop.f32.mrb[26].mxu1 }
 0x762   :  { %v7475_v26 = vpop.f32.mrb[27].mxu1 }
 0x763   :  { %v6469_v31 = vadd.f32 %v7473_v53, %v3630_v28 }
 0x77f   :  { %v7493_v34 = vpop.f32.mrb[28].mxu1 }
 0x780   :  { %v7494_v52 = vpop.f32.mrb[29].mxu1 }
 0x781   :  { %v7495_v16 = vadd.f32 %v7494_v52, %v7493_v34  ;;  %v7496_v57 = vpop.f32.mrb[30].mxu1 }
 0x782   :  { %v7497_v3 = vpop.f32.mrb[31].mxu1 }
 0x783   :  { %v6509_v6 = vadd.f32 %v7495_v16, %v6469_v31 }
 0x79f   :  { %v7515_v40 = vpop.f32.mrb[32].mxu1 }
 0x7a0   :  { %v7516_v19 = vpop.f32.mrb[33].mxu1 }
 0x7a1   :  { %v7517_v30 = vadd.f32 %v7516_v19, %v7515_v40  ;;  %v7518_v25 = vpop.f32.mrb[34].mxu1 }
 0x7a2   :  { %v7519_v59 = vpop.f32.mrb[35].mxu1 }
 0x7a3   :  { %v6549_v54 = vadd.f32 %v7517_v30, %v6509_v6 }
 0x7bf   :  { %v7537_v35 = vpop.f32.mrb[36].mxu1 }
 0x7c0   :  { %v7538_v32 = vpop.f32.mrb[37].mxu1 }
 0x7c1   :  { %v7539_v12 = vadd.f32 %v7538_v32, %v7537_v35  ;;  %v7540_v36 = vpop.f32.mrb[38].mxu1 }
 0x7c2   :  { %v7541_v46 = vpop.f32.mrb[39].mxu1 }
 0x7c3   :  { %v6589_v33 = vadd.f32 %v7539_v12, %v6549_v54 }
 0x7c5   :  { %v6600_v0 = vsub.f32 0.0, %v6589_v33 }
 0x7c7   :  { %v6613_v29 = vmul.f32 1.442695, %v6600_v0 }
 0x7c9   :  { %8529 = vpow2.f32 %v6613_v29 }
 0x7d3   :  { %v8530_v7 = vpop.eup %8529 }
 0x7d4   :  { %v6621_v63 = vadd.f32 1.0, %v8530_v7 }
 0x7d6   :  { %8531 = vrcp.f32 %v6621_v63 }
 0x7e0   :  { %v8532_v45 = vpop.eup %8531 }
 0x7e1   :  { %6635 = vst [vmem:[%s9601_s7 + $0x30] sm:$0xff] %v8532_v45 }
 0x81a   :  { %v6427_v23 = vpop.f32.mrb[12].mxu0 }
 0x81b   :  { %v7735_v2 = vadd.f32 %v6427_v23, %v3622_v42  ;;  %v6429_v18 = vpop.f32.mrb[13].mxu0 }
 0x81c   :  { %v7736_v15 = vadd.f32 %v6429_v18, %v3626_v37  ;;  %v6431_v50 = vpop.f32.mrb[14].mxu0 }
 0x81d   :  { %v6598_v58 = vsub.f32 0.0, %v7735_v2  ;;  %v6432_v13 = vpop.f32.mrb[15].mxu0 }
 0x81e   :  { %v6599_v8 = vsub.f32 0.0, %v7736_v15 }
 0x81f   :  { %v6609_v22 = vmul.f32 1.442695, %v6598_v58 }
 0x820   :  { %v6611_v5 = vmul.f32 1.442695, %v6599_v8 }
 0x821   :  { %8533 = vpow2.f32 %v6609_v22 }
 0x822   :  { %8535 = vpow2.f32 %v6611_v5 }
 0x82b   :  { %v8534_v27 = vpop.eup %8533 }
 0x82c   :  { %v8536_v41 = vpop.eup %8535  ;;  %v6619_v43 = vadd.f32 1.0, %v8534_v27 }
 0x82d   :  { %v6620_v55 = vadd.f32 1.0, %v8536_v41 }
 0x82e   :  { %8537 = vrcp.f32 %v6619_v43 }
 0x82f   :  { %8539 = vrcp.f32 %v6620_v55 }
 0x838   :  { %v8538_v20 = vpop.eup %8537 }
 0x839   :  { %v8540_v9 = vpop.eup %8539  ;;  %6633 = vst [vmem:[%s9601_s7 + $0x20] sm:$0xff] %v8538_v20 }
 0x83a   :  { %6634 = vst [vmem:[%s9601_s7 + $0x28] sm:$0xff] %v8540_v9 }
 0x83b   :  { %6640 = vsyncpa [#allocation3], 1 }
 0x83c   :  { %6641 = vsyncpa [#allocation5], 1 }
 0x83d   :  { %6642 = vsyncpa [#allocation8], 1 }

</bundles_post_ra>
